<compile_context>
chip_gen: v7x
topology: tpu7x:2x2x1
jax: 0.10.0
libtpu: 0.0.40
codegen_flags: <defaults>
</compile_context>

<pallas_src>
import numpy as np
import jax
import jax.numpy as jnp
from jax.experimental import pallas as pl
from jax.experimental.pallas import tpu as pltpu

LRELU_SLOPE = 0.2
BN_EPS = 1e-5

_VMEM = pl.BlockSpec(memory_space=pltpu.MemorySpace.VMEM)


# ----------------------------- kernel helpers ------------------------------

def _leaky(v):
    return jnp.where(v > 0, v, LRELU_SLOPE * v)


def _conv_taps(src_bf16, taps_ref, n):
    """Conv layer as a sum over taps of (contiguous row slice) @ (tap matrix).

    src_bf16: ((R + pad_rows) * n, K) bf16 activation, rows ordered
              packed-H-row major, batch minor (row = r * n + b).
    taps_ref: (T, K, K_out) bf16 tap matrices (built in the wrapper).
    Returns (4n, K_out) f32 pre-activation, same row ordering.
    """
    m = 4 * n
    acc = None
    for t in range(taps_ref.shape[0]):
        lhs = src_bf16[t * n:t * n + m, :]                       # stride-1 slice
        contrib = jnp.dot(lhs, taps_ref[t],
                          preferred_element_type=jnp.float32)
        acc = contrib if acc is None else acc + contrib
    return acc


def _bn_lrelu(y, t_ref, tt_ref, g_ref, b_ref, count):
    """Training-mode BatchNorm2d (batch stats, biased var, eps=1e-5) + LeakyReLU.

    y: (4n, L) f32 where channel = lane % 16.  All stats math in f32.
    """
    t = t_ref[...]                       # (L, 16)  0/1 lane -> channel map
    tt = tt_ref[...]                     # (16, L)  its transpose
    inv_count = 1.0 / count
    s = jnp.sum(y, axis=0, keepdims=True)                         # (1, L)
    mean_c = jnp.dot(s, t, preferred_element_type=jnp.float32) * inv_count
    mean_l = jnp.dot(mean_c, tt, preferred_element_type=jnp.float32)
    d = y - mean_l
    sq = jnp.sum(d * d, axis=0, keepdims=True)                    # (1, L)
    var_c = jnp.dot(sq, t, preferred_element_type=jnp.float32) * inv_count
    inv_c = jax.lax.rsqrt(var_c + BN_EPS)
    inv_l = jnp.dot(inv_c, tt, preferred_element_type=jnp.float32)
    return _leaky(d * inv_l * g_ref[...] + b_ref[...])


def _disc_kernel(x_ref, b1_ref, b2_ref, b3_ref, v4_ref,
                 t2_ref, t2t_ref, g2_ref, be2_ref,
                 t3_ref, t3t_ref, g3_ref, be3_ref,
                 out_ref):
    n = out_ref.shape[0]

    # Layer 1: Conv(1->16, k4, s2, p1) + LeakyReLU.
    # Input  (6n, 256)  = H packed x8 (plus one zero row block top/bottom).
    # Output (4n, 1024) = H packed x4, lane = s*256 + wo*16 + c.
    a1 = _leaky(_conv_taps(x_ref[...], b1_ref, n))
    z1 = jnp.zeros((n, a1.shape[1]), jnp.bfloat16)
    a1p = jnp.concatenate([z1, a1.astype(jnp.bfloat16), z1], axis=0)   # (6n, 1024)

    # Layer 2: Conv(16->16, k4, s2, p1) + BN + LeakyReLU.
    # Output (4n, 256) = H packed x2, lane = s*128 + wo*16 + c.
    y2 = _conv_taps(a1p, b2_ref, n)
    a2 = _bn_lrelu(y2, t2_ref, t2t_ref, g2_ref, be2_ref, float(n * 8 * 8))
    z2 = jnp.zeros((n, a2.shape[1]), jnp.bfloat16)
    a2p = jnp.concatenate([z2, a2.astype(jnp.bfloat16)], axis=0)       # (5n, 256)

    # Layer 3: Conv(16->16, k3, s2, p1) + BN + LeakyReLU.
    # Output (4n, 64) = unpacked H (row = h*n + b), lane = wo*16 + c.
    y3 = _conv_taps(a2p, b3_ref, n)
    a3 = _bn_lrelu(y3, t3_ref, t3t_ref, g3_ref, be3_ref, float(n * 4 * 4))

    # Layer 4: Conv(16->1, k4, s1, p0) on the 4x4 map == full dot product.
    v4 = v4_ref[...]                                                   # (4, 64) f32
    s = (a3[0 * n:1 * n, :] * v4[0:1, :]
         + a3[1 * n:2 * n, :] * v4[1:2, :]
         + a3[2 * n:3 * n, :] * v4[2:3, :]
         + a3[3 * n:4 * n, :] * v4[3:4, :])                            # (n, 64)
    z = jnp.sum(s, axis=1, keepdims=True)                              # (n, 1)
    sig = 1.0 / (1.0 + jnp.exp(-z))                                    # exact sigmoid
    # Lane-dense output: broadcast the score across 128 lanes (unmasked store).
    out_ref[...] = jnp.broadcast_to(sig, (n, 128))


# ------------------------------- JAX wrapper --------------------------------

def _conv_tap_matrices(w_oihw, p_in, w_in, taps, stride=2, pad=1):
    """PyTorch (Cout, Cin, KH, KW) conv weight -> (taps, p_in*W_in*Cin,
    p_out*W_out*Cout) bf16 tap matrices for the packed-H lane layout.

    Input  lane = q*(W_in*Cin)  + w*Cin  + cin   (q = H offset within pack)
    Output lane = s*(W_out*Cout) + wo*Cout + cout (s = H offset within pack)
    Tap t multiplies packed input row (m + t - 1) into packed output row m;
    W-stride and W/H zero-padding are encoded by the validity of (i, j).
    """
    c_out, c_in, kh, kw = w_oihw.shape
    p_out = max(p_in // stride, 1)
    w_out = (w_in + 2 * pad - kw) // stride + 1
    shp = (taps, p_in, w_in, p_out, w_out)
    t = np.arange(taps).reshape(taps, 1, 1, 1, 1)
    q = np.arange(p_in).reshape(1, p_in, 1, 1, 1)
    wi = np.arange(w_in).reshape(1, 1, w_in, 1, 1)
    s = np.arange(p_out).reshape(1, 1, 1, p_out, 1)
    wo = np.arange(w_out).reshape(1, 1, 1, 1, w_out)
    i_idx = np.broadcast_to(q - stride * s + pad + p_in * (t - 1), shp)
    j_idx = np.broadcast_to(wi - stride * wo + pad, shp)
    # One-hot over (kh, kw); out-of-range i/j (H/W padding) match nothing -> 0.
    oh_i = (i_idx[..., None] == np.arange(kh)).astype(np.float32)      # (..., kh)
    oh_j = (j_idx[..., None] == np.arange(kw)).astype(np.float32)      # (..., kw)
    sel = oh_i[..., :, None] * oh_j[..., None, :]                      # (t,q,w,s,o,kh,kw)
    b = jnp.einsum('tqwsoij,cuij->tqwusoc', jnp.asarray(sel), w_oihw)
    b = b.reshape(taps, p_in * w_in * c_in, p_out * w_out * c_out)
    return b.astype(jnp.bfloat16)


def _lane_to_channel(n_lanes, c):
    lane = np.arange(n_lanes)
    t = ((lane[:, None] % c) == np.arange(c)[None, :]).astype(np.float32)
    return jnp.asarray(t)                                              # (L, C)


def init_params(key):
    """DCGAN-style normal(0, 0.02) init, PyTorch weight layouts."""
    ks = jax.random.split(key, 6)
    return {
        'w1': jax.random.normal(ks[0], (16, 1, 4, 4), jnp.float32) * 0.02,
        'w2': jax.random.normal(ks[1], (16, 16, 4, 4), jnp.float32) * 0.02,
        'w3': jax.random.normal(ks[2], (16, 16, 3, 3), jnp.float32) * 0.02,
        'w4': jax.random.normal(ks[3], (1, 16, 4, 4), jnp.float32) * 0.02,
        'bn2_gamma': 1.0 + jax.random.normal(ks[4], (16,), jnp.float32) * 0.02,
        'bn2_beta': jnp.zeros((16,), jnp.float32),
        'bn3_gamma': 1.0 + jax.random.normal(ks[5], (16,), jnp.float32) * 0.02,
        'bn3_beta': jnp.zeros((16,), jnp.float32),
    }


@jax.jit
def discriminator_forward(x_nchw, params):
    """x_nchw: (N, 1, 32, 32) float32 -> (N, 1) sigmoid scores."""
    n = x_nchw.shape[0]
    x = x_nchw.astype(jnp.float32)[:, 0, :, :]                        # (N, 32, 32)

    # Pack 8 H-rows into lanes: row = r*N + b, lane = q*32 + w (256 lanes),
    # plus one zero row-block top and bottom for the H zero-padding of conv1.
    xp = jnp.transpose(x.reshape(n, 4, 8 * 32), (1, 0, 2)).reshape(4 * n, 256)
    zpad = jnp.zeros((n, 256), jnp.float32)
    xpp = jnp.concatenate([zpad, xp, zpad], axis=0).astype(jnp.bfloat16)

    # Per-tap conv matrices in bf16 (MXU-native).  Total < 3.5 MiB resident.
    b1 = _conv_tap_matrices(params['w1'], p_in=8, w_in=32, taps=3)     # (3, 256, 1024)
    b2 = _conv_tap_matrices(params['w2'], p_in=4, w_in=16, taps=3)     # (3, 1024, 256)
    b3 = _conv_tap_matrices(params['w3'], p_in=2, w_in=8, taps=2)      # (2, 256,   64)
    # Final 4x4x16 -> 1x1 conv is a plain dot product over the 4x4 map (f32).
    v4 = jnp.transpose(params['w4'][0], (1, 2, 0)).reshape(4, 64)

    # BatchNorm helpers in the lane-dense layouts (channel = lane % 16).
    t2 = _lane_to_channel(256, 16)
    t3 = _lane_to_channel(64, 16)
    g2 = jnp.tile(params['bn2_gamma'], 16).reshape(1, 256)
    be2 = jnp.tile(params['bn2_beta'], 16).reshape(1, 256)
    g3 = jnp.tile(params['bn3_gamma'], 4).reshape(1, 64)
    be3 = jnp.tile(params['bn3_beta'], 4).reshape(1, 64)

    out = pl.pallas_call(
        _disc_kernel,
        out_shape=jax.ShapeDtypeStruct((n, 128), jnp.float32),
        in_specs=[_VMEM] * 13,
        out_specs=_VMEM,
        compiler_params=pltpu.CompilerParams(
            # Raise v5e's 16 MiB scoped default; stay under v7x's 64 MiB VMEM.
            vmem_limit_bytes=48 * 1024 * 1024),
    )(xpp, b1, b2, b3, v4, t2, t2.T, g2, be2, t3, t3.T, g3, be3)
    return out[:, :1]


# ------------------------- pure-JAX reference (XLA) -------------------------

def _reference_forward(x_nchw, params):
    def conv(h, w, stride, pad):
        return jax.lax.conv_general_dilated(
            h, w, (stride, stride), [(pad, pad), (pad, pad)],
            dimension_numbers=('NCHW', 'OIHW', 'NCHW'))

    def bn(h, g, b):
        mean = jnp.mean(h, axis=(0, 2, 3), keepdims=True)
        var = jnp.var(h, axis=(0, 2, 3), keepdims=True)          # biased, train mode
        hn = (h - mean) * jax.lax.rsqrt(var + BN_EPS)
        return hn * g.reshape(1, -1, 1, 1) + b.reshape(1, -1, 1, 1)

    lrelu = lambda v: jnp.where(v > 0, v, LRELU_SLOPE * v)
    h = lrelu(conv(x_nchw.astype(jnp.float32), params['w1'], 2, 1))
    h = lrelu(bn(conv(h, params['w2'], 2, 1), params['bn2_gamma'], params['bn2_beta']))
    h = lrelu(bn(conv(h, params['w3'], 2, 1), params['bn3_gamma'], params['bn3_beta']))
    h = conv(h, params['w4'], 1, 0)
    return jax.nn.sigmoid(h.reshape(x_nchw.shape[0], -1))


if __name__ == '__main__':
    key = jax.random.PRNGKey(0)
    k_in, k_par = jax.random.split(key)

    batch = 2
    x = jax.random.normal(k_in, (batch, 1, 32, 32), jnp.float32)
    params = init_params(k_par)

    out = jax.block_until_ready(discriminator_forward(x, params))
    ref = _reference_forward(x, params)

    assert out.shape == (batch, 1), out.shape
    assert bool(jnp.all(jnp.isfinite(out)))
    assert bool(jnp.all((out >= 0.0) & (out <= 1.0)))
    err = float(jnp.max(jnp.abs(out - ref)))
    assert err < 1.5e-2, f"max abs err vs reference: {err}"
    print("KERNEL_OK")
</pallas_src>

<mosaic_0001>
module attributes {stable_mosaic.version = 11 : i64} {
  func.func @_disc_kernel(%arg0: memref<12x256xbf16, #tpu.memory_space<vmem>>, %arg1: memref<3x256x1024xbf16, #tpu.memory_space<vmem>>, %arg2: memref<3x1024x256xbf16, #tpu.memory_space<vmem>>, %arg3: memref<2x256x64xbf16, #tpu.memory_space<vmem>>, %arg4: memref<4x64xf32, #tpu.memory_space<vmem>>, %arg5: memref<256x16xf32, #tpu.memory_space<vmem>>, %arg6: memref<16x256xf32, #tpu.memory_space<vmem>>, %arg7: memref<1x256xf32, #tpu.memory_space<vmem>>, %arg8: memref<1x256xf32, #tpu.memory_space<vmem>>, %arg9: memref<64x16xf32, #tpu.memory_space<vmem>>, %arg10: memref<16x64xf32, #tpu.memory_space<vmem>>, %arg11: memref<1x64xf32, #tpu.memory_space<vmem>>, %arg12: memref<1x64xf32, #tpu.memory_space<vmem>>, %arg13: memref<2x128xf32, #tpu.memory_space<vmem>>) attributes {dimension_semantics = [], scalar_prefetch = 0 : i64, scratch_operands = 0 : i64, tpu.core_type = #tpu.core_type<tc>} {
    %c0 = arith.constant 0 : index
    %c0_0 = arith.constant 0 : index
    %0 = vector.load %arg0[%c0, %c0_0] : memref<12x256xbf16, #tpu.memory_space<vmem>>, vector<12x256xbf16>
    %1 = vector.extract_strided_slice %0 {offsets = [0, 0], sizes = [8, 256], strides = [1, 1]} : vector<12x256xbf16> to vector<8x256xbf16>
    %c0_1 = arith.constant 0 : index
    %c0_2 = arith.constant 0 : index
    %c0_3 = arith.constant 0 : index
    %2 = vector.load %arg1[%c0_1, %c0_2, %c0_3] : memref<3x256x1024xbf16, #tpu.memory_space<vmem>>, vector<1x256x1024xbf16>
    %3 = vector.shape_cast %2 : vector<1x256x1024xbf16> to vector<256x1024xbf16>
    %cst = arith.constant dense<0.000000e+00> : vector<8x1024xf32>
    %4 = tpu.matmul %1, %3, %cst {dimension_numbers = #tpu.dot_dimension_numbers<[1], [0], [0], [1], [0, 0, 1, 1], [], []>} : vector<8x256xbf16>, vector<256x1024xbf16>, vector<8x1024xf32> -> vector<8x1024xf32>
    %5 = vector.extract_strided_slice %0 {offsets = [2, 0], sizes = [8, 256], strides = [1, 1]} : vector<12x256xbf16> to vector<8x256xbf16>
    %c1 = arith.constant 1 : index
    %c0_4 = arith.constant 0 : index
    %c0_5 = arith.constant 0 : index
    %6 = vector.load %arg1[%c1, %c0_4, %c0_5] : memref<3x256x1024xbf16, #tpu.memory_space<vmem>>, vector<1x256x1024xbf16>
    %7 = vector.shape_cast %6 : vector<1x256x1024xbf16> to vector<256x1024xbf16>
    %cst_6 = arith.constant dense<0.000000e+00> : vector<8x1024xf32>
    %8 = tpu.matmul %5, %7, %cst_6 {dimension_numbers = #tpu.dot_dimension_numbers<[1], [0], [0], [1], [0, 0, 1, 1], [], []>} : vector<8x256xbf16>, vector<256x1024xbf16>, vector<8x1024xf32> -> vector<8x1024xf32>
    %9 = arith.addf %4, %8 : vector<8x1024xf32>
    %10 = vector.extract_strided_slice %0 {offsets = [4, 0], sizes = [8, 256], strides = [1, 1]} : vector<12x256xbf16> to vector<8x256xbf16>
    %c2 = arith.constant 2 : index
    %c0_7 = arith.constant 0 : index
    %c0_8 = arith.constant 0 : index
    %11 = vector.load %arg1[%c2, %c0_7, %c0_8] : memref<3x256x1024xbf16, #tpu.memory_space<vmem>>, vector<1x256x1024xbf16>
    %12 = vector.shape_cast %11 : vector<1x256x1024xbf16> to vector<256x1024xbf16>
    %cst_9 = arith.constant dense<0.000000e+00> : vector<8x1024xf32>
    %13 = tpu.matmul %10, %12, %cst_9 {dimension_numbers = #tpu.dot_dimension_numbers<[1], [0], [0], [1], [0, 0, 1, 1], [], []>} : vector<8x256xbf16>, vector<256x1024xbf16>, vector<8x1024xf32> -> vector<8x1024xf32>
    %14 = arith.addf %9, %13 : vector<8x1024xf32>
    %cst_10 = arith.constant 0.000000e+00 : f32
    %15 = vector.broadcast %cst_10 : f32 to vector<8x1024xf32>
    %16 = arith.cmpf ogt, %14, %15 : vector<8x1024xf32>
    %cst_11 = arith.constant 2.000000e-01 : f32
    %17 = vector.broadcast %cst_11 : f32 to vector<8x1024xf32>
    %18 = arith.mulf %17, %14 : vector<8x1024xf32>
    %19 = arith.select %16, %14, %18 : vector<8x1024xi1>, vector<8x1024xf32>
    %cst_12 = arith.constant 0.000000e+00 : bf16
    %20 = vector.broadcast %cst_12 : bf16 to vector<2x1024xbf16>
    %21 = arith.truncf %19 : vector<8x1024xf32> to vector<8x1024xbf16>
    %22 = tpu.concatenate %20, %21, %20 in 0 : vector<2x1024xbf16>, vector<8x1024xbf16>, vector<2x1024xbf16> -> vector<12x1024xbf16>
    %23 = vector.extract_strided_slice %22 {offsets = [0, 0], sizes = [8, 1024], strides = [1, 1]} : vector<12x1024xbf16> to vector<8x1024xbf16>
    %c0_13 = arith.constant 0 : index
    %c0_14 = arith.constant 0 : index
    %c0_15 = arith.constant 0 : index
    %24 = vector.load %arg2[%c0_13, %c0_14, %c0_15] : memref<3x1024x256xbf16, #tpu.memory_space<vmem>>, vector<1x1024x256xbf16>
    %25 = vector.shape_cast %24 : vector<1x1024x256xbf16> to vector<1024x256xbf16>
    %cst_16 = arith.constant dense<0.000000e+00> : vector<8x256xf32>
    %26 = tpu.matmul %23, %25, %cst_16 {dimension_numbers = #tpu.dot_dimension_numbers<[1], [0], [0], [1], [0, 0, 1, 1], [], []>} : vector<8x1024xbf16>, vector<1024x256xbf16>, vector<8x256xf32> -> vector<8x256xf32>
    %27 = vector.extract_strided_slice %22 {offsets = [2, 0], sizes = [8, 1024], strides = [1, 1]} : vector<12x1024xbf16> to vector<8x1024xbf16>
    %c1_17 = arith.constant 1 : index
    %c0_18 = arith.constant 0 : index
    %c0_19 = arith.constant 0 : index
    %28 = vector.load %arg2[%c1_17, %c0_18, %c0_19] : memref<3x1024x256xbf16, #tpu.memory_space<vmem>>, vector<1x1024x256xbf16>
    %29 = vector.shape_cast %28 : vector<1x1024x256xbf16> to vector<1024x256xbf16>
    %cst_20 = arith.constant dense<0.000000e+00> : vector<8x256xf32>
    %30 = tpu.matmul %27, %29, %cst_20 {dimension_numbers = #tpu.dot_dimension_numbers<[1], [0], [0], [1], [0, 0, 1, 1], [], []>} : vector<8x1024xbf16>, vector<1024x256xbf16>, vector<8x256xf32> -> vector<8x256xf32>
    %31 = arith.addf %26, %30 : vector<8x256xf32>
    %32 = vector.extract_strided_slice %22 {offsets = [4, 0], sizes = [8, 1024], strides = [1, 1]} : vector<12x1024xbf16> to vector<8x1024xbf16>
    %c2_21 = arith.constant 2 : index
    %c0_22 = arith.constant 0 : index
    %c0_23 = arith.constant 0 : index
    %33 = vector.load %arg2[%c2_21, %c0_22, %c0_23] : memref<3x1024x256xbf16, #tpu.memory_space<vmem>>, vector<1x1024x256xbf16>
    %34 = vector.shape_cast %33 : vector<1x1024x256xbf16> to vector<1024x256xbf16>
    %cst_24 = arith.constant dense<0.000000e+00> : vector<8x256xf32>
    %35 = tpu.matmul %32, %34, %cst_24 {dimension_numbers = #tpu.dot_dimension_numbers<[1], [0], [0], [1], [0, 0, 1, 1], [], []>} : vector<8x1024xbf16>, vector<1024x256xbf16>, vector<8x256xf32> -> vector<8x256xf32>
    %36 = arith.addf %31, %35 : vector<8x256xf32>
    %c0_25 = arith.constant 0 : index
    %c0_26 = arith.constant 0 : index
    %37 = vector.load %arg5[%c0_25, %c0_26] : memref<256x16xf32, #tpu.memory_space<vmem>>, vector<256x16xf32>
    %c0_27 = arith.constant 0 : index
    %c0_28 = arith.constant 0 : index
    %38 = vector.load %arg6[%c0_27, %c0_28] : memref<16x256xf32, #tpu.memory_space<vmem>>, vector<16x256xf32>
    %cst_29 = arith.constant dense<0.000000e+00> : vector<256xf32>
    %39 = vector.multi_reduction <add>, %36, %cst_29 [0] : vector<8x256xf32> to vector<256xf32>
    %40 = vector.shape_cast %39 : vector<256xf32> to vector<1x256xf32>
    %cst_30 = arith.constant dense<0.000000e+00> : vector<1x16xf32>
    %41 = tpu.matmul %40, %37, %cst_30 {dimension_numbers = #tpu.dot_dimension_numbers<[1], [0], [0], [1], [0, 0, 1, 1], [], []>} : vector<1x256xf32>, vector<256x16xf32>, vector<1x16xf32> -> vector<1x16xf32>
    %cst_31 = arith.constant 7.812500e-03 : f32
    %42 = vector.broadcast %cst_31 : f32 to vector<1x16xf32>
    %43 = arith.mulf %41, %42 : vector<1x16xf32>
    %cst_32 = arith.constant dense<0.000000e+00> : vector<1x256xf32>
    %44 = tpu.matmul %43, %38, %cst_32 {dimension_numbers = #tpu.dot_dimension_numbers<[1], [0], [0], [1], [0, 0, 1, 1], [], []>} : vector<1x16xf32>, vector<16x256xf32>, vector<1x256xf32> -> vector<1x256xf32>
    %45 = vector.broadcast %44 : vector<1x256xf32> to vector<8x256xf32>
    %46 = arith.subf %36, %45 : vector<8x256xf32>
    %47 = arith.mulf %46, %46 : vector<8x256xf32>
    %cst_33 = arith.constant dense<0.000000e+00> : vector<256xf32>
    %48 = vector.multi_reduction <add>, %47, %cst_33 [0] : vector<8x256xf32> to vector<256xf32>
    %49 = vector.shape_cast %48 : vector<256xf32> to vector<1x256xf32>
    %cst_34 = arith.constant dense<0.000000e+00> : vector<1x16xf32>
    %50 = tpu.matmul %49, %37, %cst_34 {dimension_numbers = #tpu.dot_dimension_numbers<[1], [0], [0], [1], [0, 0, 1, 1], [], []>} : vector<1x256xf32>, vector<256x16xf32>, vector<1x16xf32> -> vector<1x16xf32>
    %cst_35 = arith.constant 7.812500e-03 : f32
    %51 = vector.broadcast %cst_35 : f32 to vector<1x16xf32>
    %52 = arith.mulf %50, %51 : vector<1x16xf32>
    %cst_36 = arith.constant 9.99999974E-6 : f32
    %53 = vector.broadcast %cst_36 : f32 to vector<1x16xf32>
    %54 = arith.addf %52, %53 : vector<1x16xf32>
    %55 = math.rsqrt %54 : vector<1x16xf32>
    %cst_37 = arith.constant dense<0.000000e+00> : vector<1x256xf32>
    %56 = tpu.matmul %55, %38, %cst_37 {dimension_numbers = #tpu.dot_dimension_numbers<[1], [0], [0], [1], [0, 0, 1, 1], [], []>} : vector<1x16xf32>, vector<16x256xf32>, vector<1x256xf32> -> vector<1x256xf32>
    %57 = vector.broadcast %56 : vector<1x256xf32> to vector<8x256xf32>
    %58 = arith.mulf %46, %57 : vector<8x256xf32>
    %c0_38 = arith.constant 0 : index
    %c0_39 = arith.constant 0 : index
    %59 = vector.load %arg7[%c0_38, %c0_39] : memref<1x256xf32, #tpu.memory_space<vmem>>, vector<1x256xf32>
    %60 = vector.broadcast %59 : vector<1x256xf32> to vector<8x256xf32>
    %61 = arith.mulf %58, %60 : vector<8x256xf32>
    %c0_40 = arith.constant 0 : index
    %c0_41 = arith.constant 0 : index
    %62 = vector.load %arg8[%c0_40, %c0_41] : memref<1x256xf32, #tpu.memory_space<vmem>>, vector<1x256xf32>
    %63 = vector.broadcast %62 : vector<1x256xf32> to vector<8x256xf32>
    %64 = arith.addf %61, %63 : vector<8x256xf32>
    %cst_42 = arith.constant 0.000000e+00 : f32
    %65 = vector.broadcast %cst_42 : f32 to vector<8x256xf32>
    %66 = arith.cmpf ogt, %64, %65 : vector<8x256xf32>
    %cst_43 = arith.constant 2.000000e-01 : f32
    %67 = vector.broadcast %cst_43 : f32 to vector<8x256xf32>
    %68 = arith.mulf %67, %64 : vector<8x256xf32>
    %69 = arith.select %66, %64, %68 : vector<8x256xi1>, vector<8x256xf32>
    %cst_44 = arith.constant 0.000000e+00 : bf16
    %70 = vector.broadcast %cst_44 : bf16 to vector<2x256xbf16>
    %71 = arith.truncf %69 : vector<8x256xf32> to vector<8x256xbf16>
    %72 = tpu.concatenate %70, %71 in 0 : vector<2x256xbf16>, vector<8x256xbf16> -> vector<10x256xbf16>
    %73 = vector.extract_strided_slice %72 {offsets = [0, 0], sizes = [8, 256], strides = [1, 1]} : vector<10x256xbf16> to vector<8x256xbf16>
    %c0_45 = arith.constant 0 : index
    %c0_46 = arith.constant 0 : index
    %c0_47 = arith.constant 0 : index
    %74 = vector.load %arg3[%c0_45, %c0_46, %c0_47] : memref<2x256x64xbf16, #tpu.memory_space<vmem>>, vector<1x256x64xbf16>
    %75 = vector.shape_cast %74 : vector<1x256x64xbf16> to vector<256x64xbf16>
    %cst_48 = arith.constant dense<0.000000e+00> : vector<8x64xf32>
    %76 = tpu.matmul %73, %75, %cst_48 {dimension_numbers = #tpu.dot_dimension_numbers<[1], [0], [0], [1], [0, 0, 1, 1], [], []>} : vector<8x256xbf16>, vector<256x64xbf16>, vector<8x64xf32> -> vector<8x64xf32>
    %77 = vector.extract_strided_slice %72 {offsets = [2, 0], sizes = [8, 256], strides = [1, 1]} : vector<10x256xbf16> to vector<8x256xbf16>
    %c1_49 = arith.constant 1 : index
    %c0_50 = arith.constant 0 : index
    %c0_51 = arith.constant 0 : index
    %78 = vector.load %arg3[%c1_49, %c0_50, %c0_51] : memref<2x256x64xbf16, #tpu.memory_space<vmem>>, vector<1x256x64xbf16>
    %79 = vector.shape_cast %78 : vector<1x256x64xbf16> to vector<256x64xbf16>
    %cst_52 = arith.constant dense<0.000000e+00> : vector<8x64xf32>
    %80 = tpu.matmul %77, %79, %cst_52 {dimension_numbers = #tpu.dot_dimension_numbers<[1], [0], [0], [1], [0, 0, 1, 1], [], []>} : vector<8x256xbf16>, vector<256x64xbf16>, vector<8x64xf32> -> vector<8x64xf32>
    %81 = arith.addf %76, %80 : vector<8x64xf32>
    %c0_53 = arith.constant 0 : index
    %c0_54 = arith.constant 0 : index
    %82 = vector.load %arg9[%c0_53, %c0_54] : memref<64x16xf32, #tpu.memory_space<vmem>>, vector<64x16xf32>
    %c0_55 = arith.constant 0 : index
    %c0_56 = arith.constant 0 : index
    %83 = vector.load %arg10[%c0_55, %c0_56] : memref<16x64xf32, #tpu.memory_space<vmem>>, vector<16x64xf32>
    %cst_57 = arith.constant dense<0.000000e+00> : vector<64xf32>
    %84 = vector.multi_reduction <add>, %81, %cst_57 [0] : vector<8x64xf32> to vector<64xf32>
    %85 = vector.shape_cast %84 : vector<64xf32> to vector<1x64xf32>
    %cst_58 = arith.constant dense<0.000000e+00> : vector<1x16xf32>
    %86 = tpu.matmul %85, %82, %cst_58 {dimension_numbers = #tpu.dot_dimension_numbers<[1], [0], [0], [1], [0, 0, 1, 1], [], []>} : vector<1x64xf32>, vector<64x16xf32>, vector<1x16xf32> -> vector<1x16xf32>
    %cst_59 = arith.constant 3.125000e-02 : f32
    %87 = vector.broadcast %cst_59 : f32 to vector<1x16xf32>
    %88 = arith.mulf %86, %87 : vector<1x16xf32>
    %cst_60 = arith.constant dense<0.000000e+00> : vector<1x64xf32>
    %89 = tpu.matmul %88, %83, %cst_60 {dimension_numbers = #tpu.dot_dimension_numbers<[1], [0], [0], [1], [0, 0, 1, 1], [], []>} : vector<1x16xf32>, vector<16x64xf32>, vector<1x64xf32> -> vector<1x64xf32>
    %90 = vector.broadcast %89 : vector<1x64xf32> to vector<8x64xf32>
    %91 = arith.subf %81, %90 : vector<8x64xf32>
    %92 = arith.mulf %91, %91 : vector<8x64xf32>
    %cst_61 = arith.constant dense<0.000000e+00> : vector<64xf32>
    %93 = vector.multi_reduction <add>, %92, %cst_61 [0] : vector<8x64xf32> to vector<64xf32>
    %94 = vector.shape_cast %93 : vector<64xf32> to vector<1x64xf32>
    %cst_62 = arith.constant dense<0.000000e+00> : vector<1x16xf32>
    %95 = tpu.matmul %94, %82, %cst_62 {dimension_numbers = #tpu.dot_dimension_numbers<[1], [0], [0], [1], [0, 0, 1, 1], [], []>} : vector<1x64xf32>, vector<64x16xf32>, vector<1x16xf32> -> vector<1x16xf32>
    %cst_63 = arith.constant 3.125000e-02 : f32
    %96 = vector.broadcast %cst_63 : f32 to vector<1x16xf32>
    %97 = arith.mulf %95, %96 : vector<1x16xf32>
    %cst_64 = arith.constant 9.99999974E-6 : f32
    %98 = vector.broadcast %cst_64 : f32 to vector<1x16xf32>
    %99 = arith.addf %97, %98 : vector<1x16xf32>
    %100 = math.rsqrt %99 : vector<1x16xf32>
    %cst_65 = arith.constant dense<0.000000e+00> : vector<1x64xf32>
    %101 = tpu.matmul %100, %83, %cst_65 {dimension_numbers = #tpu.dot_dimension_numbers<[1], [0], [0], [1], [0, 0, 1, 1], [], []>} : vector<1x16xf32>, vector<16x64xf32>, vector<1x64xf32> -> vector<1x64xf32>
    %102 = vector.broadcast %101 : vector<1x64xf32> to vector<8x64xf32>
    %103 = arith.mulf %91, %102 : vector<8x64xf32>
    %c0_66 = arith.constant 0 : index
    %c0_67 = arith.constant 0 : index
    %104 = vector.load %arg11[%c0_66, %c0_67] : memref<1x64xf32, #tpu.memory_space<vmem>>, vector<1x64xf32>
    %105 = vector.broadcast %104 : vector<1x64xf32> to vector<8x64xf32>
    %106 = arith.mulf %103, %105 : vector<8x64xf32>
    %c0_68 = arith.constant 0 : index
    %c0_69 = arith.constant 0 : index
    %107 = vector.load %arg12[%c0_68, %c0_69] : memref<1x64xf32, #tpu.memory_space<vmem>>, vector<1x64xf32>
    %108 = vector.broadcast %107 : vector<1x64xf32> to vector<8x64xf32>
    %109 = arith.addf %106, %108 : vector<8x64xf32>
    %cst_70 = arith.constant 0.000000e+00 : f32
    %110 = vector.broadcast %cst_70 : f32 to vector<8x64xf32>
    %111 = arith.cmpf ogt, %109, %110 : vector<8x64xf32>
    %cst_71 = arith.constant 2.000000e-01 : f32
    %112 = vector.broadcast %cst_71 : f32 to vector<8x64xf32>
    %113 = arith.mulf %112, %109 : vector<8x64xf32>
    %114 = arith.select %111, %109, %113 : vector<8x64xi1>, vector<8x64xf32>
    %c0_72 = arith.constant 0 : index
    %c0_73 = arith.constant 0 : index
    %115 = vector.load %arg4[%c0_72, %c0_73] : memref<4x64xf32, #tpu.memory_space<vmem>>, vector<4x64xf32>
    %116 = vector.extract_strided_slice %114 {offsets = [0, 0], sizes = [2, 64], strides = [1, 1]} : vector<8x64xf32> to vector<2x64xf32>
    %117 = vector.extract_strided_slice %115 {offsets = [0, 0], sizes = [1, 64], strides = [1, 1]} : vector<4x64xf32> to vector<1x64xf32>
    %118 = vector.broadcast %117 : vector<1x64xf32> to vector<2x64xf32>
    %119 = arith.mulf %116, %118 : vector<2x64xf32>
    %120 = vector.extract_strided_slice %114 {offsets = [2, 0], sizes = [2, 64], strides = [1, 1]} : vector<8x64xf32> to vector<2x64xf32>
    %121 = vector.extract_strided_slice %115 {offsets = [1, 0], sizes = [1, 64], strides = [1, 1]} : vector<4x64xf32> to vector<1x64xf32>
    %122 = vector.broadcast %121 : vector<1x64xf32> to vector<2x64xf32>
    %123 = arith.mulf %120, %122 : vector<2x64xf32>
    %124 = arith.addf %119, %123 : vector<2x64xf32>
    %125 = vector.extract_strided_slice %114 {offsets = [4, 0], sizes = [2, 64], strides = [1, 1]} : vector<8x64xf32> to vector<2x64xf32>
    %126 = vector.extract_strided_slice %115 {offsets = [2, 0], sizes = [1, 64], strides = [1, 1]} : vector<4x64xf32> to vector<1x64xf32>
    %127 = vector.broadcast %126 : vector<1x64xf32> to vector<2x64xf32>
    %128 = arith.mulf %125, %127 : vector<2x64xf32>
    %129 = arith.addf %124, %128 : vector<2x64xf32>
    %130 = vector.extract_strided_slice %114 {offsets = [6, 0], sizes = [2, 64], strides = [1, 1]} : vector<8x64xf32> to vector<2x64xf32>
    %131 = vector.extract_strided_slice %115 {offsets = [3, 0], sizes = [1, 64], strides = [1, 1]} : vector<4x64xf32> to vector<1x64xf32>
    %132 = vector.broadcast %131 : vector<1x64xf32> to vector<2x64xf32>
    %133 = arith.mulf %130, %132 : vector<2x64xf32>
    %134 = arith.addf %129, %133 : vector<2x64xf32>
    %cst_74 = arith.constant dense<0.000000e+00> : vector<2xf32>
    %135 = vector.multi_reduction <add>, %134, %cst_74 [1] : vector<2x64xf32> to vector<2xf32>
    %136 = vector.shape_cast %135 : vector<2xf32> to vector<2x1xf32>
    %cst_75 = arith.constant 0.000000e+00 : f32
    %137 = vector.broadcast %cst_75 : f32 to vector<2x1xf32>
    %138 = arith.subf %137, %136 : vector<2x1xf32>
    %139 = math.exp %138 : vector<2x1xf32>
    %cst_76 = arith.constant 1.000000e+00 : f32
    %140 = vector.broadcast %cst_76 : f32 to vector<2x1xf32>
    %141 = arith.addf %140, %139 : vector<2x1xf32>
    %cst_77 = arith.constant 1.000000e+00 : f32
    %142 = vector.broadcast %cst_77 : f32 to vector<2x1xf32>
    %143 = arith.divf %142, %141 : vector<2x1xf32>
    %144 = vector.shape_cast %143 : vector<2x1xf32> to vector<2x1xf32>
    %145 = vector.broadcast %144 : vector<2x1xf32> to vector<2x128xf32>
    %c0_78 = arith.constant 0 : index
    %c0_79 = arith.constant 0 : index
    %146 = vector.load %arg13[%c0_78, %c0_79] : memref<2x128xf32, #tpu.memory_space<vmem>>, vector<2x128xf32>
    tpu.vector_store %arg13[%c0_78, %c0_79], %145 {strides = array<i32>} : memref<2x128xf32, #tpu.memory_space<vmem>>, vector<2x128xf32>,
    return
  }
}

</mosaic_0001>

<bundles_post_ra>
// kernel: squeeze.0
= control target key start
LH: loop header
LB: loop body
LE: loop exit
PB: predicated region body
PF: predicated region fallthrough
CT: control target
= control target key end

     0   :  { %vm153_vm0 = vcmask 1047556   ;;  %vm130_vm1 = vcmask 261120   ;;  %s309_s14 = smov 64   ;;  %s310_s15 = smov 32   ;;  %vm157_vm2 = vcmask 1048320   ;;  %vm182_vm3 = vcmask 785920   ;;  %s360_s0 = inlined_call_operand.vmem [shape: bf16[2,1,32,32], index: 0, kind: input, shape index: {}]   ;;  %s361_s1 = inlined_call_operand.vmem [shape: bf16[2,4,256], index: 1, kind: output, shape index: {}]  }
   0x1   :  { %v286_v0 = vld [vmem:[%s360_s0 + $0x18] sm:$0xff]   ;;  %v287_v1 = vld [vmem:[%s360_s0 + $0x10] sm:$0xff]   ;;  %v288_v2 = vld [vmem:[%s360_s0 + $0x8] sm:$0xff]   ;;  %vm207_vm4 = vcmask 523520   ;;  %v311_v47 = vmov 0.0  }
   0x2   :  { %v272_v3 = vunpack.c.l.bf16 %v286_v0  ;;  %v273_v4 = vunpack.c.h.bf16 %v286_v0  ;;  %v276_v5 = vunpack.c.l.bf16 %v287_v1  ;;  %v277_v6 = vunpack.c.h.bf16 %v287_v1  ;;  %v283_v7 = vld [vmem:[%s360_s0] sm:$0xff]   ;;  %s308_s0 = smov 96  }
   0x3   :  { %v280_v8 = vunpack.c.l.bf16 %v288_v2  ;;  %v281_v9 = vunpack.c.h.bf16 %v288_v2  ;;  %v284_v10 = vunpack.c.l.bf16 %v283_v7  ;;  %v285_v11 = vunpack.c.h.bf16 %v283_v7 }
   0x4   :  { %20 = vst [vmem:[#allocation1 + $0x38] sm:$0xff] %v273_v4  ;;  %36 = vst [vmem:[#allocation1 + $0x30] sm:$0xff] %v272_v3 }
   0x5   :  { %52 = vst [vmem:[#allocation1 + $0x28] sm:$0xff] %v277_v6  ;;  %68 = vst [vmem:[#allocation1 + $0x20] sm:$0xff] %v276_v5 }
   0x6   :  { %84 = vst [vmem:[#allocation1 + $0x18] sm:$0xff] %v281_v9  ;;  %100 = vst [vmem:[#allocation1 + $0x10] sm:$0xff] %v280_v8 }
   0x7   :  { %115 = vst [vmem:[#allocation1 + $0x8] sm:$0xff] %v285_v11  ;;  %128 = vst [vmem:[#allocation1] sm:$0xff] %v284_v10 }
   0xc   :  { %v162_v12 = vld [vmem:[#allocation1 + $0x23] ss:$8 sm:$0xf]   ;;  %v164_v13 = vld [vmem:[#allocation1 + $0x7] ss:$8 sm:$0xf0]  }
   0xd   :  { %v166_v16 = vsel %vm153_vm0, %v164_v13, %v162_v12  ;;  %v187_v22 = vld [vmem:[#allocation1 + $0x22] ss:$8 sm:$0xf]   ;;  %v189_v23 = vld [vmem:[#allocation1 + $0x6] ss:$8 sm:$0xf0]  }
   0xe   :  { %v150_v14 = vld [vmem:[#allocation1 + $0x3] ss:$8 sm:$0xf]   ;;  %v152_v15 = vld [vmem:[#allocation1 - $0x19] ss:$8 sm:$0xf0]   ;;  %v191_v24 = vsel %vm153_vm0, %v189_v23, %v187_v22 }
   0xf   :  { %v154_v17 = vsel %vm153_vm0, %v152_v15, %v150_v14  ;;  %v175_v18 = vld [vmem:[#allocation1 + $0x2] ss:$8 sm:$0xf]   ;;  %v177_v19 = vld [vmem:[#allocation1 - $0x1a] ss:$8 sm:$0xf0]  }
  0x10   :  { %v293_v20 = vpack.i.bf16 %v166_v16, %v154_v17  ;;  %v179_v21 = vsel %vm153_vm0, %v177_v19, %v175_v18  ;;  %v200_v25 = vld [vmem:[#allocation1 + $0x1] ss:$8 sm:$0xf]   ;;  %v202_v26 = vld [vmem:[#allocation1 - $0x1b] ss:$8 sm:$0xf0]  }
  0x11   :  { %v298_v27 = vpack.i.bf16 %v191_v24, %v179_v21  ;;  %v204_v28 = vsel %vm153_vm0, %v202_v26, %v200_v25  ;;  %v212_v29 = vld [vmem:[#allocation1 + $0x21] ss:$8 sm:$0xf]   ;;  %v214_v30 = vld [vmem:[#allocation1 + $0x5] ss:$8 sm:$0xf0]  }
  0x12   :  { %294 = vrot.lane.b32.xlu0 %v293_v20, %s308_s0  ;;  %v216_v31 = vsel %vm153_vm0, %v214_v30, %v212_v29  ;;  %v129_v32 = vld [vmem:[#allocation1] ss:$4 sm:$0xff]  }
  0x13   :  { %v139_v33 = vld [vmem:[#allocation1 + $0x20] ss:$4 sm:$0xff]   ;;  %v303_v34 = vpack.i.bf16 %v216_v31, %v204_v28  ;;  %131 = vst.msk [vmem:[#allocation0] ss:$8 sm:$0x3] %vm130_vm1, %v129_v32  }
  0x14   :  { %133 = vst.msk [vmem:[#allocation0 - $0xf] ss:$8 sm:$0xc] %vm130_vm1, %v129_v32   ;;  %135 = vst.msk [vmem:[#allocation0 - $0x1e] ss:$8 sm:$0x30] %vm130_vm1, %v129_v32  }
  0x15   :  { %137 = vst.msk [vmem:[#allocation0 - $0x2d] ss:$8 sm:$0xc0] %vm130_vm1, %v129_v32   ;;  %142 = vst.msk [vmem:[#allocation0 + $0x10] ss:$8 sm:$0x3] %vm130_vm1, %v139_v33   ;;  %304 = vrot.lane.b32.xlu1 %v303_v34, %s310_s15 }
  0x16   :  { %144 = vst.msk [vmem:[#allocation0 + $0x1] ss:$8 sm:$0xc] %vm130_vm1, %v139_v33   ;;  %146 = vst.msk [vmem:[#allocation0 - $0xe] ss:$8 sm:$0x30] %vm130_vm1, %v139_v33   ;;  %299 = vrot.lane.b32.xlu0 %v298_v27, %s309_s14 }
  0x17   :  { %148 = vst.msk [vmem:[#allocation0 - $0x1d] ss:$8 sm:$0xc0] %vm130_vm1, %v139_v33  }
  0x84   :  { %v295_v35 = vpop.permute.xlu0 %294 }
  0x85   :  { %v297_v36 = vunpack.i.h.bf16 %v295_v35  ;;  %v296_v37 = vunpack.i.l.bf16 %v295_v35 }
  0x87   :  { %158 = vst.msk [vmem:[#allocation0] sm:$0xf] %vm157_vm2, %v296_v37   ;;  %160 = vst.msk [vmem:[#allocation0 + $0x4] sm:$0xf0] %vm157_vm2, %v296_v37   ;;  %v305_v39 = vpop.permute.xlu1 %304 }
  0x88   :  { %171 = vst.msk [vmem:[#allocation0 + $0x10] sm:$0xf] %vm157_vm2, %v297_v36   ;;  %173 = vst.msk [vmem:[#allocation0 + $0x14] sm:$0xf0] %vm157_vm2, %v297_v36   ;;  %v300_v38 = vpop.permute.xlu0 %299  ;;  %v307_v42 = vunpack.i.h.bf16 %v305_v39  ;;  %v306_v43 = vunpack.i.l.bf16 %v305_v39 }
  0x89   :  { %v302_v40 = vunpack.i.h.bf16 %v300_v38  ;;  %v301_v41 = vunpack.i.l.bf16 %v300_v38 }
  0x8b   :  { %183 = vst.msk [vmem:[#allocation0] sm:$0xf] %vm182_vm3, %v301_v41   ;;  %185 = vst.msk [vmem:[#allocation0 + $0x4] sm:$0xf0] %vm182_vm3, %v301_v41  }
  0x8c   :  { %196 = vst.msk [vmem:[#allocation0 + $0x10] sm:$0xf] %vm182_vm3, %v302_v40   ;;  %198 = vst.msk [vmem:[#allocation0 + $0x14] sm:$0xf0] %vm182_vm3, %v302_v40  }
  0x8d   :  { %208 = vst.msk [vmem:[#allocation0] sm:$0xf] %vm207_vm4, %v306_v43   ;;  %210 = vst.msk [vmem:[#allocation0 + $0x4] sm:$0xf0] %vm207_vm4, %v306_v43  }
  0x8e   :  { %221 = vst.msk [vmem:[#allocation0 + $0x10] sm:$0xf] %vm207_vm4, %v307_v42   ;;  %223 = vst.msk [vmem:[#allocation0 + $0x14] sm:$0xf0] %vm207_vm4, %v307_v42  }
  0x94   :  { %v228_v44 = vld [vmem:[#allocation0] sm:$0xf]  ;;  %v233_v45 = vld [vmem:[#allocation0 + $0x8] sm:$0xf] }
  0x95   :  { %v239_v46 = vld [vmem:[#allocation0 + $0x10] sm:$0xf]  ;;  %v229_v48 = vpack.c.bf16 %v311_v47, %v228_v44  ;;  %v234_v49 = vpack.c.bf16 %v311_v47, %v233_v45  ;;  %v246_v51 = vld [vmem:[#allocation0 + $0x18] sm:$0xf] }
  0x96   :  { %v240_v50 = vpack.c.bf16 %v311_v47, %v239_v46  ;;  %v247_v52 = vpack.c.bf16 %v311_v47, %v246_v51 }
  0x97   :  { %231 = vst [vmem:[%s361_s1] sm:$0x3] %v229_v48  ;;  %267 = vst [vmem:[%s361_s1 + $0x2] sm:$0x3] %v234_v49 }
  0x98   :  { %268 = vst [vmem:[%s361_s1 + $0x4] sm:$0x3] %v240_v50  ;;  %269 = vst [vmem:[%s361_s1 + $0x6] sm:$0x3] %v247_v52 }

// kernel: tile.23
= control target key start
LH: loop header
LB: loop body
LE: loop exit
PB: predicated region body
PF: predicated region fallthrough
CT: control target
= control target key end

     0   :  { %s28_s0 = inlined_call_operand.vmem [shape: f32[16], index: 0, kind: input, shape index: {}]   ;;  %s29_s1 = inlined_call_operand.vmem [shape: f32[16,16], index: 1, kind: output, shape index: {}]  }
   0x1   :  { %v4_v0 = vld [vmem:[%s28_s0] ss:$0 sm:$0xff] }
   0x2   :  { %5 = vst [vmem:[%s29_s1] sm:$0xff] %v4_v0  ;;  %8 = vst [vmem:[%s29_s1 + $0x8] sm:$0xff] %v4_v0 }

// kernel: tile.24
= control target key start
LH: loop header
LB: loop body
LE: loop exit
PB: predicated region body
PF: predicated region fallthrough
CT: control target
= control target key end

     0   :  { %s7_s6 = smov 3  ;;  %s21_s9 = smov 3  ;;  %vm4_vm0 = vcmask 130048   ;;  %vm11_vm1 = vcmask 1048448   ;;  %vm18_vm2 = vcmask 917248   ;;  %vm25_vm3 = vcmask 786048   ;;  %s128_s0 = inlined_call_operand.vmem [shape: f32[16,16], index: 0, kind: input, shape index: {}]   ;;  %s129_s1 = inlined_call_operand.vmem [shape: f32[1,256], index: 1, kind: output, shape index: {}]  }
   0x1   :  { %v66_v0 = vld [vmem:[%s128_s0 + $0x7] ss:$8 sm:%s7_s6]   ;;  %s81_s10 = smov 112   ;;  %v68_v1 = vld [vmem:[%s128_s0 + $0x5] ss:$8 sm:%s21_s9]   ;;  %s14_s13 = smov 3 }
   0x2   :  { %9 = vrot.lane.b32.xlu0 %v66_v0, %s81_s10  ;;  %s82_s14 = smov 80   ;;  %v67_v2 = vld [vmem:[%s128_s0 + $0x6] ss:$8 sm:%s14_s13]   ;;  %s28_s17 = smov 3  ;;  %vm32_vm4 = vcmask 654848   ;;  %vm39_vm5 = vcmask 523648  }
   0x3   :  { %23 = vrot.lane.b32.xlu1 %v68_v1, %s82_s14  ;;  %v69_v3 = vld [vmem:[%s128_s0 + $0x4] ss:$8 sm:%s28_s17]   ;;  %s35_s20 = smov 3  ;;  %s42_s21 = smov 3  ;;  %vm46_vm6 = vcmask 392448   ;;  %vm53_vm7 = vcmask 261248  }
   0x4   :  { %s83_s22 = smov 96   ;;  %s84_s23 = smov 64   ;;  %v70_v4 = vld [vmem:[%s128_s0 + $0x3] ss:$8 sm:%s35_s20]   ;;  %v71_v5 = vld [vmem:[%s128_s0 + $0x2] ss:$8 sm:%s42_s21]  }
   0x5   :  { %s2_s26 = smov 3  ;;  %s49_s29 = smov 3 }
   0x6   :  { %16 = vrot.lane.b32.xlu0 %v67_v2, %s83_s22  ;;  %v3_v6 = vld [vmem:[%s128_s0] ss:$8 sm:%s2_s26]   ;;  %s85_s3 = smov 48   ;;  %s86_s4 = smov 32  }
   0x7   :  { %30 = vrot.lane.b32.xlu1 %v69_v3, %s84_s23  ;;  %5 = vst.msk [vmem:[#allocation0] ss:$8 sm:$0x3] %vm4_vm0, %v3_v6   ;;  %v72_v7 = vld [vmem:[%s128_s0 + $0x1] ss:$8 sm:%s49_s29]   ;;  %s87_s0 = smov 16  }
   0xa   :  { %37 = vrot.lane.b32.xlu0 %v70_v4, %s85_s3 }
   0xb   :  { %44 = vrot.lane.b32.xlu1 %v71_v5, %s86_s4 }
   0xe   :  { %51 = vrot.lane.b32.xlu0 %v72_v7, %s87_s0 }
  0x74   :  { %v10_v8 = vpop.permute.xlu0 %9  }
  0x75   :  { %12 = vst.msk [vmem:[#allocation0] ss:$8 sm:$0x3] %vm11_vm1, %v10_v8   ;;  %v24_v9 = vpop.permute.xlu1 %23  }
  0x78   :  { %v17_v10 = vpop.permute.xlu0 %16  }
  0x79   :  { %19 = vst.msk [vmem:[#allocation0] ss:$8 sm:$0x3] %vm18_vm2, %v17_v10   ;;  %v31_v11 = vpop.permute.xlu1 %30  }
  0x7a   :  { %26 = vst.msk [vmem:[#allocation0] ss:$8 sm:$0x3] %vm25_vm3, %v24_v9  }
  0x7b   :  { %33 = vst.msk [vmem:[#allocation0] ss:$8 sm:$0x3] %vm32_vm4, %v31_v11  }
  0x7c   :  { %v38_v12 = vpop.permute.xlu0 %37  }
  0x7d   :  { %40 = vst.msk [vmem:[#allocation0] ss:$8 sm:$0x3] %vm39_vm5, %v38_v12   ;;  %v45_v13 = vpop.permute.xlu1 %44  }
  0x7e   :  { %47 = vst.msk [vmem:[#allocation0] ss:$8 sm:$0x3] %vm46_vm6, %v45_v13  }
  0x80   :  { %v52_v14 = vpop.permute.xlu0 %51  }
  0x81   :  { %54 = vst.msk [vmem:[#allocation0] ss:$8 sm:$0x3] %vm53_vm7, %v52_v14  }
  0x88   :  { %v58_v15 = vld [vmem:[#allocation0] sm:$0x1]  ;;  %v62_v16 = vld [vmem:[#allocation0 + $0x8] sm:$0x1] }
  0x89   :  { %60 = vst [vmem:[%s129_s1] sm:$0x1] %v58_v15  ;;  %73 = vst [vmem:[%s129_s1 + $0x1] sm:$0x1] %v62_v16 }

// kernel: tile.33
= control target key start
LH: loop header
LB: loop body
LE: loop exit
PB: predicated region body
PF: predicated region fallthrough
CT: control target
= control target key end

     0   :  { %s22_s0 = inlined_call_operand.vmem [shape: f32[16], index: 0, kind: input, shape index: {}]   ;;  %s23_s1 = inlined_call_operand.vmem [shape: f32[4,16], index: 1, kind: output, shape index: {}]  }
   0x1   :  { %v4_v0 = vld [vmem:[%s22_s0] ss:$0 sm:$0xff] }
   0x2   :  { %5 = vst [vmem:[%s23_s1] sm:$0xf] %v4_v0 }

// kernel: tile.34
= control target key start
LH: loop header
LB: loop body
LE: loop exit
PB: predicated region body
PF: predicated region fallthrough
CT: control target
= control target key end

     0   :  { %vm7_vm0 = vcmask 130048   ;;  %s37_s8 = smov 16   ;;  %s38_s9 = smov 32   ;;  %vm13_vm1 = vcmask 523648   ;;  %vm19_vm2 = vcmask 392448   ;;  %vm25_vm3 = vcmask 261248   ;;  %s55_s0 = inlined_call_operand.vmem [shape: f32[4,16], index: 0, kind: input, shape index: {}]   ;;  %s56_s1 = inlined_call_operand.vmem [shape: f32[1,64], index: 1, kind: output, shape index: {}]  }
   0x1   :  { %v4_v0 = vld [vmem:[%s55_s0] sm:$0xf]  ;;  %s36_s0 = smov 48  }
   0x2   :  { %5 = vst [vmem:[#allocation1] sm:$0xf] %v4_v0 }
   0x9   :  { %v10_v1 = vld [vmem:[#allocation1 + $0x3] sm:$0x1]   ;;  %v22_v2 = vld [vmem:[#allocation1 + $0x1] sm:$0x1]   ;;  %v6_v3 = vld [vmem:[#allocation1] sm:$0x1]  }
   0xa   :  { %11 = vrot.lane.b32.xlu0 %v10_v1, %s36_s0  ;;  %23 = vrot.lane.b32.xlu1 %v22_v2, %s37_s8  ;;  %v16_v4 = vld [vmem:[#allocation1 + $0x2] sm:$0x1]   ;;  %8 = vst.msk [vmem:[#allocation0] sm:$0x1] %vm7_vm0, %v6_v3  }
   0xe   :  { %17 = vrot.lane.b32.xlu0 %v16_v4, %s38_s9 }
  0x7c   :  { %v12_v5 = vpop.permute.xlu0 %11   ;;  %v24_v6 = vpop.permute.xlu1 %23  }
  0x7d   :  { %14 = vst.msk [vmem:[#allocation0] sm:$0x1] %vm13_vm1, %v12_v5  }
  0x80   :  { %v18_v7 = vpop.permute.xlu0 %17  }
  0x81   :  { %20 = vst.msk [vmem:[#allocation0] sm:$0x1] %vm19_vm2, %v18_v7  }
  0x82   :  { %26 = vst.msk [vmem:[#allocation0] sm:$0x1] %vm25_vm3, %v24_v6  }
  0x89   :  { %v30_v8 = vld [vmem:[#allocation0] sm:$0x1] }
  0x8a   :  { %32 = vst [vmem:[%s56_s1] sm:$0x1] %v30_v8 }

// kernel: discriminator_forward.1
= control target key start
LH: loop header
LB: loop body
LE: loop exit
PB: predicated region body
PF: predicated region fallthrough
CT: control target
= control target key end

     0   :  { %vm2921_vm2 = vcmask 1040384   ;;  %vm2939_vm3 = vcmask 1044480   ;;  %vm5915_vm10 = vcmask 130048   ;;  %vm9319_vm14 = vmmov 0   ;;  %s12231_s1 = inlined_call_operand.vmem [shape: bf16[3,256,1024], index: 1, kind: input, shape index: {}]   ;;  %s12232_s0 = inlined_call_operand.vmem [shape: bf16[12,256], index: 0, kind: input, shape index: {}]   ;;  %s12233_s2 = inlined_call_operand.vmem [shape: bf16[3,1024,256], index: 2, kind: input, shape index: {}]   ;;  %s12234_s5 = inlined_call_operand.vmem [shape: f32[256,16], index: 5, kind: input, shape index: {}]   ;;  %s12235_s6 = inlined_call_operand.vmem [shape: f32[16,256], index: 6, kind: input, shape index: {}]   ;;  %s12236_s3 = inlined_call_operand.vmem [shape: bf16[2,256,64], index: 3, kind: input, shape index: {}]   ;;  %s12237_s7 = inlined_call_operand.vmem [shape: f32[1,256], index: 7, kind: input, shape index: {}]   ;;  %s12238_s8 = inlined_call_operand.vmem [shape: f32[1,256], index: 8, kind: input, shape index: {}]   ;;  %s12239_s9 = inlined_call_operand.vmem [shape: f32[64,16], index: 9, kind: input, shape index: {}]   ;;  %s12240_s10 = inlined_call_operand.vmem [shape: f32[16,64], index: 10, kind: input, shape index: {}]   ;;  %s12241_s11 = inlined_call_operand.vmem [shape: f32[1,64], index: 11, kind: input, shape index: {}]   ;;  %s12242_s12 = inlined_call_operand.vmem [shape: f32[1,64], index: 12, kind: input, shape index: {}]   ;;  %s12243_s4 = inlined_call_operand.vmem [shape: f32[4,64], index: 4, kind: input, shape index: {}]   ;;  %s12244_s13 = inlined_call_operand.vmem [shape: f32[2,128], index: 13, kind: output, shape index: {}]  }
   0x1   :  { %v6959_v0 = vld [vmem:[%s12231_s1 + $0x400] sm:$0xff]  ;;  %v9428_v18 = vld [vmem:[%s12232_s0 + $0x8] sm:$0x33]  ;;  %vm12119_vm13 = vmneg %vm2921_vm2  ;;  %vm6570_vm15 = vcmask 523264  }
   0x2   :  { %v6963_v1 = vld [vmem:[%s12231_s1 + $0x420] sm:$0xff] }
   0x3   :  { %v6967_v2 = vld [vmem:[%s12231_s1 + $0x440] sm:$0xff]  ;;  %v7090_v3 = vcombine.high %v6959_v0, %v6963_v1  ;;  %v7089_v4 = vcombine.low %v6959_v0, %v6963_v1 }
   0x4   :  { %v6971_v5 = vld [vmem:[%s12231_s1 + $0x460] sm:$0xff] }
   0x5   :  { %v7098_v6 = vcombine.high %v6967_v2, %v6971_v5  ;;  %v6975_v7 = vld [vmem:[%s12231_s1 + $0x480] sm:$0xff]  ;;  %956 = vmatprep.subr.bf16.mxu1 %v7090_v3  ;;  %v7097_v9 = vcombine.low %v6967_v2, %v6971_v5  ;;  %v6960_v3 = vld [vmem:[%s12231_s1 + $0x408] sm:$0xff] }
   0x6   :  { %v6979_v8 = vld [vmem:[%s12231_s1 + $0x4a0] sm:$0xff]  ;;  %957 = vmatpush1.bf16.msra.mxu1 %v7089_v4  ;;  %v6964_v4 = vld [vmem:[%s12231_s1 + $0x428] sm:$0xff] }
   0x7   :  { %958 = vmatprep.subr.bf16.mxu1 %v7098_v6  ;;  %v7106_v10 = vcombine.high %v6975_v7, %v6979_v8  ;;  %v6983_v11 = vld [vmem:[%s12231_s1 + $0x4c0] sm:$0xff]  ;;  %v7105_v13 = vcombine.low %v6975_v7, %v6979_v8  ;;  %v7092_v7 = vcombine.high %v6960_v3, %v6964_v4  ;;  %v6968_v8 = vld [vmem:[%s12231_s1 + $0x448] sm:$0xff] }
   0x8   :  { %v6987_v12 = vld [vmem:[%s12231_s1 + $0x4e0] sm:$0xff] }
   0x9   :  { %v7114_v14 = vcombine.high %v6983_v11, %v6987_v12  ;;  %v6991_v15 = vld [vmem:[%s12231_s1 + $0x500] sm:$0xff]  ;;  %v7113_v19 = vcombine.low %v6983_v11, %v6987_v12  ;;  %v7091_v11 = vcombine.low %v6960_v3, %v6964_v4  ;;  %v7080_v4 = vld [vmem:[%s12231_s1 + $0x7c8] sm:$0xff] }
   0xa   :  { %959 = vmatpush1.bf16.msra.mxu1 %v7097_v9  ;;  %v6995_v16 = vld [vmem:[%s12231_s1 + $0x520] sm:$0xff]  ;;  %v6972_v9 = vld [vmem:[%s12231_s1 + $0x468] sm:$0xff] }
   0xb   :  { %960 = vmatprep.subr.bf16.mxu1 %v7106_v10  ;;  %v9423_v17 = vld [vmem:[%s12232_s0] sm:$0xff]  ;;  %v7122_v21 = vcombine.high %v6991_v15, %v6995_v16  ;;  %v7121_v25 = vcombine.low %v6991_v15, %v6995_v16  ;;  %v7100_v12 = vcombine.high %v6968_v8, %v6972_v9  ;;  %v7099_v15 = vcombine.low %v6968_v8, %v6972_v9  ;;  %v6961_v9 = vld [vmem:[%s12231_s1 + $0x410] sm:$0xff] }
   0xc   :  { %v9432_v20 = vcombine.high %v9423_v17, %v9428_v18  ;;  %v6999_v22 = vld [vmem:[%s12231_s1 + $0x540] sm:$0xff]  ;;  %v9512_v5 = vcombine.low %v9423_v17, %v9428_v18  ;;  %v6984_v18 = vld [vmem:[%s12231_s1 + $0x4c8] sm:$0xff] }
   0xd   :  { %v7003_v23 = vld [vmem:[%s12231_s1 + $0x560] sm:$0xff] }
   0xe   :  { %961 = vmatpush1.bf16.msra.mxu1 %v7105_v13  ;;  %v9441_v24 = vrot.slane %v9432_v20, 1  ;;  %v7130_v26 = vcombine.high %v6999_v22, %v7003_v23  ;;  %v7007_v27 = vld [vmem:[%s12231_s1 + $0x580] sm:$0xff]  ;;  %v7129_v29 = vcombine.low %v6999_v22, %v7003_v23  ;;  %v9521_v10 = vrot.slane %v9512_v5, 1  ;;  %v6976_v13 = vld [vmem:[%s12231_s1 + $0x488] sm:$0xff] }
   0xf   :  { %962 = vmatprep.subr.bf16.mxu1 %v7114_v14  ;;  %v7011_v28 = vld [vmem:[%s12231_s1 + $0x5a0] sm:$0xff]  ;;  %v6980_v14 = vld [vmem:[%s12231_s1 + $0x4a8] sm:$0xff] }
  0x10   :  { %988 = vmatprep.mubr.bf16.mxu1 %v9441_v24  ;;  %v7138_v30 = vcombine.high %v7007_v27, %v7011_v28  ;;  %v7015_v31 = vld [vmem:[%s12231_s1 + $0x5c0] sm:$0xff]  ;;  %v7137_v33 = vcombine.low %v7007_v27, %v7011_v28  ;;  %v7108_v16 = vcombine.high %v6976_v13, %v6980_v14  ;;  %v6992_v23 = vld [vmem:[%s12231_s1 + $0x508] sm:$0xff] }
  0x11   :  { %v7019_v32 = vld [vmem:[%s12231_s1 + $0x5e0] sm:$0xff]  ;;  %v7000_v28 = vld [vmem:[%s12231_s1 + $0x548] sm:$0xff] }
  0x12   :  { %963 = vmatpush1.bf16.msra.mxu1 %v7113_v19  ;;  %v7146_v34 = vcombine.high %v7015_v31, %v7019_v32  ;;  %v7023_v35 = vld [vmem:[%s12231_s1 + $0x600] sm:$0xff]  ;;  %v7145_v37 = vcombine.low %v7015_v31, %v7019_v32  ;;  %v6988_v19 = vld [vmem:[%s12231_s1 + $0x4e8] sm:$0xff] }
  0x13   :  { %964 = vmatprep.subr.bf16.mxu1 %v7122_v21  ;;  %v7027_v36 = vld [vmem:[%s12231_s1 + $0x620] sm:$0xff]  ;;  %v7107_v21 = vcombine.low %v6976_v13, %v6980_v14  ;;  %v7116_v22 = vcombine.high %v6984_v18, %v6988_v19  ;;  %v7008_v32 = vld [vmem:[%s12231_s1 + $0x588] sm:$0xff]  ;;  %v6969_v14 = vld [vmem:[%s12231_s1 + $0x450] sm:$0xff] }
  0x14   :  { %v7154_v38 = vcombine.high %v7023_v35, %v7027_v36  ;;  %v7031_v39 = vld [vmem:[%s12231_s1 + $0x640] sm:$0xff]  ;;  %v7153_v41 = vcombine.low %v7023_v35, %v7027_v36  ;;  %v7016_v36 = vld [vmem:[%s12231_s1 + $0x5c8] sm:$0xff] }
  0x15   :  { %v7035_v40 = vld [vmem:[%s12231_s1 + $0x660] sm:$0xff] }
  0x16   :  { %965 = vmatpush1.bf16.msra.mxu1 %v7121_v25  ;;  %v7162_v42 = vcombine.high %v7031_v39, %v7035_v40  ;;  %v7039_v43 = vld [vmem:[%s12231_s1 + $0x680] sm:$0xff]  ;;  %v7161_v45 = vcombine.low %v7031_v39, %v7035_v40  ;;  %v6996_v25 = vld [vmem:[%s12231_s1 + $0x528] sm:$0xff] }
  0x17   :  { %966 = vmatprep.subr.bf16.mxu1 %v7130_v26  ;;  %v7043_v44 = vld [vmem:[%s12231_s1 + $0x6a0] sm:$0xff]  ;;  %v7115_v26 = vcombine.low %v6984_v18, %v6988_v19  ;;  %v7124_v27 = vcombine.high %v6992_v23, %v6996_v25  ;;  %v7024_v40 = vld [vmem:[%s12231_s1 + $0x608] sm:$0xff]  ;;  %v6977_v19 = vld [vmem:[%s12231_s1 + $0x490] sm:$0xff] }
  0x18   :  { %v7170_v46 = vcombine.high %v7039_v43, %v7043_v44  ;;  %v7047_v47 = vld [vmem:[%s12231_s1 + $0x6c0] sm:$0xff]  ;;  %v7169_v49 = vcombine.low %v7039_v43, %v7043_v44  ;;  %v7032_v44 = vld [vmem:[%s12231_s1 + $0x648] sm:$0xff] }
  0x19   :  { %v7051_v48 = vld [vmem:[%s12231_s1 + $0x6e0] sm:$0xff] }
  0x1a   :  { %967 = vmatpush1.bf16.msra.mxu1 %v7129_v29  ;;  %v7178_v50 = vcombine.high %v7047_v47, %v7051_v48  ;;  %v7055_v51 = vld [vmem:[%s12231_s1 + $0x700] sm:$0xff]  ;;  %v7177_v53 = vcombine.low %v7047_v47, %v7051_v48  ;;  %v7004_v29 = vld [vmem:[%s12231_s1 + $0x568] sm:$0xff] }
  0x1b   :  { %968 = vmatprep.subr.bf16.mxu1 %v7138_v30  ;;  %v7059_v52 = vld [vmem:[%s12231_s1 + $0x720] sm:$0xff]  ;;  %v7123_v30 = vcombine.low %v6992_v23, %v6996_v25  ;;  %v7132_v31 = vcombine.high %v7000_v28, %v7004_v29  ;;  %v7040_v48 = vld [vmem:[%s12231_s1 + $0x688] sm:$0xff]  ;;  %v6985_v25 = vld [vmem:[%s12231_s1 + $0x4d0] sm:$0xff] }
  0x1c   :  { %v7186_v54 = vcombine.high %v7055_v51, %v7059_v52  ;;  %v7063_v55 = vld [vmem:[%s12231_s1 + $0x740] sm:$0xff]  ;;  %v7185_v57 = vcombine.low %v7055_v51, %v7059_v52  ;;  %v7048_v52 = vld [vmem:[%s12231_s1 + $0x6c8] sm:$0xff] }
  0x1d   :  { %v7067_v56 = vld [vmem:[%s12231_s1 + $0x760] sm:$0xff] }
  0x1e   :  { %969 = vmatpush1.bf16.msra.mxu1 %v7137_v33  ;;  %v7194_v58 = vcombine.high %v7063_v55, %v7067_v56  ;;  %v7071_v59 = vld [vmem:[%s12231_s1 + $0x780] sm:$0xff]  ;;  %v7193_v61 = vcombine.low %v7063_v55, %v7067_v56  ;;  %v7012_v33 = vld [vmem:[%s12231_s1 + $0x5a8] sm:$0xff] }
  0x1f   :  { %970 = vmatprep.subr.bf16.mxu1 %v7146_v34  ;;  %v7075_v60 = vld [vmem:[%s12231_s1 + $0x7a0] sm:$0xff]  ;;  %v7131_v34 = vcombine.low %v7000_v28, %v7004_v29  ;;  %v7140_v35 = vcombine.high %v7008_v32, %v7012_v33  ;;  %v7056_v56 = vld [vmem:[%s12231_s1 + $0x708] sm:$0xff]  ;;  %v6993_v29 = vld [vmem:[%s12231_s1 + $0x510] sm:$0xff] }
  0x20   :  { %v7202_v62 = vcombine.high %v7071_v59, %v7075_v60  ;;  %v7079_v63 = vld [vmem:[%s12231_s1 + $0x7c0] sm:$0xff]  ;;  %v7201_v1 = vcombine.low %v7071_v59, %v7075_v60  ;;  %v7064_v60 = vld [vmem:[%s12231_s1 + $0x748] sm:$0xff] }
  0x21   :  { %v7083_v0 = vld [vmem:[%s12231_s1 + $0x7e0] sm:$0xff] }
  0x22   :  { %971 = vmatpush1.bf16.msra.mxu1 %v7145_v37  ;;  %v7210_v2 = vcombine.high %v7079_v63, %v7083_v0  ;;  %v7209_v6 = vcombine.low %v7079_v63, %v7083_v0  ;;  %v7020_v37 = vld [vmem:[%s12231_s1 + $0x5e8] sm:$0xff] }
  0x23   :  { %972 = vmatprep.subr.bf16.mxu1 %v7154_v38  ;;  %v7139_v38 = vcombine.low %v7008_v32, %v7012_v33  ;;  %v7148_v39 = vcombine.high %v7016_v36, %v7020_v37  ;;  %v7072_v0 = vld [vmem:[%s12231_s1 + $0x788] sm:$0xff]  ;;  %v7001_v33 = vld [vmem:[%s12231_s1 + $0x550] sm:$0xff] }
  0x26   :  { %973 = vmatpush1.bf16.msra.mxu1 %v7153_v41  ;;  %v7028_v41 = vld [vmem:[%s12231_s1 + $0x628] sm:$0xff] }
  0x27   :  { %974 = vmatprep.subr.bf16.mxu1 %v7162_v42  ;;  %v7147_v42 = vcombine.low %v7016_v36, %v7020_v37  ;;  %v7156_v43 = vcombine.high %v7024_v40, %v7028_v41  ;;  %v7009_v37 = vld [vmem:[%s12231_s1 + $0x590] sm:$0xff] }
  0x2a   :  { %975 = vmatpush1.bf16.msra.mxu1 %v7161_v45  ;;  %v7036_v45 = vld [vmem:[%s12231_s1 + $0x668] sm:$0xff] }
  0x2b   :  { %976 = vmatprep.subr.bf16.mxu1 %v7170_v46  ;;  %v7155_v46 = vcombine.low %v7024_v40, %v7028_v41  ;;  %v7164_v47 = vcombine.high %v7032_v44, %v7036_v45  ;;  %v7017_v41 = vld [vmem:[%s12231_s1 + $0x5d0] sm:$0xff] }
  0x2e   :  { %977 = vmatpush1.bf16.msra.mxu1 %v7169_v49  ;;  %v7044_v49 = vld [vmem:[%s12231_s1 + $0x6a8] sm:$0xff] }
  0x2f   :  { %978 = vmatprep.subr.bf16.mxu1 %v7178_v50  ;;  %v7163_v50 = vcombine.low %v7032_v44, %v7036_v45  ;;  %v7172_v51 = vcombine.high %v7040_v48, %v7044_v49  ;;  %v7025_v45 = vld [vmem:[%s12231_s1 + $0x610] sm:$0xff] }
  0x32   :  { %979 = vmatpush1.bf16.msra.mxu1 %v7177_v53  ;;  %v7052_v53 = vld [vmem:[%s12231_s1 + $0x6e8] sm:$0xff] }
  0x33   :  { %980 = vmatprep.subr.bf16.mxu1 %v7186_v54  ;;  %v7171_v54 = vcombine.low %v7040_v48, %v7044_v49  ;;  %v7180_v55 = vcombine.high %v7048_v52, %v7052_v53  ;;  %v7033_v49 = vld [vmem:[%s12231_s1 + $0x650] sm:$0xff] }
  0x36   :  { %981 = vmatpush1.bf16.msra.mxu1 %v7185_v57  ;;  %v7060_v57 = vld [vmem:[%s12231_s1 + $0x728] sm:$0xff] }
  0x37   :  { %982 = vmatprep.subr.bf16.mxu1 %v7194_v58  ;;  %v7179_v58 = vcombine.low %v7048_v52, %v7052_v53  ;;  %v7188_v59 = vcombine.high %v7056_v56, %v7060_v57  ;;  %v7041_v53 = vld [vmem:[%s12231_s1 + $0x690] sm:$0xff] }
  0x3a   :  { %983 = vmatpush1.bf16.msra.mxu1 %v7193_v61  ;;  %v7068_v61 = vld [vmem:[%s12231_s1 + $0x768] sm:$0xff] }
  0x3b   :  { %984 = vmatprep.subr.bf16.mxu1 %v7202_v62  ;;  %v7187_v62 = vcombine.low %v7056_v56, %v7060_v57  ;;  %v7196_v63 = vcombine.high %v7064_v60, %v7068_v61  ;;  %v7049_v57 = vld [vmem:[%s12231_s1 + $0x6d0] sm:$0xff] }
  0x3e   :  { %985 = vmatpush1.bf16.msra.mxu1 %v7201_v1  ;;  %v7076_v1 = vld [vmem:[%s12231_s1 + $0x7a8] sm:$0xff] }
  0x3f   :  { %986 = vmatprep.subr.bf16.mxu1 %v7210_v2  ;;  %v7195_v2 = vcombine.low %v7064_v60, %v7068_v61  ;;  %v7204_v3 = vcombine.high %v7072_v0, %v7076_v1  ;;  %v7057_v61 = vld [vmem:[%s12231_s1 + $0x710] sm:$0xff] }
  0x42   :  { %987 = vmatpush1.bf16.msra.mxu1 %v7209_v6  ;;  %v7084_v6 = vld [vmem:[%s12231_s1 + $0x7e8] sm:$0xff] }
  0x43   :  { %997 = vmatprep.subr.bf16.mxu1 %v7092_v7  ;;  %v7203_v7 = vcombine.low %v7072_v0, %v7076_v1  ;;  %v7212_v8 = vcombine.high %v7080_v4, %v7084_v6  ;;  %v7065_v1 = vld [vmem:[%s12231_s1 + $0x750] sm:$0xff] }
  0x45   :  { %989 = vmatmul.mubr.bf16.vlgmr.msra.gmra.mrb[0].mxu1 %v9521_v10 }
  0x46   :  { %998 = vmatpush1.bf16.msra.mxu1 %v7091_v11  ;;  %1029 = vmatprep.mubr.bf16.mxu1 %v9441_v24  ;;  %v6965_v11 = vld [vmem:[%s12231_s1 + $0x430] sm:$0xff] }
  0x47   :  { %999 = vmatprep.subr.bf16.mxu1 %v7100_v12  ;;  %v7211_v12 = vcombine.low %v7080_v4, %v7084_v6  ;;  %v7094_v13 = vcombine.high %v6961_v9, %v6965_v11  ;;  %v7073_v6 = vld [vmem:[%s12231_s1 + $0x790] sm:$0xff] }
  0x4a   :  { %1000 = vmatpush1.bf16.msra.mxu1 %v7099_v15  ;;  %v6973_v15 = vld [vmem:[%s12231_s1 + $0x470] sm:$0xff] }
  0x4b   :  { %1001 = vmatprep.subr.bf16.mxu1 %v7108_v16  ;;  %v7093_v16 = vcombine.low %v6961_v9, %v6965_v11  ;;  %v7102_v18 = vcombine.high %v6969_v14, %v6973_v15  ;;  %v7081_v11 = vld [vmem:[%s12231_s1 + $0x7d0] sm:$0xff] }
  0x4e   :  { %1002 = vmatpush1.bf16.msra.mxu1 %v7107_v21  ;;  %v6981_v21 = vld [vmem:[%s12231_s1 + $0x4b0] sm:$0xff] }
  0x4f   :  { %1003 = vmatprep.subr.bf16.mxu1 %v7116_v22  ;;  %v7101_v22 = vcombine.low %v6969_v14, %v6973_v15  ;;  %v7110_v23 = vcombine.high %v6977_v19, %v6981_v21  ;;  %v6962_v15 = vld [vmem:[%s12231_s1 + $0x418] sm:$0xff] }
  0x52   :  { %1004 = vmatpush1.bf16.msra.mxu1 %v7115_v26  ;;  %v6989_v26 = vld [vmem:[%s12231_s1 + $0x4f0] sm:$0xff] }
  0x53   :  { %1005 = vmatprep.subr.bf16.mxu1 %v7124_v27  ;;  %v7109_v27 = vcombine.low %v6977_v19, %v6981_v21  ;;  %v7118_v28 = vcombine.high %v6985_v25, %v6989_v26  ;;  %v6970_v21 = vld [vmem:[%s12231_s1 + $0x458] sm:$0xff] }
  0x56   :  { %1006 = vmatpush1.bf16.msra.mxu1 %v7123_v30  ;;  %v6997_v30 = vld [vmem:[%s12231_s1 + $0x530] sm:$0xff] }
  0x57   :  { %1007 = vmatprep.subr.bf16.mxu1 %v7132_v31  ;;  %v7117_v31 = vcombine.low %v6985_v25, %v6989_v26  ;;  %v7126_v32 = vcombine.high %v6993_v29, %v6997_v30  ;;  %v6978_v26 = vld [vmem:[%s12231_s1 + $0x498] sm:$0xff] }
  0x5a   :  { %1008 = vmatpush1.bf16.msra.mxu1 %v7131_v34  ;;  %v7005_v34 = vld [vmem:[%s12231_s1 + $0x570] sm:$0xff] }
  0x5b   :  { %1009 = vmatprep.subr.bf16.mxu1 %v7140_v35  ;;  %v7125_v35 = vcombine.low %v6993_v29, %v6997_v30  ;;  %v7134_v36 = vcombine.high %v7001_v33, %v7005_v34  ;;  %v6986_v30 = vld [vmem:[%s12231_s1 + $0x4d8] sm:$0xff] }
  0x5e   :  { %1010 = vmatpush1.bf16.msra.mxu1 %v7139_v38  ;;  %v7013_v38 = vld [vmem:[%s12231_s1 + $0x5b0] sm:$0xff] }
  0x5f   :  { %1011 = vmatprep.subr.bf16.mxu1 %v7148_v39  ;;  %v7133_v39 = vcombine.low %v7001_v33, %v7005_v34  ;;  %v7142_v40 = vcombine.high %v7009_v37, %v7013_v38  ;;  %v6994_v34 = vld [vmem:[%s12231_s1 + $0x518] sm:$0xff] }
  0x62   :  { %1012 = vmatpush1.bf16.msra.mxu1 %v7147_v42  ;;  %v7021_v42 = vld [vmem:[%s12231_s1 + $0x5f0] sm:$0xff] }
  0x63   :  { %1013 = vmatprep.subr.bf16.mxu1 %v7156_v43  ;;  %v7141_v43 = vcombine.low %v7009_v37, %v7013_v38  ;;  %v7150_v44 = vcombine.high %v7017_v41, %v7021_v42  ;;  %v7002_v37 = vld [vmem:[%s12231_s1 + $0x558] sm:$0xff] }
  0x64   :  { %v7006_v38 = vld [vmem:[%s12231_s1 + $0x578] sm:$0xff] }
  0x66   :  { %1014 = vmatpush1.bf16.msra.mxu1 %v7155_v46  ;;  %v7029_v46 = vld [vmem:[%s12231_s1 + $0x630] sm:$0xff] }
  0x67   :  { %1015 = vmatprep.subr.bf16.mxu1 %v7164_v47  ;;  %v7149_v47 = vcombine.low %v7017_v41, %v7021_v42  ;;  %v7158_v48 = vcombine.high %v7025_v45, %v7029_v46  ;;  %v7010_v41 = vld [vmem:[%s12231_s1 + $0x598] sm:$0xff] }
  0x68   :  { %v7014_v42 = vld [vmem:[%s12231_s1 + $0x5b8] sm:$0xff] }
  0x6a   :  { %1016 = vmatpush1.bf16.msra.mxu1 %v7163_v50  ;;  %v7037_v50 = vld [vmem:[%s12231_s1 + $0x670] sm:$0xff] }
  0x6b   :  { %1017 = vmatprep.subr.bf16.mxu1 %v7172_v51  ;;  %v7157_v51 = vcombine.low %v7025_v45, %v7029_v46  ;;  %v7166_v52 = vcombine.high %v7033_v49, %v7037_v50  ;;  %v7018_v45 = vld [vmem:[%s12231_s1 + $0x5d8] sm:$0xff] }
  0x6c   :  { %v7022_v46 = vld [vmem:[%s12231_s1 + $0x5f8] sm:$0xff] }
  0x6e   :  { %1018 = vmatpush1.bf16.msra.mxu1 %v7171_v54  ;;  %v7045_v54 = vld [vmem:[%s12231_s1 + $0x6b0] sm:$0xff] }
  0x6f   :  { %1019 = vmatprep.subr.bf16.mxu1 %v7180_v55  ;;  %v7165_v55 = vcombine.low %v7033_v49, %v7037_v50  ;;  %v7174_v56 = vcombine.high %v7041_v53, %v7045_v54  ;;  %v7026_v49 = vld [vmem:[%s12231_s1 + $0x618] sm:$0xff] }
  0x70   :  { %v7030_v50 = vld [vmem:[%s12231_s1 + $0x638] sm:$0xff] }
  0x72   :  { %1020 = vmatpush1.bf16.msra.mxu1 %v7179_v58  ;;  %v7053_v58 = vld [vmem:[%s12231_s1 + $0x6f0] sm:$0xff] }
  0x73   :  { %1021 = vmatprep.subr.bf16.mxu1 %v7188_v59  ;;  %v7173_v59 = vcombine.low %v7041_v53, %v7045_v54  ;;  %v7182_v60 = vcombine.high %v7049_v57, %v7053_v58  ;;  %v7034_v53 = vld [vmem:[%s12231_s1 + $0x658] sm:$0xff] }
  0x74   :  { %v7038_v54 = vld [vmem:[%s12231_s1 + $0x678] sm:$0xff] }
  0x76   :  { %1022 = vmatpush1.bf16.msra.mxu1 %v7187_v62  ;;  %v7061_v62 = vld [vmem:[%s12231_s1 + $0x730] sm:$0xff] }
  0x77   :  { %1023 = vmatprep.subr.bf16.mxu1 %v7196_v63  ;;  %v7181_v63 = vcombine.low %v7049_v57, %v7053_v58  ;;  %v7190_v0 = vcombine.high %v7057_v61, %v7061_v62  ;;  %v7042_v57 = vld [vmem:[%s12231_s1 + $0x698] sm:$0xff] }
  0x78   :  { %v7046_v58 = vld [vmem:[%s12231_s1 + $0x6b8] sm:$0xff] }
  0x7a   :  { %1024 = vmatpush1.bf16.msra.mxu1 %v7195_v2  ;;  %v7069_v2 = vld [vmem:[%s12231_s1 + $0x770] sm:$0xff] }
  0x7b   :  { %1025 = vmatprep.subr.bf16.mxu1 %v7204_v3  ;;  %v7189_v3 = vcombine.low %v7057_v61, %v7061_v62  ;;  %v7198_v4 = vcombine.high %v7065_v1, %v7069_v2  ;;  %v7050_v61 = vld [vmem:[%s12231_s1 + $0x6d8] sm:$0xff] }
  0x7c   :  { %v7054_v62 = vld [vmem:[%s12231_s1 + $0x6f8] sm:$0xff] }
  0x7e   :  { %1026 = vmatpush1.bf16.msra.mxu1 %v7203_v7  ;;  %v7077_v7 = vld [vmem:[%s12231_s1 + $0x7b0] sm:$0xff] }
  0x7f   :  { %1027 = vmatprep.subr.bf16.mxu1 %v7212_v8  ;;  %v7197_v8 = vcombine.low %v7065_v1, %v7069_v2  ;;  %v7206_v9 = vcombine.high %v7073_v6, %v7077_v7  ;;  %v7058_v1 = vld [vmem:[%s12231_s1 + $0x718] sm:$0xff] }
  0x80   :  { %v7062_v2 = vld [vmem:[%s12231_s1 + $0x738] sm:$0xff] }
  0x82   :  { %1028 = vmatpush1.bf16.msra.mxu1 %v7211_v12  ;;  %v7085_v12 = vld [vmem:[%s12231_s1 + $0x7f0] sm:$0xff] }
  0x83   :  { %1038 = vmatprep.subr.bf16.mxu1 %v7094_v13  ;;  %v7205_v13 = vcombine.low %v7073_v6, %v7077_v7  ;;  %v7214_v14 = vcombine.high %v7081_v11, %v7085_v12  ;;  %v7066_v6 = vld [vmem:[%s12231_s1 + $0x758] sm:$0xff] }
  0x84   :  { %v7070_v7 = vld [vmem:[%s12231_s1 + $0x778] sm:$0xff] }
  0x85   :  { %1030 = vmatmul.mubr.bf16.vlgmr.msra.gmra.mrb[4].mxu1 %v9521_v10 }
  0x86   :  { %1039 = vmatpush1.bf16.msra.mxu1 %v7093_v16  ;;  %1070 = vmatprep.mubr.bf16.mxu1 %v9441_v24  ;;  %v6966_v16 = vld [vmem:[%s12231_s1 + $0x438] sm:$0xff] }
  0x87   :  { %1040 = vmatprep.subr.bf16.mxu1 %v7102_v18  ;;  %v7213_v18 = vcombine.low %v7081_v11, %v7085_v12  ;;  %v7096_v19 = vcombine.high %v6962_v15, %v6966_v16  ;;  %v7074_v11 = vld [vmem:[%s12231_s1 + $0x798] sm:$0xff] }
  0x88   :  { %v7078_v12 = vld [vmem:[%s12231_s1 + $0x7b8] sm:$0xff] }
  0x8a   :  { %1041 = vmatpush1.bf16.msra.mxu1 %v7101_v22  ;;  %v6974_v22 = vld [vmem:[%s12231_s1 + $0x478] sm:$0xff] }
  0x8b   :  { %1042 = vmatprep.subr.bf16.mxu1 %v7110_v23  ;;  %v7095_v23 = vcombine.low %v6962_v15, %v6966_v16  ;;  %v7104_v25 = vcombine.high %v6970_v21, %v6974_v22  ;;  %v7082_v15 = vld [vmem:[%s12231_s1 + $0x7d8] sm:$0xff] }
  0x8c   :  { %v7086_v16 = vld [vmem:[%s12231_s1 + $0x7f8] sm:$0xff] }
  0x8e   :  { %1043 = vmatpush1.bf16.msra.mxu1 %v7109_v27  ;;  %v6982_v27 = vld [vmem:[%s12231_s1 + $0x4b8] sm:$0xff] }
  0x8f   :  { %1044 = vmatprep.subr.bf16.mxu1 %v7118_v28  ;;  %v7103_v28 = vcombine.low %v6970_v21, %v6974_v22  ;;  %v7112_v29 = vcombine.high %v6978_v26, %v6982_v27  ;;  %v47_v21 = vld [vmem:[%s12231_s1] sm:$0xff] }
  0x90   :  { %v51_v22 = vld [vmem:[%s12231_s1 + $0x20] sm:$0xff] }
  0x92   :  { %1045 = vmatpush1.bf16.msra.mxu1 %v7117_v31  ;;  %v6990_v31 = vld [vmem:[%s12231_s1 + $0x4f8] sm:$0xff] }
  0x93   :  { %1046 = vmatprep.subr.bf16.mxu1 %v7126_v32  ;;  %v7111_v32 = vcombine.low %v6978_v26, %v6982_v27  ;;  %v7120_v33 = vcombine.high %v6986_v30, %v6990_v31  ;;  %v55_v26 = vld [vmem:[%s12231_s1 + $0x40] sm:$0xff] }
  0x94   :  { %v59_v27 = vld [vmem:[%s12231_s1 + $0x60] sm:$0xff] }
  0x96   :  { %1047 = vmatpush1.bf16.msra.mxu1 %v7125_v35  ;;  %v7119_v35 = vcombine.low %v6986_v30, %v6990_v31  ;;  %v7349_v30 = vld [vmem:[%s12231_s1 + $0x810] sm:$0xff]  ;;  %v7228_v31 = vcombine.high %v55_v26, %v59_v27 }
  0x97   :  { %1048 = vmatprep.subr.bf16.mxu1 %v7134_v36 }
  0x9a   :  { %1049 = vmatpush1.bf16.msra.mxu1 %v7133_v39 }
  0x9b   :  { %1050 = vmatprep.subr.bf16.mxu1 %v7142_v40  ;;  %v7136_v40 = vcombine.high %v7002_v37, %v7006_v38 }
  0x9e   :  { %1051 = vmatpush1.bf16.msra.mxu1 %v7141_v43  ;;  %v7135_v43 = vcombine.low %v7002_v37, %v7006_v38  ;;  %v7361_v38 = vld [vmem:[%s12231_s1 + $0x870] sm:$0xff] }
  0x9f   :  { %1052 = vmatprep.subr.bf16.mxu1 %v7150_v44  ;;  %v7144_v44 = vcombine.high %v7010_v41, %v7014_v42 }
  0xa2   :  { %1053 = vmatpush1.bf16.msra.mxu1 %v7149_v47  ;;  %v7143_v47 = vcombine.low %v7010_v41, %v7014_v42 }
  0xa3   :  { %1054 = vmatprep.subr.bf16.mxu1 %v7158_v48  ;;  %v7152_v48 = vcombine.high %v7018_v45, %v7022_v46 }
  0xa6   :  { %1055 = vmatpush1.bf16.msra.mxu1 %v7157_v51  ;;  %v7151_v51 = vcombine.low %v7018_v45, %v7022_v46  ;;  %v7369_v45 = vld [vmem:[%s12231_s1 + $0x8b0] sm:$0xff]  ;;  %v79_v46 = vld [vmem:[%s12231_s1 + $0x100] sm:$0xff] }
  0xa7   :  { %1056 = vmatprep.subr.bf16.mxu1 %v7166_v52  ;;  %v7160_v52 = vcombine.high %v7026_v49, %v7030_v50 }
  0xaa   :  { %1057 = vmatpush1.bf16.msra.mxu1 %v7165_v55  ;;  %v7159_v55 = vcombine.low %v7026_v49, %v7030_v50 }
  0xab   :  { %1058 = vmatprep.subr.bf16.mxu1 %v7174_v56  ;;  %v7168_v56 = vcombine.high %v7034_v53, %v7038_v54 }
  0xae   :  { %1059 = vmatpush1.bf16.msra.mxu1 %v7173_v59  ;;  %v7167_v59 = vcombine.low %v7034_v53, %v7038_v54  ;;  %v7377_v53 = vld [vmem:[%s12231_s1 + $0x8f0] sm:$0xff]  ;;  %v87_v54 = vld [vmem:[%s12231_s1 + $0x140] sm:$0xff] }
  0xaf   :  { %1060 = vmatprep.subr.bf16.mxu1 %v7182_v60  ;;  %v7176_v60 = vcombine.high %v7042_v57, %v7046_v58 }
  0xb2   :  { %1061 = vmatpush1.bf16.msra.mxu1 %v7181_v63  ;;  %v7175_v63 = vcombine.low %v7042_v57, %v7046_v58 }
  0xb3   :  { %1062 = vmatprep.subr.bf16.mxu1 %v7190_v0  ;;  %v7184_v0 = vcombine.high %v7050_v61, %v7054_v62 }
  0xb6   :  { %1063 = vmatpush1.bf16.msra.mxu1 %v7189_v3  ;;  %v7183_v3 = vcombine.low %v7050_v61, %v7054_v62  ;;  %v7385_v61 = vld [vmem:[%s12231_s1 + $0x930] sm:$0xff]  ;;  %v95_v62 = vld [vmem:[%s12231_s1 + $0x180] sm:$0xff] }
  0xb7   :  { %1064 = vmatprep.subr.bf16.mxu1 %v7198_v4  ;;  %v7192_v4 = vcombine.high %v7058_v1, %v7062_v2 }
  0xba   :  { %1065 = vmatpush1.bf16.msra.mxu1 %v7197_v8  ;;  %v7191_v8 = vcombine.low %v7058_v1, %v7062_v2 }
  0xbb   :  { %1066 = vmatprep.subr.bf16.mxu1 %v7206_v9  ;;  %v7200_v9 = vcombine.high %v7066_v6, %v7070_v7 }
  0xbe   :  { %1067 = vmatpush1.bf16.msra.mxu1 %v7205_v13  ;;  %v7199_v13 = vcombine.low %v7066_v6, %v7070_v7  ;;  %v7393_v6 = vld [vmem:[%s12231_s1 + $0x970] sm:$0xff]  ;;  %v103_v7 = vld [vmem:[%s12231_s1 + $0x1c0] sm:$0xff] }
  0xbf   :  { %1068 = vmatprep.subr.bf16.mxu1 %v7214_v14  ;;  %v7208_v14 = vcombine.high %v7074_v11, %v7078_v12 }
  0xc2   :  { %1069 = vmatpush1.bf16.msra.mxu1 %v7213_v18  ;;  %v7207_v18 = vcombine.low %v7074_v11, %v7078_v12 }
  0xc3   :  { %1079 = vmatprep.subr.bf16.mxu1 %v7096_v19  ;;  %v7216_v19 = vcombine.high %v7082_v15, %v7086_v16 }
  0xc5   :  { %1071 = vmatmul.mubr.bf16.vlgmr.msra.gmra.mrb[8].mxu1 %v9521_v10 }
  0xc6   :  { %1080 = vmatpush1.bf16.msra.mxu1 %v7095_v23  ;;  %1111 = vmatprep.mubr.bf16.mxu1 %v9441_v24  ;;  %v6998_v24 = vld [vmem:[%s12231_s1 + $0x538] sm:$0xff]  ;;  %v7215_v23 = vcombine.low %v7082_v15, %v7086_v16  ;;  %v7401_v15 = vld [vmem:[%s12231_s1 + $0x9b0] sm:$0xff]  ;;  %v111_v16 = vld [vmem:[%s12231_s1 + $0x200] sm:$0xff] }
  0xc7   :  { %1081 = vmatprep.subr.bf16.mxu1 %v7104_v25  ;;  %v7128_v36 = vcombine.high %v6994_v34, %v6998_v24  ;;  %v7127_v39 = vcombine.low %v6994_v34, %v6998_v24  ;;  %v7220_v25 = vcombine.high %v47_v21, %v51_v22  ;;  %v67_v34 = vld [vmem:[%s12231_s1 + $0xa0] sm:$0xff] }
  0xca   :  { %1082 = vmatpush1.bf16.msra.mxu1 %v7103_v28  ;;  %v7219_v28 = vcombine.low %v47_v21, %v51_v22 }
  0xcb   :  { %1083 = vmatprep.subr.bf16.mxu1 %v7112_v29  ;;  %v9819_v29 = vcombine.high %v9423_v17, %v9423_v17 }
  0xce   :  { %1084 = vmatpush1.bf16.msra.mxu1 %v7111_v32  ;;  %v7353_v32 = vld [vmem:[%s12231_s1 + $0x830] sm:$0xff] }
  0xcf   :  { %1085 = vmatprep.subr.bf16.mxu1 %v7120_v33  ;;  %v63_v33 = vld [vmem:[%s12231_s1 + $0x80] sm:$0xff]  ;;  %v7480_v17 = vcombine.high %v7349_v30, %v7353_v32  ;;  %v7479_v24 = vcombine.low %v7349_v30, %v7353_v32 }
  0xd0   :  { %v7236_v37 = vcombine.high %v63_v33, %v67_v34  ;;  %v7235_v42 = vcombine.low %v63_v33, %v67_v34  ;;  %v7413_v33 = vld [vmem:[%s12231_s1 + $0xa10] sm:$0xff] }
  0xd1   :  { %2783 = vmatprep.subr.bf16.mxu0 %v7480_v17  ;;  %v7417_v17 = vld [vmem:[%s12231_s1 + $0xa30] sm:$0xff] }
  0xd2   :  { %1086 = vmatpush1.bf16.msra.mxu1 %v7119_v35  ;;  %v7227_v35 = vcombine.low %v55_v26, %v59_v27  ;;  %2784 = vmatpush1.bf16.msra.mxu0 %v7479_v24  ;;  %v7409_v26 = vld [vmem:[%s12231_s1 + $0x9f0] sm:$0xff]  ;;  %v119_v27 = vld [vmem:[%s12231_s1 + $0x240] sm:$0xff] }
  0xd3   :  { %1087 = vmatprep.subr.bf16.mxu1 %v7128_v36  ;;  %v7357_v36 = vld [vmem:[%s12231_s1 + $0x850] sm:$0xff]  ;;  %v127_v24 = vld [vmem:[%s12231_s1 + $0x280] sm:$0xff] }
  0xd4   :  { %v7487_v41 = vcombine.low %v7357_v36, %v7361_v38 }
  0xd6   :  { %1088 = vmatpush1.bf16.msra.mxu1 %v7127_v39  ;;  %v71_v39 = vld [vmem:[%s12231_s1 + $0xc0] sm:$0xff] }
  0xd7   :  { %1089 = vmatprep.subr.bf16.mxu1 %v7136_v40  ;;  %v7488_v40 = vcombine.high %v7357_v36, %v7361_v38  ;;  %v7544_v36 = vcombine.high %v7413_v33, %v7417_v17 }
  0xd9   :  { %2785 = vmatprep.subr.bf16.mxu0 %v7488_v40  ;;  %v7425_v40 = vld [vmem:[%s12231_s1 + $0xa70] sm:$0xff] }
  0xda   :  { %1090 = vmatpush1.bf16.msra.mxu1 %v7135_v43  ;;  %v7365_v43 = vld [vmem:[%s12231_s1 + $0x890] sm:$0xff]  ;;  %2786 = vmatpush1.bf16.msra.mxu0 %v7487_v41  ;;  %v135_v41 = vld [vmem:[%s12231_s1 + $0x2c0] sm:$0xff] }
  0xdb   :  { %1091 = vmatprep.subr.bf16.mxu1 %v7144_v44  ;;  %v7495_v49 = vcombine.low %v7365_v43, %v7369_v45 }
  0xde   :  { %1092 = vmatpush1.bf16.msra.mxu1 %v7143_v47  ;;  %v83_v47 = vld [vmem:[%s12231_s1 + $0x120] sm:$0xff] }
  0xdf   :  { %1093 = vmatprep.subr.bf16.mxu1 %v7152_v48  ;;  %v7496_v48 = vcombine.high %v7365_v43, %v7369_v45  ;;  %v7251_v58 = vcombine.low %v79_v46, %v83_v47 }
  0xe1   :  { %2787 = vmatprep.subr.bf16.mxu0 %v7496_v48  ;;  %v7433_v48 = vld [vmem:[%s12231_s1 + $0xab0] sm:$0xff] }
  0xe2   :  { %1094 = vmatpush1.bf16.msra.mxu1 %v7151_v51  ;;  %v7373_v51 = vld [vmem:[%s12231_s1 + $0x8d0] sm:$0xff]  ;;  %2788 = vmatpush1.bf16.msra.mxu0 %v7495_v49  ;;  %v143_v49 = vld [vmem:[%s12231_s1 + $0x300] sm:$0xff] }
  0xe3   :  { %1095 = vmatprep.subr.bf16.mxu1 %v7160_v52  ;;  %v7252_v52 = vcombine.high %v79_v46, %v83_v47  ;;  %v7503_v57 = vcombine.low %v7373_v51, %v7377_v53  ;;  %v7429_v46 = vld [vmem:[%s12231_s1 + $0xa90] sm:$0xff] }
  0xe6   :  { %1096 = vmatpush1.bf16.msra.mxu1 %v7159_v55  ;;  %v91_v55 = vld [vmem:[%s12231_s1 + $0x160] sm:$0xff] }
  0xe7   :  { %1097 = vmatprep.subr.bf16.mxu1 %v7168_v56  ;;  %v7504_v56 = vcombine.high %v7373_v51, %v7377_v53  ;;  %v7259_v2 = vcombine.low %v87_v54, %v91_v55  ;;  %v7560_v51 = vcombine.high %v7429_v46, %v7433_v48 }
  0xe9   :  { %2789 = vmatprep.subr.bf16.mxu0 %v7504_v56  ;;  %v7441_v56 = vld [vmem:[%s12231_s1 + $0xaf0] sm:$0xff] }
  0xea   :  { %1098 = vmatpush1.bf16.msra.mxu1 %v7167_v59  ;;  %v7381_v59 = vld [vmem:[%s12231_s1 + $0x910] sm:$0xff]  ;;  %2790 = vmatpush1.bf16.msra.mxu0 %v7503_v57  ;;  %v151_v57 = vld [vmem:[%s12231_s1 + $0x340] sm:$0xff] }
  0xeb   :  { %1099 = vmatprep.subr.bf16.mxu1 %v7176_v60  ;;  %v7260_v60 = vcombine.high %v87_v54, %v91_v55  ;;  %v7511_v1 = vcombine.low %v7381_v59, %v7385_v61  ;;  %v7437_v54 = vld [vmem:[%s12231_s1 + $0xad0] sm:$0xff] }
  0xee   :  { %1100 = vmatpush1.bf16.msra.mxu1 %v7175_v63  ;;  %v99_v63 = vld [vmem:[%s12231_s1 + $0x1a0] sm:$0xff] }
  0xef   :  { %1101 = vmatprep.subr.bf16.mxu1 %v7184_v0  ;;  %v7512_v0 = vcombine.high %v7381_v59, %v7385_v61  ;;  %v7267_v12 = vcombine.low %v95_v62, %v99_v63  ;;  %v7568_v59 = vcombine.high %v7437_v54, %v7441_v56 }
  0xf1   :  { %2791 = vmatprep.subr.bf16.mxu0 %v7512_v0  ;;  %v7449_v0 = vld [vmem:[%s12231_s1 + $0xb30] sm:$0xff] }
  0xf2   :  { %1102 = vmatpush1.bf16.msra.mxu1 %v7183_v3  ;;  %v7389_v3 = vld [vmem:[%s12231_s1 + $0x950] sm:$0xff]  ;;  %2792 = vmatpush1.bf16.msra.mxu0 %v7511_v1  ;;  %v159_v1 = vld [vmem:[%s12231_s1 + $0x380] sm:$0xff] }
  0xf3   :  { %1103 = vmatprep.subr.bf16.mxu1 %v7192_v4  ;;  %v7268_v4 = vcombine.high %v95_v62, %v99_v63  ;;  %v7519_v11 = vcombine.low %v7389_v3, %v7393_v6  ;;  %v7445_v62 = vld [vmem:[%s12231_s1 + $0xb10] sm:$0xff] }
  0xf6   :  { %1104 = vmatpush1.bf16.msra.mxu1 %v7191_v8  ;;  %v107_v8 = vld [vmem:[%s12231_s1 + $0x1e0] sm:$0xff] }
  0xf7   :  { %1105 = vmatprep.subr.bf16.mxu1 %v7200_v9  ;;  %v7520_v9 = vcombine.high %v7389_v3, %v7393_v6  ;;  %v7275_v22 = vcombine.low %v103_v7, %v107_v8  ;;  %v7576_v3 = vcombine.high %v7445_v62, %v7449_v0 }
  0xf9   :  { %2793 = vmatprep.subr.bf16.mxu0 %v7520_v9  ;;  %v7457_v9 = vld [vmem:[%s12231_s1 + $0xb70] sm:$0xff] }
  0xfa   :  { %1106 = vmatpush1.bf16.msra.mxu1 %v7199_v13  ;;  %v7397_v13 = vld [vmem:[%s12231_s1 + $0x990] sm:$0xff]  ;;  %2794 = vmatpush1.bf16.msra.mxu0 %v7519_v11  ;;  %v167_v11 = vld [vmem:[%s12231_s1 + $0x3c0] sm:$0xff] }
  0xfb   :  { %1107 = vmatprep.subr.bf16.mxu1 %v7208_v14  ;;  %v7276_v14 = vcombine.high %v103_v7, %v107_v8  ;;  %v7527_v21 = vcombine.low %v7397_v13, %v7401_v15  ;;  %v7453_v7 = vld [vmem:[%s12231_s1 + $0xb50] sm:$0xff] }
  0xfe   :  { %1108 = vmatpush1.bf16.msra.mxu1 %v7207_v18  ;;  %v115_v18 = vld [vmem:[%s12231_s1 + $0x220] sm:$0xff] }
  0xff   :  { %1109 = vmatprep.subr.bf16.mxu1 %v7216_v19  ;;  %v7528_v19 = vcombine.high %v7397_v13, %v7401_v15  ;;  %v7283_v32 = vcombine.low %v111_v16, %v115_v18  ;;  %v7584_v13 = vcombine.high %v7453_v7, %v7457_v9 }
 0x101   :  { %2795 = vmatprep.subr.bf16.mxu0 %v7528_v19  ;;  %v7465_v19 = vld [vmem:[%s12231_s1 + $0xbb0] sm:$0xff] }
 0x102   :  { %1110 = vmatpush1.bf16.msra.mxu1 %v7215_v23  ;;  %v7405_v23 = vld [vmem:[%s12231_s1 + $0x9d0] sm:$0xff]  ;;  %2796 = vmatpush1.bf16.msra.mxu0 %v7527_v21  ;;  %v48_v21 = vld [vmem:[%s12231_s1 + $0x8] sm:$0xff] }
 0x103   :  { %1764 = vmatprep.subr.bf16.mxu1 %v7220_v25  ;;  %v7284_v25 = vcombine.high %v111_v16, %v115_v18  ;;  %v7536_v30 = vcombine.high %v7405_v23, %v7409_v26  ;;  %v7461_v16 = vld [vmem:[%s12231_s1 + $0xb90] sm:$0xff] }
 0x105   :  { %1112 = vmatmul.mubr.bf16.vlgmr.msra.gmra.mrb[12].mxu1 %v9521_v10  ;;  %v75_v10 = vld [vmem:[%s12231_s1 + $0xe0] sm:$0xff]  ;;  %2797 = vmatprep.subr.bf16.mxu0 %v7536_v30  ;;  %v7473_v30 = vld [vmem:[%s12231_s1 + $0xbf0] sm:$0xff] }
 0x106   :  { %1765 = vmatpush1.bf16.msra.mxu1 %v7219_v28  ;;  %1796 = vmatprep.mubr.bf16.mxu1 %v9819_v29  ;;  %v7244_v44 = vcombine.high %v71_v39, %v75_v10  ;;  %v7243_v50 = vcombine.low %v71_v39, %v75_v10  ;;  %v123_v28 = vld [vmem:[%s12231_s1 + $0x260] sm:$0xff]  ;;  %v7421_v39 = vld [vmem:[%s12231_s1 + $0xa50] sm:$0xff] }
 0x107   :  { %1766 = vmatprep.subr.bf16.mxu1 %v7228_v31  ;;  %v7535_v31 = vcombine.low %v7405_v23, %v7409_v26  ;;  %v7292_v34 = vcombine.high %v119_v27, %v123_v28  ;;  %v7291_v38 = vcombine.low %v119_v27, %v123_v28  ;;  %v7552_v43 = vcombine.high %v7421_v39, %v7425_v40  ;;  %v7469_v27 = vld [vmem:[%s12231_s1 + $0xbd0] sm:$0xff] }
 0x108   :  { %v7592_v23 = vcombine.high %v7461_v16, %v7465_v19 }
 0x109   :  { %2798 = vmatpush1.bf16.msra.mxu0 %v7535_v31  ;;  %v56_v31 = vld [vmem:[%s12231_s1 + $0x48] sm:$0xff] }
 0x10a   :  { %1767 = vmatpush1.bf16.msra.mxu1 %v7227_v35  ;;  %v131_v35 = vld [vmem:[%s12231_s1 + $0x2a0] sm:$0xff]  ;;  %2799 = vmatprep.subr.bf16.mxu0 %v7544_v36  ;;  %v10021_v36 = vrot.slane %v9432_v20, 2 }
 0x10b   :  { %1768 = vmatprep.subr.bf16.mxu1 %v7236_v37  ;;  %v7543_v37 = vcombine.low %v7413_v33, %v7417_v17  ;;  %v7300_v10 = vcombine.high %v127_v24, %v131_v35  ;;  %v7299_v45 = vcombine.low %v127_v24, %v131_v35  ;;  %v7600_v33 = vcombine.high %v7469_v27, %v7473_v30  ;;  %v9316_v17 = vld [vmem:[%s12232_s0] sm:$0xff] }
 0x10c   :  { %v10018_v24 = vcombine.low %v9316_v17, %v9316_v17  ;;  %2815 = vmatprep.mubr.bf16.mxu0 %v10021_v36  ;;  %v53_v17 = vld [vmem:[%s12231_s1 + $0x30] sm:$0xff] }
 0x10d   :  { %2800 = vmatpush1.bf16.msra.mxu0 %v7543_v37 }
 0x10e   :  { %1769 = vmatpush1.bf16.msra.mxu1 %v7235_v42  ;;  %v139_v42 = vld [vmem:[%s12231_s1 + $0x2e0] sm:$0xff]  ;;  %2801 = vmatprep.subr.bf16.mxu0 %v7552_v43 }
 0x10f   :  { %1770 = vmatprep.subr.bf16.mxu1 %v7244_v44  ;;  %v7551_v44 = vcombine.low %v7421_v39, %v7425_v40  ;;  %v7308_v47 = vcombine.high %v135_v41, %v139_v42  ;;  %v7307_v53 = vcombine.low %v135_v41, %v139_v42  ;;  %v64_v39 = vld [vmem:[%s12231_s1 + $0x88] sm:$0xff] }
 0x110   :  { %v72_v40 = vld [vmem:[%s12231_s1 + $0xc8] sm:$0xff] }
 0x111   :  { %2802 = vmatpush1.bf16.msra.mxu0 %v7551_v44  ;;  %v76_v41 = vld [vmem:[%s12231_s1 + $0xe8] sm:$0xff] }
 0x112   :  { %1771 = vmatpush1.bf16.msra.mxu1 %v7243_v50  ;;  %v147_v50 = vld [vmem:[%s12231_s1 + $0x320] sm:$0xff]  ;;  %2803 = vmatprep.subr.bf16.mxu0 %v7560_v51  ;;  %v7246_v43 = vcombine.high %v72_v40, %v76_v41  ;;  %v80_v44 = vld [vmem:[%s12231_s1 + $0x108] sm:$0xff] }
 0x113   :  { %1772 = vmatprep.subr.bf16.mxu1 %v7252_v52  ;;  %v7559_v52 = vcombine.low %v7429_v46, %v7433_v48  ;;  %v7316_v55 = vcombine.high %v143_v49, %v147_v50  ;;  %v7315_v61 = vcombine.low %v143_v49, %v147_v50  ;;  %v7245_v46 = vcombine.low %v72_v40, %v76_v41  ;;  %v88_v48 = vld [vmem:[%s12231_s1 + $0x148] sm:$0xff]  ;;  %v65_v40 = vld [vmem:[%s12231_s1 + $0x90] sm:$0xff] }
 0x114   :  { %v92_v49 = vld [vmem:[%s12231_s1 + $0x168] sm:$0xff]  ;;  %v69_v41 = vld [vmem:[%s12231_s1 + $0xb0] sm:$0xff] }
 0x115   :  { %2804 = vmatpush1.bf16.msra.mxu0 %v7559_v52  ;;  %v7262_v51 = vcombine.high %v88_v48, %v92_v49  ;;  %v96_v52 = vld [vmem:[%s12231_s1 + $0x188] sm:$0xff] }
 0x116   :  { %1773 = vmatpush1.bf16.msra.mxu1 %v7251_v58  ;;  %v155_v58 = vld [vmem:[%s12231_s1 + $0x360] sm:$0xff]  ;;  %2805 = vmatprep.subr.bf16.mxu0 %v7568_v59 }
 0x117   :  { %1774 = vmatprep.subr.bf16.mxu1 %v7260_v60  ;;  %v7567_v60 = vcombine.low %v7437_v54, %v7441_v56  ;;  %v7324_v63 = vcombine.high %v151_v57, %v155_v58  ;;  %v7323_v6 = vcombine.low %v151_v57, %v155_v58  ;;  %v7261_v54 = vcombine.low %v88_v48, %v92_v49  ;;  %v104_v56 = vld [vmem:[%s12231_s1 + $0x1c8] sm:$0xff]  ;;  %v81_v48 = vld [vmem:[%s12231_s1 + $0x110] sm:$0xff] }
 0x118   :  { %v108_v57 = vld [vmem:[%s12231_s1 + $0x1e8] sm:$0xff]  ;;  %v85_v49 = vld [vmem:[%s12231_s1 + $0x130] sm:$0xff] }
 0x119   :  { %2806 = vmatpush1.bf16.msra.mxu0 %v7567_v60  ;;  %v7278_v59 = vcombine.high %v104_v56, %v108_v57  ;;  %v112_v60 = vld [vmem:[%s12231_s1 + $0x208] sm:$0xff] }
 0x11a   :  { %1775 = vmatpush1.bf16.msra.mxu1 %v7259_v2  ;;  %v163_v2 = vld [vmem:[%s12231_s1 + $0x3a0] sm:$0xff]  ;;  %2807 = vmatprep.subr.bf16.mxu0 %v7576_v3 }
 0x11b   :  { %1776 = vmatprep.subr.bf16.mxu1 %v7268_v4  ;;  %v7575_v4 = vcombine.low %v7445_v62, %v7449_v0  ;;  %v7332_v8 = vcombine.high %v159_v1, %v163_v2  ;;  %v7331_v15 = vcombine.low %v159_v1, %v163_v2  ;;  %v7277_v62 = vcombine.low %v104_v56, %v108_v57  ;;  %v120_v0 = vld [vmem:[%s12231_s1 + $0x248] sm:$0xff]  ;;  %v97_v56 = vld [vmem:[%s12231_s1 + $0x190] sm:$0xff] }
 0x11c   :  { %v124_v1 = vld [vmem:[%s12231_s1 + $0x268] sm:$0xff]  ;;  %v101_v57 = vld [vmem:[%s12231_s1 + $0x1b0] sm:$0xff] }
 0x11d   :  { %2808 = vmatpush1.bf16.msra.mxu0 %v7575_v4  ;;  %v7294_v3 = vcombine.high %v120_v0, %v124_v1  ;;  %v128_v4 = vld [vmem:[%s12231_s1 + $0x288] sm:$0xff] }
 0x11e   :  { %1777 = vmatpush1.bf16.msra.mxu1 %v7267_v12  ;;  %v171_v12 = vld [vmem:[%s12231_s1 + $0x3e0] sm:$0xff]  ;;  %2809 = vmatprep.subr.bf16.mxu0 %v7584_v13 }
 0x11f   :  { %1778 = vmatprep.subr.bf16.mxu1 %v7276_v14  ;;  %v7583_v14 = vcombine.low %v7453_v7, %v7457_v9  ;;  %v7340_v18 = vcombine.high %v167_v11, %v171_v12  ;;  %v7339_v26 = vcombine.low %v167_v11, %v171_v12  ;;  %v7293_v7 = vcombine.low %v120_v0, %v124_v1  ;;  %v136_v9 = vld [vmem:[%s12231_s1 + $0x2c8] sm:$0xff]  ;;  %v113_v0 = vld [vmem:[%s12231_s1 + $0x210] sm:$0xff] }
 0x120   :  { %v140_v11 = vld [vmem:[%s12231_s1 + $0x2e8] sm:$0xff]  ;;  %v117_v1 = vld [vmem:[%s12231_s1 + $0x230] sm:$0xff] }
 0x121   :  { %2810 = vmatpush1.bf16.msra.mxu0 %v7583_v14  ;;  %v7310_v13 = vcombine.high %v136_v9, %v140_v11  ;;  %v144_v14 = vld [vmem:[%s12231_s1 + $0x308] sm:$0xff] }
 0x122   :  { %1779 = vmatpush1.bf16.msra.mxu1 %v7275_v22  ;;  %v52_v22 = vld [vmem:[%s12231_s1 + $0x28] sm:$0xff]  ;;  %2811 = vmatprep.subr.bf16.mxu0 %v7592_v23 }
 0x123   :  { %1780 = vmatprep.subr.bf16.mxu1 %v7284_v25  ;;  %v7591_v25 = vcombine.low %v7461_v16, %v7465_v19  ;;  %v7222_v28 = vcombine.high %v48_v21, %v52_v22  ;;  %v7221_v35 = vcombine.low %v48_v21, %v52_v22  ;;  %v7309_v16 = vcombine.low %v136_v9, %v140_v11  ;;  %v152_v19 = vld [vmem:[%s12231_s1 + $0x348] sm:$0xff]  ;;  %v129_v9 = vld [vmem:[%s12231_s1 + $0x290] sm:$0xff] }
 0x124   :  { %v156_v21 = vld [vmem:[%s12231_s1 + $0x368] sm:$0xff]  ;;  %v133_v11 = vld [vmem:[%s12231_s1 + $0x2b0] sm:$0xff] }
 0x125   :  { %2812 = vmatpush1.bf16.msra.mxu0 %v7591_v25  ;;  %v7326_v23 = vcombine.high %v152_v19, %v156_v21  ;;  %v160_v25 = vld [vmem:[%s12231_s1 + $0x388] sm:$0xff] }
 0x126   :  { %1781 = vmatpush1.bf16.msra.mxu1 %v7283_v32  ;;  %v60_v32 = vld [vmem:[%s12231_s1 + $0x68] sm:$0xff]  ;;  %2813 = vmatprep.subr.bf16.mxu0 %v7600_v33 }
 0x127   :  { %1782 = vmatprep.subr.bf16.mxu1 %v7292_v34  ;;  %v7599_v34 = vcombine.low %v7469_v27, %v7473_v30  ;;  %v7230_v37 = vcombine.high %v56_v31, %v60_v32  ;;  %v7229_v20 = vcombine.low %v56_v31, %v60_v32  ;;  %v7325_v27 = vcombine.low %v152_v19, %v156_v21  ;;  %v168_v30 = vld [vmem:[%s12231_s1 + $0x3c8] sm:$0xff]  ;;  %v145_v19 = vld [vmem:[%s12231_s1 + $0x310] sm:$0xff] }
 0x128   :  { %v172_v31 = vld [vmem:[%s12231_s1 + $0x3e8] sm:$0xff]  ;;  %v149_v21 = vld [vmem:[%s12231_s1 + $0x330] sm:$0xff] }
 0x129   :  { %2814 = vmatpush1.bf16.msra.mxu0 %v7599_v34  ;;  %v7342_v33 = vcombine.high %v168_v30, %v172_v31  ;;  %v49_v34 = vld [vmem:[%s12231_s1 + $0x10] sm:$0xff] }
 0x12a   :  { %1783 = vmatpush1.bf16.msra.mxu1 %v7291_v38  ;;  %v10024_v38 = vrot.slane %v9512_v5, 2 }
 0x12b   :  { %1784 = vmatprep.subr.bf16.mxu1 %v7300_v10  ;;  %v68_v10 = vld [vmem:[%s12231_s1 + $0xa8] sm:$0xff] }
 0x12c   :  { %v7238_v5 = vcombine.high %v64_v39, %v68_v10  ;;  %2816 = vmatmul.mubr.bf16.vlgmr.msra.gmra.mrb[0].mxu0 %v10024_v38  ;;  %v7237_v42 = vcombine.low %v64_v39, %v68_v10  ;;  %v57_v39 = vld [vmem:[%s12231_s1 + $0x50] sm:$0xff] }
 0x12d   :  { %v61_v10 = vld [vmem:[%s12231_s1 + $0x70] sm:$0xff] }
 0x12e   :  { %1785 = vmatpush1.bf16.msra.mxu1 %v7299_v45  ;;  %v84_v45 = vld [vmem:[%s12231_s1 + $0x128] sm:$0xff] }
 0x12f   :  { %1786 = vmatprep.subr.bf16.mxu1 %v7308_v47  ;;  %v7254_v47 = vcombine.high %v80_v44, %v84_v45  ;;  %v7253_v50 = vcombine.low %v80_v44, %v84_v45  ;;  %v73_v44 = vld [vmem:[%s12231_s1 + $0xd0] sm:$0xff] }
 0x130   :  { %v77_v45 = vld [vmem:[%s12231_s1 + $0xf0] sm:$0xff] }
 0x132   :  { %1787 = vmatpush1.bf16.msra.mxu1 %v7307_v53  ;;  %v100_v53 = vld [vmem:[%s12231_s1 + $0x1a8] sm:$0xff] }
 0x133   :  { %1788 = vmatprep.subr.bf16.mxu1 %v7316_v55  ;;  %v7270_v55 = vcombine.high %v96_v52, %v100_v53  ;;  %v7269_v58 = vcombine.low %v96_v52, %v100_v53  ;;  %v89_v52 = vld [vmem:[%s12231_s1 + $0x150] sm:$0xff] }
 0x134   :  { %v93_v53 = vld [vmem:[%s12231_s1 + $0x170] sm:$0xff] }
 0x136   :  { %1789 = vmatpush1.bf16.msra.mxu1 %v7315_v61  ;;  %v116_v61 = vld [vmem:[%s12231_s1 + $0x228] sm:$0xff] }
 0x137   :  { %1790 = vmatprep.subr.bf16.mxu1 %v7324_v63  ;;  %v7286_v63 = vcombine.high %v112_v60, %v116_v61  ;;  %v7285_v2 = vcombine.low %v112_v60, %v116_v61  ;;  %v105_v60 = vld [vmem:[%s12231_s1 + $0x1d0] sm:$0xff] }
 0x138   :  { %v109_v61 = vld [vmem:[%s12231_s1 + $0x1f0] sm:$0xff] }
 0x13a   :  { %1791 = vmatpush1.bf16.msra.mxu1 %v7323_v6  ;;  %v132_v6 = vld [vmem:[%s12231_s1 + $0x2a8] sm:$0xff] }
 0x13b   :  { %1792 = vmatprep.subr.bf16.mxu1 %v7332_v8  ;;  %v7302_v8 = vcombine.high %v128_v4, %v132_v6  ;;  %v7301_v12 = vcombine.low %v128_v4, %v132_v6  ;;  %v121_v4 = vld [vmem:[%s12231_s1 + $0x250] sm:$0xff] }
 0x13c   :  { %v125_v6 = vld [vmem:[%s12231_s1 + $0x270] sm:$0xff] }
 0x13e   :  { %1793 = vmatpush1.bf16.msra.mxu1 %v7331_v15  ;;  %v148_v15 = vld [vmem:[%s12231_s1 + $0x328] sm:$0xff] }
 0x13f   :  { %1794 = vmatprep.subr.bf16.mxu1 %v7340_v18  ;;  %v7318_v18 = vcombine.high %v144_v14, %v148_v15  ;;  %v7317_v22 = vcombine.low %v144_v14, %v148_v15  ;;  %v137_v14 = vld [vmem:[%s12231_s1 + $0x2d0] sm:$0xff] }
 0x140   :  { %v141_v15 = vld [vmem:[%s12231_s1 + $0x2f0] sm:$0xff] }
 0x142   :  { %1795 = vmatpush1.bf16.msra.mxu1 %v7339_v26  ;;  %v164_v26 = vld [vmem:[%s12231_s1 + $0x3a8] sm:$0xff] }
 0x143   :  { %1805 = vmatprep.subr.bf16.mxu1 %v7222_v28  ;;  %v7334_v28 = vcombine.high %v160_v25, %v164_v26  ;;  %v7333_v32 = vcombine.low %v160_v25, %v164_v26  ;;  %v153_v25 = vld [vmem:[%s12231_s1 + $0x350] sm:$0xff] }
 0x144   :  { %v157_v26 = vld [vmem:[%s12231_s1 + $0x370] sm:$0xff] }
 0x145   :  { %1797 = vmatmul.mubr.bf16.vlgmr.msra.gmra.mrb[0].mxu1 %v10018_v24 }
 0x146   :  { %1806 = vmatpush1.bf16.msra.mxu1 %v7221_v35  ;;  %1837 = vmatprep.mubr.bf16.mxu1 %v9819_v29  ;;  %v7341_v35 = vcombine.low %v168_v30, %v172_v31  ;;  %v161_v30 = vld [vmem:[%s12231_s1 + $0x390] sm:$0xff] }
 0x147   :  { %1807 = vmatprep.subr.bf16.mxu1 %v7230_v37  ;;  %v7224_v37 = vcombine.high %v49_v34, %v53_v17  ;;  %v165_v31 = vld [vmem:[%s12231_s1 + $0x3b0] sm:$0xff] }
 0x14a   :  { %1808 = vmatpush1.bf16.msra.mxu1 %v7229_v20  ;;  %v7223_v20 = vcombine.low %v49_v34, %v53_v17  ;;  %v169_v34 = vld [vmem:[%s12231_s1 + $0x3d0] sm:$0xff] }
 0x14b   :  { %1809 = vmatprep.subr.bf16.mxu1 %v7238_v5  ;;  %v7232_v5 = vcombine.high %v57_v39, %v61_v10  ;;  %v173_v17 = vld [vmem:[%s12231_s1 + $0x3f0] sm:$0xff] }
 0x14e   :  { %1810 = vmatpush1.bf16.msra.mxu1 %v7237_v42  ;;  %v7231_v42 = vcombine.low %v57_v39, %v61_v10  ;;  %v50_v39 = vld [vmem:[%s12231_s1 + $0x18] sm:$0xff] }
 0x14f   :  { %1811 = vmatprep.subr.bf16.mxu1 %v7246_v43  ;;  %v7240_v43 = vcombine.high %v65_v40, %v69_v41  ;;  %v54_v10 = vld [vmem:[%s12231_s1 + $0x38] sm:$0xff] }
 0x152   :  { %1812 = vmatpush1.bf16.msra.mxu1 %v7245_v46  ;;  %v7239_v46 = vcombine.low %v65_v40, %v69_v41  ;;  %v58_v40 = vld [vmem:[%s12231_s1 + $0x58] sm:$0xff] }
 0x153   :  { %1813 = vmatprep.subr.bf16.mxu1 %v7254_v47  ;;  %v7248_v47 = vcombine.high %v73_v44, %v77_v45  ;;  %v62_v41 = vld [vmem:[%s12231_s1 + $0x78] sm:$0xff] }
 0x156   :  { %1814 = vmatpush1.bf16.msra.mxu1 %v7253_v50  ;;  %v7247_v50 = vcombine.low %v73_v44, %v77_v45  ;;  %v66_v44 = vld [vmem:[%s12231_s1 + $0x98] sm:$0xff] }
 0x157   :  { %1815 = vmatprep.subr.bf16.mxu1 %v7262_v51  ;;  %v7256_v51 = vcombine.high %v81_v48, %v85_v49  ;;  %v70_v45 = vld [vmem:[%s12231_s1 + $0xb8] sm:$0xff] }
 0x15a   :  { %1816 = vmatpush1.bf16.msra.mxu1 %v7261_v54  ;;  %v7255_v54 = vcombine.low %v81_v48, %v85_v49  ;;  %v74_v48 = vld [vmem:[%s12231_s1 + $0xd8] sm:$0xff] }
 0x15b   :  { %1817 = vmatprep.subr.bf16.mxu1 %v7270_v55  ;;  %v7264_v55 = vcombine.high %v89_v52, %v93_v53  ;;  %v78_v49 = vld [vmem:[%s12231_s1 + $0xf8] sm:$0xff] }
 0x15e   :  { %1818 = vmatpush1.bf16.msra.mxu1 %v7269_v58  ;;  %v7263_v58 = vcombine.low %v89_v52, %v93_v53  ;;  %v82_v52 = vld [vmem:[%s12231_s1 + $0x118] sm:$0xff]  ;;  %v7249_v53 = vcombine.low %v74_v48, %v78_v49 }
 0x15f   :  { %1819 = vmatprep.subr.bf16.mxu1 %v7278_v59  ;;  %v7272_v59 = vcombine.high %v97_v56, %v101_v57 }
 0x162   :  { %1820 = vmatpush1.bf16.msra.mxu1 %v7277_v62  ;;  %v7271_v62 = vcombine.low %v97_v56, %v101_v57  ;;  %v94_v56 = vld [vmem:[%s12231_s1 + $0x178] sm:$0xff] }
 0x163   :  { %1821 = vmatprep.subr.bf16.mxu1 %v7286_v63  ;;  %v7280_v63 = vcombine.high %v105_v60, %v109_v61 }
 0x166   :  { %1822 = vmatpush1.bf16.msra.mxu1 %v7285_v2  ;;  %v7279_v2 = vcombine.low %v105_v60, %v109_v61  ;;  %v102_v60 = vld [vmem:[%s12231_s1 + $0x1b8] sm:$0xff] }
 0x167   :  { %1823 = vmatprep.subr.bf16.mxu1 %v7294_v3  ;;  %v7288_v3 = vcombine.high %v113_v0, %v117_v1 }
 0x16a   :  { %1824 = vmatpush1.bf16.msra.mxu1 %v7293_v7  ;;  %v7287_v7 = vcombine.low %v113_v0, %v117_v1  ;;  %v110_v0 = vld [vmem:[%s12231_s1 + $0x1f8] sm:$0xff] }
 0x16b   :  { %1825 = vmatprep.subr.bf16.mxu1 %v7302_v8  ;;  %v7296_v8 = vcombine.high %v121_v4, %v125_v6 }
 0x16e   :  { %1826 = vmatpush1.bf16.msra.mxu1 %v7301_v12  ;;  %v7295_v12 = vcombine.low %v121_v4, %v125_v6  ;;  %v118_v4 = vld [vmem:[%s12231_s1 + $0x238] sm:$0xff] }
 0x16f   :  { %1827 = vmatprep.subr.bf16.mxu1 %v7310_v13  ;;  %v7304_v13 = vcombine.high %v129_v9, %v133_v11 }
 0x172   :  { %1828 = vmatpush1.bf16.msra.mxu1 %v7309_v16  ;;  %v7303_v16 = vcombine.low %v129_v9, %v133_v11  ;;  %v126_v9 = vld [vmem:[%s12231_s1 + $0x278] sm:$0xff] }
 0x173   :  { %1829 = vmatprep.subr.bf16.mxu1 %v7318_v18  ;;  %v7312_v18 = vcombine.high %v137_v14, %v141_v15 }
 0x176   :  { %1830 = vmatpush1.bf16.msra.mxu1 %v7317_v22  ;;  %v7311_v22 = vcombine.low %v137_v14, %v141_v15  ;;  %v134_v14 = vld [vmem:[%s12231_s1 + $0x2b8] sm:$0xff] }
 0x177   :  { %1831 = vmatprep.subr.bf16.mxu1 %v7326_v23  ;;  %v7320_v23 = vcombine.high %v145_v19, %v149_v21 }
 0x17a   :  { %1832 = vmatpush1.bf16.msra.mxu1 %v7325_v27  ;;  %v7319_v27 = vcombine.low %v145_v19, %v149_v21  ;;  %v142_v19 = vld [vmem:[%s12231_s1 + $0x2f8] sm:$0xff] }
 0x17b   :  { %1833 = vmatprep.subr.bf16.mxu1 %v7334_v28  ;;  %v7328_v28 = vcombine.high %v153_v25, %v157_v26 }
 0x17e   :  { %1834 = vmatpush1.bf16.msra.mxu1 %v7333_v32  ;;  %v7327_v32 = vcombine.low %v153_v25, %v157_v26  ;;  %v150_v25 = vld [vmem:[%s12231_s1 + $0x338] sm:$0xff] }
 0x17f   :  { %1835 = vmatprep.subr.bf16.mxu1 %v7342_v33  ;;  %v7336_v33 = vcombine.high %v161_v30, %v165_v31 }
 0x182   :  { %1836 = vmatpush1.bf16.msra.mxu1 %v7341_v35  ;;  %v7335_v35 = vcombine.low %v161_v30, %v165_v31  ;;  %v158_v30 = vld [vmem:[%s12231_s1 + $0x378] sm:$0xff] }
 0x183   :  { %1846 = vmatprep.subr.bf16.mxu1 %v7224_v37  ;;  %v7344_v37 = vcombine.high %v169_v34, %v173_v17 }
 0x185   :  { %1838 = vmatmul.mubr.bf16.vlgmr.msra.gmra.mrb[4].mxu1 %v10018_v24 }
 0x186   :  { %1847 = vmatpush1.bf16.msra.mxu1 %v7223_v20  ;;  %1878 = vmatprep.mubr.bf16.mxu1 %v9819_v29  ;;  %v7343_v20 = vcombine.low %v169_v34, %v173_v17  ;;  %v166_v34 = vld [vmem:[%s12231_s1 + $0x3b8] sm:$0xff] }
 0x187   :  { %1848 = vmatprep.subr.bf16.mxu1 %v7232_v5  ;;  %v7226_v5 = vcombine.high %v50_v39, %v54_v10 }
 0x18a   :  { %1849 = vmatpush1.bf16.msra.mxu1 %v7231_v42  ;;  %v7225_v42 = vcombine.low %v50_v39, %v54_v10  ;;  %v174_v39 = vld [vmem:[%s12231_s1 + $0x3f8] sm:$0xff] }
 0x18b   :  { %1850 = vmatprep.subr.bf16.mxu1 %v7240_v43  ;;  %v7234_v43 = vcombine.high %v58_v40, %v62_v41 }
 0x18e   :  { %1851 = vmatpush1.bf16.msra.mxu1 %v7239_v46  ;;  %v7233_v46 = vcombine.low %v58_v40, %v62_v41  ;;  %v7351_v40 = vld [vmem:[%s12231_s1 + $0x820] sm:$0xff] }
 0x18f   :  { %1852 = vmatprep.subr.bf16.mxu1 %v7248_v47  ;;  %v7242_v47 = vcombine.high %v66_v44, %v70_v45 }
 0x192   :  { %1853 = vmatpush1.bf16.msra.mxu1 %v7247_v50  ;;  %v7241_v50 = vcombine.low %v66_v44, %v70_v45  ;;  %v7359_v44 = vld [vmem:[%s12231_s1 + $0x860] sm:$0xff] }
 0x193   :  { %1854 = vmatprep.subr.bf16.mxu1 %v7256_v51  ;;  %v7250_v51 = vcombine.high %v74_v48, %v78_v49  ;;  %v7367_v48 = vld [vmem:[%s12231_s1 + $0x8a0] sm:$0xff] }
 0x196   :  { %1855 = vmatpush1.bf16.msra.mxu1 %v7255_v54 }
 0x197   :  { %1856 = vmatprep.subr.bf16.mxu1 %v7264_v55  ;;  %v90_v55 = vld [vmem:[%s12231_s1 + $0x158] sm:$0xff] }
 0x198   :  { %v7265_v61 = vcombine.low %v90_v55, %v94_v56 }
 0x19a   :  { %1857 = vmatpush1.bf16.msra.mxu1 %v7263_v58  ;;  %v7266_v58 = vcombine.high %v90_v55, %v94_v56 }
 0x19b   :  { %1858 = vmatprep.subr.bf16.mxu1 %v7272_v59  ;;  %v98_v59 = vld [vmem:[%s12231_s1 + $0x198] sm:$0xff] }
 0x19c   :  { %v7273_v1 = vcombine.low %v98_v59, %v102_v60 }
 0x19e   :  { %1859 = vmatpush1.bf16.msra.mxu1 %v7271_v62  ;;  %v7274_v62 = vcombine.high %v98_v59, %v102_v60 }
 0x19f   :  { %1860 = vmatprep.subr.bf16.mxu1 %v7280_v63  ;;  %v106_v63 = vld [vmem:[%s12231_s1 + $0x1d8] sm:$0xff] }
 0x1a0   :  { %v7281_v6 = vcombine.low %v106_v63, %v110_v0 }
 0x1a2   :  { %1861 = vmatpush1.bf16.msra.mxu1 %v7279_v2  ;;  %v7282_v2 = vcombine.high %v106_v63, %v110_v0 }
 0x1a3   :  { %1862 = vmatprep.subr.bf16.mxu1 %v7288_v3  ;;  %v114_v3 = vld [vmem:[%s12231_s1 + $0x218] sm:$0xff] }
 0x1a4   :  { %v7289_v11 = vcombine.low %v114_v3, %v118_v4 }
 0x1a6   :  { %1863 = vmatpush1.bf16.msra.mxu1 %v7287_v7  ;;  %v7290_v7 = vcombine.high %v114_v3, %v118_v4 }
 0x1a7   :  { %1864 = vmatprep.subr.bf16.mxu1 %v7296_v8  ;;  %v122_v8 = vld [vmem:[%s12231_s1 + $0x258] sm:$0xff] }
 0x1a8   :  { %v7297_v15 = vcombine.low %v122_v8, %v126_v9 }
 0x1aa   :  { %1865 = vmatpush1.bf16.msra.mxu1 %v7295_v12  ;;  %v7298_v12 = vcombine.high %v122_v8, %v126_v9  ;;  %v7411_v8 = vld [vmem:[%s12231_s1 + $0xa00] sm:$0xff] }
 0x1ab   :  { %1866 = vmatprep.subr.bf16.mxu1 %v7304_v13  ;;  %v130_v13 = vld [vmem:[%s12231_s1 + $0x298] sm:$0xff]  ;;  %v7415_v9 = vld [vmem:[%s12231_s1 + $0xa20] sm:$0xff] }
 0x1ac   :  { %v7305_v21 = vcombine.low %v130_v13, %v134_v14 }
 0x1ae   :  { %1867 = vmatpush1.bf16.msra.mxu1 %v7303_v16  ;;  %v7306_v16 = vcombine.high %v130_v13, %v134_v14  ;;  %v7540_v14 = vcombine.high %v7411_v8, %v7415_v9 }
 0x1af   :  { %1868 = vmatprep.subr.bf16.mxu1 %v7312_v18  ;;  %v138_v18 = vld [vmem:[%s12231_s1 + $0x2d8] sm:$0xff] }
 0x1b0   :  { %v7313_v26 = vcombine.low %v138_v18, %v142_v19 }
 0x1b2   :  { %1869 = vmatpush1.bf16.msra.mxu1 %v7311_v22  ;;  %v7314_v22 = vcombine.high %v138_v18, %v142_v19  ;;  %v7539_v18 = vcombine.low %v7411_v8, %v7415_v9  ;;  %v8711_v8 = vld [vmem:[%s12233_s2 + $0x434] ss:$8 sps:$4 sm:$0xff]   ;;  %v7388_v9 = vld [vmem:[%s12231_s1 + $0x948] sm:$0xff] }
 0x1b3   :  { %1870 = vmatprep.subr.bf16.mxu1 %v7320_v23  ;;  %v146_v23 = vld [vmem:[%s12231_s1 + $0x318] sm:$0xff] }
 0x1b4   :  { %v7321_v31 = vcombine.low %v146_v23, %v150_v25 }
 0x1b6   :  { %1871 = vmatpush1.bf16.msra.mxu1 %v7319_v27  ;;  %v7322_v27 = vcombine.high %v146_v23, %v150_v25 }
 0x1b7   :  { %1872 = vmatprep.subr.bf16.mxu1 %v7328_v28  ;;  %v154_v28 = vld [vmem:[%s12231_s1 + $0x358] sm:$0xff] }
 0x1b8   :  { %v7329_v17 = vcombine.low %v154_v28, %v158_v30 }
 0x1ba   :  { %1873 = vmatpush1.bf16.msra.mxu1 %v7327_v32  ;;  %v7330_v32 = vcombine.high %v154_v28, %v158_v30 }
 0x1bb   :  { %1874 = vmatprep.subr.bf16.mxu1 %v7336_v33  ;;  %v162_v33 = vld [vmem:[%s12231_s1 + $0x398] sm:$0xff] }
 0x1bc   :  { %v7337_v10 = vcombine.low %v162_v33, %v166_v34 }
 0x1be   :  { %1875 = vmatpush1.bf16.msra.mxu1 %v7335_v35  ;;  %v7338_v35 = vcombine.high %v162_v33, %v166_v34 }
 0x1bf   :  { %1876 = vmatprep.subr.bf16.mxu1 %v7344_v37  ;;  %v170_v37 = vld [vmem:[%s12231_s1 + $0x3d8] sm:$0xff] }
 0x1c0   :  { %v7345_v41 = vcombine.low %v170_v37, %v174_v39 }
 0x1c2   :  { %1877 = vmatpush1.bf16.msra.mxu1 %v7343_v20  ;;  %v7346_v20 = vcombine.high %v170_v37, %v174_v39 }
 0x1c3   :  { %1887 = vmatprep.subr.bf16.mxu1 %v7226_v5  ;;  %v7347_v5 = vld [vmem:[%s12231_s1 + $0x800] sm:$0xff] }
 0x1c4   :  { %v7475_v45 = vcombine.low %v7347_v5, %v7351_v40 }
 0x1c5   :  { %1879 = vmatmul.mubr.bf16.vlgmr.msra.gmra.mrb[8].mxu1 %v10018_v24 }
 0x1c6   :  { %1888 = vmatpush1.bf16.msra.mxu1 %v7225_v42  ;;  %1919 = vmatprep.mubr.bf16.mxu1 %v9819_v29  ;;  %v86_v29 = vld [vmem:[%s12231_s1 + $0x138] sm:$0xff]  ;;  %v7476_v42 = vcombine.high %v7347_v5, %v7351_v40 }
 0x1c7   :  { %1889 = vmatprep.subr.bf16.mxu1 %v7234_v43  ;;  %v7258_v54 = vcombine.high %v82_v52, %v86_v29  ;;  %v7257_v57 = vcombine.low %v82_v52, %v86_v29  ;;  %v7355_v43 = vld [vmem:[%s12231_s1 + $0x840] sm:$0xff] }
 0x1c8   :  { %v7483_v49 = vcombine.low %v7355_v43, %v7359_v44  ;;  %v7375_v52 = vld [vmem:[%s12231_s1 + $0x8e0] sm:$0xff] }
 0x1ca   :  { %1890 = vmatpush1.bf16.msra.mxu1 %v7233_v46  ;;  %v7484_v46 = vcombine.high %v7355_v43, %v7359_v44 }
 0x1cb   :  { %1891 = vmatprep.subr.bf16.mxu1 %v7242_v47  ;;  %v7363_v47 = vld [vmem:[%s12231_s1 + $0x880] sm:$0xff] }
 0x1cc   :  { %v7491_v29 = vcombine.low %v7363_v47, %v7367_v48 }
 0x1ce   :  { %1892 = vmatpush1.bf16.msra.mxu1 %v7241_v50  ;;  %v7492_v50 = vcombine.high %v7363_v47, %v7367_v48 }
 0x1cf   :  { %1893 = vmatprep.subr.bf16.mxu1 %v7250_v51  ;;  %v7371_v51 = vld [vmem:[%s12231_s1 + $0x8c0] sm:$0xff] }
 0x1d0   :  { %v7499_v55 = vcombine.low %v7371_v51, %v7375_v52 }
 0x1d2   :  { %1894 = vmatpush1.bf16.msra.mxu1 %v7249_v53  ;;  %v7500_v53 = vcombine.high %v7371_v51, %v7375_v52 }
 0x1d3   :  { %1895 = vmatprep.subr.bf16.mxu1 %v7258_v54  ;;  %v7383_v54 = vld [vmem:[%s12231_s1 + $0x920] sm:$0xff] }
 0x1d6   :  { %1896 = vmatpush1.bf16.msra.mxu1 %v7257_v57  ;;  %v7387_v57 = vld [vmem:[%s12231_s1 + $0x940] sm:$0xff] }
 0x1d7   :  { %1897 = vmatprep.subr.bf16.mxu1 %v7266_v58  ;;  %v7391_v58 = vld [vmem:[%s12231_s1 + $0x960] sm:$0xff] }
 0x1d8   :  { %v7516_v60 = vcombine.high %v7387_v57, %v7391_v58  ;;  %v7515_v63 = vcombine.low %v7387_v57, %v7391_v58  ;;  %v8702_v57 = vld [vmem:[%s12233_s2 + $0x404] ss:$8 sps:$4 sm:$0xff]  }
 0x1d9   :  { %v7376_v58 = vld [vmem:[%s12231_s1 + $0x8e8] sm:$0xff]  ;;  %3877 = vmatprep.subr.bf16.mxu0 %v8702_v57 }
 0x1da   :  { %1898 = vmatpush1.bf16.msra.mxu1 %v7265_v61  ;;  %v7395_v61 = vld [vmem:[%s12231_s1 + $0x980] sm:$0xff]  ;;  %v7452_v57 = vld [vmem:[%s12231_s1 + $0xb48] sm:$0xff] }
 0x1db   :  { %1899 = vmatprep.subr.bf16.mxu1 %v7274_v62  ;;  %v7399_v62 = vld [vmem:[%s12231_s1 + $0x9a0] sm:$0xff] }
 0x1dc   :  { %v7524_v0 = vcombine.high %v7395_v61, %v7399_v62  ;;  %v7523_v3 = vcombine.low %v7395_v61, %v7399_v62  ;;  %v8703_v61 = vld [vmem:[%s12233_s2 + $0x410] ss:$8 sps:$4 sm:$0xff]  }
 0x1de   :  { %1900 = vmatpush1.bf16.msra.mxu1 %v7273_v1  ;;  %v7403_v1 = vld [vmem:[%s12231_s1 + $0x9c0] sm:$0xff] }
 0x1df   :  { %1901 = vmatprep.subr.bf16.mxu1 %v7282_v2  ;;  %v7407_v2 = vld [vmem:[%s12231_s1 + $0x9e0] sm:$0xff] }
 0x1e0   :  { %v7531_v13 = vcombine.low %v7403_v1, %v7407_v2 }
 0x1e2   :  { %1902 = vmatpush1.bf16.msra.mxu1 %v7281_v6  ;;  %v7532_v6 = vcombine.high %v7403_v1, %v7407_v2  ;;  %v7384_v1 = vld [vmem:[%s12231_s1 + $0x928] sm:$0xff] }
 0x1e3   :  { %1903 = vmatprep.subr.bf16.mxu1 %v7290_v7 }
 0x1e6   :  { %1904 = vmatpush1.bf16.msra.mxu1 %v7289_v11 }
 0x1e7   :  { %1905 = vmatprep.subr.bf16.mxu1 %v7298_v12 }
 0x1ea   :  { %1906 = vmatpush1.bf16.msra.mxu1 %v7297_v15  ;;  %v7419_v15 = vld [vmem:[%s12231_s1 + $0xa40] sm:$0xff] }
 0x1eb   :  { %1907 = vmatprep.subr.bf16.mxu1 %v7306_v16  ;;  %v7423_v16 = vld [vmem:[%s12231_s1 + $0xa60] sm:$0xff] }
 0x1ec   :  { %v7548_v19 = vcombine.high %v7419_v15, %v7423_v16  ;;  %v7547_v23 = vcombine.low %v7419_v15, %v7423_v16  ;;  %v8714_v15 = vld [vmem:[%s12233_s2 + $0x444] ss:$8 sps:$4 sm:$0xff]  }
 0x1ed   :  { %v7396_v16 = vld [vmem:[%s12231_s1 + $0x988] sm:$0xff] }
 0x1ee   :  { %1908 = vmatpush1.bf16.msra.mxu1 %v7305_v21  ;;  %v7427_v21 = vld [vmem:[%s12231_s1 + $0xa80] sm:$0xff] }
 0x1ef   :  { %1909 = vmatprep.subr.bf16.mxu1 %v7314_v22  ;;  %v7431_v22 = vld [vmem:[%s12231_s1 + $0xaa0] sm:$0xff] }
 0x1f0   :  { %v7556_v25 = vcombine.high %v7427_v21, %v7431_v22  ;;  %v7555_v28 = vcombine.low %v7427_v21, %v7431_v22  ;;  %v7404_v21 = vld [vmem:[%s12231_s1 + $0x9c8] sm:$0xff] }
 0x1f1   :  { %v7408_v22 = vld [vmem:[%s12231_s1 + $0x9e8] sm:$0xff] }
 0x1f2   :  { %1910 = vmatpush1.bf16.msra.mxu1 %v7313_v26  ;;  %v7435_v26 = vld [vmem:[%s12231_s1 + $0xac0] sm:$0xff] }
 0x1f3   :  { %1911 = vmatprep.subr.bf16.mxu1 %v7322_v27  ;;  %v7439_v27 = vld [vmem:[%s12231_s1 + $0xae0] sm:$0xff] }
 0x1f4   :  { %v7564_v30 = vcombine.high %v7435_v26, %v7439_v27  ;;  %v7563_v33 = vcombine.low %v7435_v26, %v7439_v27  ;;  %v8717_v26 = vld [vmem:[%s12233_s2 + $0x454] ss:$8 sps:$4 sm:$0xff]   ;;  %v8715_v27 = vld [vmem:[%s12233_s2 + $0x450] ss:$8 sps:$4 sm:$0xff]  }
 0x1f6   :  { %1912 = vmatpush1.bf16.msra.mxu1 %v7321_v31  ;;  %v7443_v31 = vld [vmem:[%s12231_s1 + $0xb00] sm:$0xff] }
 0x1f7   :  { %1913 = vmatprep.subr.bf16.mxu1 %v7330_v32  ;;  %v7447_v32 = vld [vmem:[%s12231_s1 + $0xb20] sm:$0xff] }
 0x1f8   :  { %v7572_v34 = vcombine.high %v7443_v31, %v7447_v32  ;;  %v7571_v37 = vcombine.low %v7443_v31, %v7447_v32  ;;  %v7412_v31 = vld [vmem:[%s12231_s1 + $0xa08] sm:$0xff] }
 0x1f9   :  { %v7416_v32 = vld [vmem:[%s12231_s1 + $0xa28] sm:$0xff] }
 0x1fa   :  { %1914 = vmatpush1.bf16.msra.mxu1 %v7329_v17  ;;  %v7451_v17 = vld [vmem:[%s12231_s1 + $0xb40] sm:$0xff] }
 0x1fb   :  { %1915 = vmatprep.subr.bf16.mxu1 %v7338_v35  ;;  %v7455_v35 = vld [vmem:[%s12231_s1 + $0xb60] sm:$0xff] }
 0x1fc   :  { %v7580_v39 = vcombine.high %v7451_v17, %v7455_v35  ;;  %v7579_v5 = vcombine.low %v7451_v17, %v7455_v35  ;;  %v8723_v17 = vld [vmem:[%s12233_s2 + $0x474] ss:$8 sps:$4 sm:$0xff]   ;;  %v7533_v35 = vcombine.low %v7404_v21, %v7408_v22 }
 0x1fe   :  { %1916 = vmatpush1.bf16.msra.mxu1 %v7337_v10  ;;  %v7459_v10 = vld [vmem:[%s12231_s1 + $0xb80] sm:$0xff] }
 0x1ff   :  { %1917 = vmatprep.subr.bf16.mxu1 %v7346_v20  ;;  %v10360_v4 = vpop.f32.mrb[0].mxu0  ;;  %v7463_v20 = vld [vmem:[%s12231_s1 + $0xba0] sm:$0xff] }
 0x200   :  { %v10362_v7 = vpop.f32.mrb[1].mxu0  ;;  %v7588_v40 = vcombine.high %v7459_v10, %v7463_v20  ;;  %v7587_v43 = vcombine.low %v7459_v10, %v7463_v20  ;;  %v7542_v10 = vcombine.high %v7412_v31, %v7416_v32  ;;  %v8721_v20 = vld [vmem:[%s12233_s2 + $0x470] ss:$8 sps:$4 sm:$0xff]  }
 0x201   :  { %v2821_v11 = vpop.f32.mrb[2].mxu0 }
 0x202   :  { %1918 = vmatpush1.bf16.msra.mxu1 %v7345_v41  ;;  %v2822_v12 = vpop.f32.mrb[3].mxu0  ;;  %v7467_v41 = vld [vmem:[%s12231_s1 + $0xbc0] sm:$0xff]  ;;  %v7392_v11 = vld [vmem:[%s12231_s1 + $0x968] sm:$0xff] }
 0x203   :  { %2701 = vmatprep.subr.bf16.mxu1 %v7476_v42  ;;  %v7471_v42 = vld [vmem:[%s12231_s1 + $0xbe0] sm:$0xff] }
 0x204   :  { %v7596_v44 = vcombine.high %v7467_v41, %v7471_v42  ;;  %v7595_v47 = vcombine.low %v7467_v41, %v7471_v42  ;;  %v7428_v41 = vld [vmem:[%s12231_s1 + $0xa88] sm:$0xff] }
 0x205   :  { %1920 = vmatmul.mubr.bf16.vlgmr.msra.gmra.mrb[12].mxu1 %v10018_v24  ;;  %v7379_v24 = vld [vmem:[%s12231_s1 + $0x900] sm:$0xff]  ;;  %v7432_v42 = vld [vmem:[%s12231_s1 + $0xaa8] sm:$0xff] }
 0x206   :  { %2702 = vmatpush1.bf16.msra.mxu1 %v7475_v45  ;;  %2733 = vmatprep.mubr.bf16.mxu1 %v10021_v36  ;;  %v7508_v56 = vcombine.high %v7379_v24, %v7383_v54  ;;  %v7507_v59 = vcombine.low %v7379_v24, %v7383_v54  ;;  %v7348_v45 = vld [vmem:[%s12231_s1 + $0x808] sm:$0xff] }
 0x207   :  { %2703 = vmatprep.subr.bf16.mxu1 %v7484_v46  ;;  %v7352_v46 = vld [vmem:[%s12231_s1 + $0x828] sm:$0xff] }
 0x208   :  { %v7478_v48 = vcombine.high %v7348_v45, %v7352_v46  ;;  %v7477_v51 = vcombine.low %v7348_v45, %v7352_v46  ;;  %v7372_v54 = vld [vmem:[%s12231_s1 + $0x8c8] sm:$0xff]  ;;  %v8729_v45 = vld [vmem:[%s12233_s2 + $0x494] ss:$8 sps:$4 sm:$0xff]  }
 0x209   :  { %v7502_v62 = vcombine.high %v7372_v54, %v7376_v58  ;;  %v7501_v2 = vcombine.low %v7372_v54, %v7376_v58  ;;  %v8730_v54 = vld [vmem:[%s12233_s2 + $0x4a0] ss:$8 sps:$4 sm:$0xff]  }
 0x20a   :  { %2704 = vmatpush1.bf16.msra.mxu1 %v7483_v49  ;;  %v7356_v49 = vld [vmem:[%s12231_s1 + $0x848] sm:$0xff] }
 0x20b   :  { %2705 = vmatprep.subr.bf16.mxu1 %v7492_v50  ;;  %v7360_v50 = vld [vmem:[%s12231_s1 + $0x868] sm:$0xff] }
 0x20c   :  { %v7486_v52 = vcombine.high %v7356_v49, %v7360_v50  ;;  %v7485_v24 = vcombine.low %v7356_v49, %v7360_v50  ;;  %v7558_v49 = vcombine.high %v7428_v41, %v7432_v42  ;;  %v8727_v50 = vld [vmem:[%s12233_s2 + $0x490] ss:$8 sps:$4 sm:$0xff]   ;;  %v7456_v58 = vld [vmem:[%s12231_s1 + $0xb68] sm:$0xff] }
 0x20e   :  { %2706 = vmatpush1.bf16.msra.mxu1 %v7491_v29  ;;  %v7364_v29 = vld [vmem:[%s12231_s1 + $0x888] sm:$0xff] }
 0x20f   :  { %2707 = vmatprep.subr.bf16.mxu1 %v7500_v53  ;;  %v7368_v53 = vld [vmem:[%s12231_s1 + $0x8a8] sm:$0xff] }
 0x212   :  { %2708 = vmatpush1.bf16.msra.mxu1 %v7499_v55  ;;  %v8700_v55 = vld [vmem:[%s12233_s2 + $0x400] ss:$8 sps:$4 sm:$0xff]  }
 0x213   :  { %2709 = vmatprep.subr.bf16.mxu1 %v7508_v56  ;;  %v7494_v56 = vcombine.high %v7364_v29, %v7368_v53  ;;  %3878 = vmatpush1.bf16.msra.mxu0 %v8700_v55  ;;  %v8735_v55 = vld [vmem:[%s12233_s2 + $0x4b4] ss:$8 sps:$4 sm:$0xff]  }
 0x216   :  { %2710 = vmatpush1.bf16.msra.mxu1 %v7507_v59  ;;  %v8705_v59 = vld [vmem:[%s12233_s2 + $0x414] ss:$8 sps:$4 sm:$0xff]  }
 0x217   :  { %2711 = vmatprep.subr.bf16.mxu1 %v7516_v60  ;;  %v7493_v60 = vcombine.low %v7364_v29, %v7368_v53  ;;  %3879 = vmatprep.subr.bf16.mxu0 %v8705_v59  ;;  %v7444_v29 = vld [vmem:[%s12231_s1 + $0xb08] sm:$0xff] }
 0x218   :  { %3880 = vmatpush1.bf16.msra.mxu0 %v8703_v61  ;;  %v7448_v53 = vld [vmem:[%s12231_s1 + $0xb28] sm:$0xff] }
 0x219   :  { %v7574_v59 = vcombine.high %v7444_v29, %v7448_v53  ;;  %v8738_v61 = vld [vmem:[%s12233_s2 + $0x4c4] ss:$8 sps:$4 sm:$0xff]  }
 0x21a   :  { %2712 = vmatpush1.bf16.msra.mxu1 %v7515_v63  ;;  %v8708_v63 = vld [vmem:[%s12233_s2 + $0x424] ss:$8 sps:$4 sm:$0xff]  }
 0x21b   :  { %2713 = vmatprep.subr.bf16.mxu1 %v7524_v0  ;;  %v7380_v0 = vld [vmem:[%s12231_s1 + $0x908] sm:$0xff]  ;;  %3881 = vmatprep.subr.bf16.mxu0 %v8708_v63 }
 0x21c   :  { %v7509_v12 = vcombine.low %v7380_v0, %v7384_v1  ;;  %v7460_v63 = vld [vmem:[%s12231_s1 + $0xb88] sm:$0xff] }
 0x21e   :  { %2714 = vmatpush1.bf16.msra.mxu1 %v7523_v3  ;;  %v8706_v3 = vld [vmem:[%s12233_s2 + $0x420] ss:$8 sps:$4 sm:$0xff]  }
 0x21f   :  { %2715 = vmatprep.subr.bf16.mxu1 %v7532_v6  ;;  %v7510_v6 = vcombine.high %v7380_v0, %v7384_v1  ;;  %3882 = vmatpush1.bf16.msra.mxu0 %v8706_v3  ;;  %v7464_v0 = vld [vmem:[%s12231_s1 + $0xba8] sm:$0xff]  ;;  %v7582_v1 = vcombine.high %v7452_v57, %v7456_v58  ;;  %v7581_v3 = vcombine.low %v7452_v57, %v7456_v58  ;;  %v8747_v58 = vld [vmem:[%s12233_s2 + $0x4f4] ss:$8 sps:$4 sm:$0xff]  }
 0x220   :  { %3883 = vmatprep.subr.bf16.mxu0 %v8711_v8  ;;  %v7472_v8 = vld [vmem:[%s12231_s1 + $0xbe8] sm:$0xff] }
 0x222   :  { %2716 = vmatpush1.bf16.msra.mxu1 %v7531_v13  ;;  %v8709_v13 = vld [vmem:[%s12233_s2 + $0x430] ss:$8 sps:$4 sm:$0xff]  }
 0x223   :  { %2717 = vmatprep.subr.bf16.mxu1 %v7540_v14  ;;  %v7518_v14 = vcombine.high %v7388_v9, %v7392_v11  ;;  %3884 = vmatpush1.bf16.msra.mxu0 %v8709_v13  ;;  %v7354_v13 = vld [vmem:[%s12231_s1 + $0x838] sm:$0xff] }
 0x224   :  { %3885 = vmatprep.subr.bf16.mxu0 %v8714_v15 }
 0x226   :  { %2718 = vmatpush1.bf16.msra.mxu1 %v7539_v18  ;;  %v7400_v18 = vld [vmem:[%s12231_s1 + $0x9a8] sm:$0xff] }
 0x227   :  { %2719 = vmatprep.subr.bf16.mxu1 %v7548_v19  ;;  %v7517_v19 = vcombine.low %v7388_v9, %v7392_v11  ;;  %v7590_v9 = vcombine.high %v7460_v63, %v7464_v0  ;;  %v7589_v11 = vcombine.low %v7460_v63, %v7464_v0  ;;  %v8750_v63 = vld [vmem:[%s12233_s2 + $0x504] ss:$8 sps:$4 sm:$0xff]   ;;  %v7434_v0 = vld [vmem:[%s12231_s1 + $0xab8] sm:$0xff] }
 0x22a   :  { %2720 = vmatpush1.bf16.msra.mxu1 %v7547_v23  ;;  %v8712_v23 = vld [vmem:[%s12233_s2 + $0x440] ss:$8 sps:$4 sm:$0xff]  }
 0x22b   :  { %2721 = vmatprep.subr.bf16.mxu1 %v7556_v25  ;;  %v7526_v25 = vcombine.high %v7396_v16, %v7400_v18  ;;  %3886 = vmatpush1.bf16.msra.mxu0 %v8712_v23  ;;  %v7370_v23 = vld [vmem:[%s12231_s1 + $0x8b8] sm:$0xff] }
 0x22c   :  { %3887 = vmatprep.subr.bf16.mxu0 %v8717_v26 }
 0x22e   :  { %2722 = vmatpush1.bf16.msra.mxu1 %v7555_v28  ;;  %v8720_v28 = vld [vmem:[%s12233_s2 + $0x464] ss:$8 sps:$4 sm:$0xff]  }
 0x22f   :  { %2723 = vmatprep.subr.bf16.mxu1 %v7564_v30  ;;  %v7525_v30 = vcombine.low %v7396_v16, %v7400_v18  ;;  %3888 = vmatpush1.bf16.msra.mxu0 %v8715_v27  ;;  %v7358_v16 = vld [vmem:[%s12231_s1 + $0x858] sm:$0xff] }
 0x230   :  { %3889 = vmatprep.subr.bf16.mxu0 %v8720_v28  ;;  %v7362_v18 = vld [vmem:[%s12231_s1 + $0x878] sm:$0xff] }
 0x231   :  { %v7489_v26 = vcombine.low %v7358_v16, %v7362_v18  ;;  %v7374_v27 = vld [vmem:[%s12231_s1 + $0x8d8] sm:$0xff] }
 0x232   :  { %2724 = vmatpush1.bf16.msra.mxu1 %v7563_v33  ;;  %v7534_v33 = vcombine.high %v7404_v21, %v7408_v22  ;;  %v7366_v22 = vld [vmem:[%s12231_s1 + $0x898] sm:$0xff] }
 0x233   :  { %2725 = vmatprep.subr.bf16.mxu1 %v7572_v34  ;;  %v8718_v34 = vld [vmem:[%s12233_s2 + $0x460] ss:$8 sps:$4 sm:$0xff]   ;;  %v7378_v28 = vld [vmem:[%s12231_s1 + $0x8f8] sm:$0xff] }
 0x234   :  { %3890 = vmatpush1.bf16.msra.mxu0 %v8718_v34  ;;  %v7506_v34 = vcombine.high %v7374_v27, %v7378_v28 }
 0x235   :  { %3891 = vmatprep.subr.bf16.mxu0 %v8723_v17  ;;  %v7505_v17 = vcombine.low %v7374_v27, %v7378_v28  ;;  %v7474_v27 = vld [vmem:[%s12231_s1 + $0xbf8] sm:$0xff] }
 0x236   :  { %2726 = vmatpush1.bf16.msra.mxu1 %v7571_v37  ;;  %v7420_v37 = vld [vmem:[%s12231_s1 + $0xa48] sm:$0xff] }
 0x237   :  { %2727 = vmatprep.subr.bf16.mxu1 %v7580_v39  ;;  %v7424_v39 = vld [vmem:[%s12231_s1 + $0xa68] sm:$0xff] }
 0x238   :  { %v7549_v46 = vcombine.low %v7420_v37, %v7424_v39  ;;  %3892 = vmatpush1.bf16.msra.mxu0 %v8721_v20  ;;  %v7402_v20 = vld [vmem:[%s12231_s1 + $0x9b8] sm:$0xff] }
 0x23a   :  { %2728 = vmatpush1.bf16.msra.mxu1 %v7579_v5  ;;  %v8726_v5 = vld [vmem:[%s12233_s2 + $0x484] ss:$8 sps:$4 sm:$0xff]  }
 0x23b   :  { %2729 = vmatprep.subr.bf16.mxu1 %v7588_v40  ;;  %v7541_v40 = vcombine.low %v7412_v31, %v7416_v32  ;;  %3893 = vmatprep.subr.bf16.mxu0 %v8726_v5  ;;  %v7497_v31 = vcombine.low %v7366_v22, %v7370_v23  ;;  %v7382_v32 = vld [vmem:[%s12231_s1 + $0x918] sm:$0xff] }
 0x23e   :  { %2730 = vmatpush1.bf16.msra.mxu1 %v7587_v43  ;;  %v7550_v43 = vcombine.high %v7420_v37, %v7424_v39 }
 0x23f   :  { %2731 = vmatprep.subr.bf16.mxu1 %v7596_v44  ;;  %v8724_v44 = vld [vmem:[%s12233_s2 + $0x480] ss:$8 sps:$4 sm:$0xff]  }
 0x240   :  { %3894 = vmatpush1.bf16.msra.mxu0 %v8724_v44  ;;  %v8741_v44 = vld [vmem:[%s12233_s2 + $0x4d4] ss:$8 sps:$4 sm:$0xff]  }
 0x241   :  { %3895 = vmatprep.subr.bf16.mxu0 %v8729_v45 }
 0x242   :  { %2732 = vmatpush1.bf16.msra.mxu1 %v7595_v47  ;;  %v7436_v47 = vld [vmem:[%s12231_s1 + $0xac8] sm:$0xff] }
 0x243   :  { %2742 = vmatprep.subr.bf16.mxu1 %v7478_v48  ;;  %v7440_v48 = vld [vmem:[%s12231_s1 + $0xae8] sm:$0xff] }
 0x244   :  { %3896 = vmatpush1.bf16.msra.mxu0 %v8727_v50 }
 0x245   :  { %2734 = vmatmul.mubr.bf16.vlgmr.msra.gmra.mrb[0].mxu1 %v10024_v38 }
 0x246   :  { %2743 = vmatpush1.bf16.msra.mxu1 %v7477_v51  ;;  %2774 = vmatprep.mubr.bf16.mxu1 %v10021_v36  ;;  %v8732_v51 = vld [vmem:[%s12233_s2 + $0x4a4] ss:$8 sps:$4 sm:$0xff]  }
 0x247   :  { %2744 = vmatprep.subr.bf16.mxu1 %v7486_v52  ;;  %v7557_v52 = vcombine.low %v7428_v41, %v7432_v42  ;;  %3897 = vmatprep.subr.bf16.mxu0 %v8732_v51  ;;  %v7406_v41 = vld [vmem:[%s12231_s1 + $0x9d8] sm:$0xff] }
 0x248   :  { %3898 = vmatpush1.bf16.msra.mxu0 %v8730_v54  ;;  %v7410_v42 = vld [vmem:[%s12231_s1 + $0x9f8] sm:$0xff] }
 0x249   :  { %3899 = vmatprep.subr.bf16.mxu0 %v8735_v55  ;;  %v7537_v54 = vcombine.low %v7406_v41, %v7410_v42  ;;  %v7422_v55 = vld [vmem:[%s12231_s1 + $0xa58] sm:$0xff] }
 0x24a   :  { %2745 = vmatpush1.bf16.msra.mxu1 %v7485_v24  ;;  %v7566_v24 = vcombine.high %v7436_v47, %v7440_v48 }
 0x24b   :  { %2746 = vmatprep.subr.bf16.mxu1 %v7494_v56  ;;  %v7565_v56 = vcombine.low %v7436_v47, %v7440_v48 }
 0x24e   :  { %2747 = vmatpush1.bf16.msra.mxu1 %v7493_v60  ;;  %v8733_v60 = vld [vmem:[%s12233_s2 + $0x4b0] ss:$8 sps:$4 sm:$0xff]  }
 0x24f   :  { %2748 = vmatprep.subr.bf16.mxu1 %v7502_v62  ;;  %v7573_v62 = vcombine.low %v7444_v29, %v7448_v53  ;;  %3900 = vmatpush1.bf16.msra.mxu0 %v8733_v60  ;;  %v7538_v29 = vcombine.high %v7406_v41, %v7410_v42  ;;  %v7414_v53 = vld [vmem:[%s12231_s1 + $0xa18] sm:$0xff] }
 0x250   :  { %3901 = vmatprep.subr.bf16.mxu0 %v8738_v61  ;;  %v7430_v61 = vld [vmem:[%s12231_s1 + $0xa98] sm:$0xff] }
 0x252   :  { %2749 = vmatpush1.bf16.msra.mxu1 %v7501_v2  ;;  %v8736_v2 = vld [vmem:[%s12233_s2 + $0x4c0] ss:$8 sps:$4 sm:$0xff]  }
 0x253   :  { %2750 = vmatprep.subr.bf16.mxu1 %v7510_v6  ;;  %v7468_v6 = vld [vmem:[%s12231_s1 + $0xbc8] sm:$0xff]  ;;  %3902 = vmatpush1.bf16.msra.mxu0 %v8736_v2  ;;  %v7562_v2 = vcombine.high %v7430_v61, %v7434_v0 }
 0x254   :  { %v7597_v15 = vcombine.low %v7468_v6, %v7472_v8  ;;  %3903 = vmatprep.subr.bf16.mxu0 %v8741_v44 }
 0x256   :  { %2751 = vmatpush1.bf16.msra.mxu1 %v7509_v12  ;;  %v7350_v12 = vld [vmem:[%s12231_s1 + $0x818] sm:$0xff] }
 0x257   :  { %2752 = vmatprep.subr.bf16.mxu1 %v7518_v14  ;;  %v7598_v14 = vcombine.high %v7468_v6, %v7472_v8  ;;  %v7481_v21 = vcombine.low %v7350_v12, %v7354_v13  ;;  %v7442_v6 = vld [vmem:[%s12231_s1 + $0xaf8] sm:$0xff]  ;;  %v7561_v8 = vcombine.low %v7430_v61, %v7434_v0  ;;  %v8778_v0 = vld [vmem:[%s12233_s2 + $0x5a0] ss:$8 sps:$4 sm:$0xff]  }
 0x258   :  { %v8777_v61 = vld [vmem:[%s12233_s2 + $0x594] ss:$8 sps:$4 sm:$0xff]  }
 0x25a   :  { %2753 = vmatpush1.bf16.msra.mxu1 %v7517_v19  ;;  %v7482_v19 = vcombine.high %v7350_v12, %v7354_v13  ;;  %v7450_v12 = vld [vmem:[%s12231_s1 + $0xb38] sm:$0xff] }
 0x25b   :  { %2754 = vmatprep.subr.bf16.mxu1 %v7526_v25  ;;  %v7490_v25 = vcombine.high %v7358_v16, %v7362_v18  ;;  %v7458_v16 = vld [vmem:[%s12231_s1 + $0xb78] sm:$0xff] }
 0x25e   :  { %2755 = vmatpush1.bf16.msra.mxu1 %v7525_v30  ;;  %v7498_v30 = vcombine.high %v7366_v22, %v7370_v23  ;;  %v7466_v22 = vld [vmem:[%s12231_s1 + $0xbb8] sm:$0xff] }
 0x25f   :  { %2756 = vmatprep.subr.bf16.mxu1 %v7534_v33  ;;  %v7386_v33 = vld [vmem:[%s12231_s1 + $0x938] sm:$0xff] }
 0x260   :  { %v7514_v37 = vcombine.high %v7382_v32, %v7386_v33  ;;  %v7513_v39 = vcombine.low %v7382_v32, %v7386_v33 }
 0x262   :  { %2757 = vmatpush1.bf16.msra.mxu1 %v7533_v35  ;;  %v7394_v35 = vld [vmem:[%s12231_s1 + $0x978] sm:$0xff] }
 0x263   :  { %2758 = vmatprep.subr.bf16.mxu1 %v7542_v10  ;;  %v7398_v10 = vld [vmem:[%s12231_s1 + $0x998] sm:$0xff] }
 0x264   :  { %v7529_v51 = vcombine.low %v7398_v10, %v7402_v20 }
 0x266   :  { %2759 = vmatpush1.bf16.msra.mxu1 %v7541_v40 }
 0x267   :  { %2760 = vmatprep.subr.bf16.mxu1 %v7550_v43  ;;  %v7530_v43 = vcombine.high %v7398_v10, %v7402_v20 }
 0x26a   :  { %2761 = vmatpush1.bf16.msra.mxu1 %v7549_v46  ;;  %v8739_v46 = vld [vmem:[%s12233_s2 + $0x4d0] ss:$8 sps:$4 sm:$0xff]  }
 0x26b   :  { %2762 = vmatprep.subr.bf16.mxu1 %v7558_v49  ;;  %3904 = vmatpush1.bf16.msra.mxu0 %v8739_v46 }
 0x26e   :  { %2763 = vmatpush1.bf16.msra.mxu1 %v7557_v52 }
 0x26f   :  { %2764 = vmatprep.subr.bf16.mxu1 %v7566_v24  ;;  %v8742_v24 = vld [vmem:[%s12233_s2 + $0x4e0] ss:$8 sps:$4 sm:$0xff]  }
 0x272   :  { %2765 = vmatpush1.bf16.msra.mxu1 %v7565_v56  ;;  %v7426_v56 = vld [vmem:[%s12231_s1 + $0xa78] sm:$0xff] }
 0x273   :  { %2766 = vmatprep.subr.bf16.mxu1 %v7574_v59  ;;  %v8745_v59 = vld [vmem:[%s12233_s2 + $0x4f0] ss:$8 sps:$4 sm:$0xff]  }
 0x276   :  { %2767 = vmatpush1.bf16.msra.mxu1 %v7573_v62  ;;  %v7554_v62 = vcombine.high %v7422_v55, %v7426_v56 }
 0x277   :  { %2768 = vmatprep.subr.bf16.mxu1 %v7582_v1  ;;  %v7553_v1 = vcombine.low %v7422_v55, %v7426_v56  ;;  %v8768_v55 = vld [vmem:[%s12233_s2 + $0x564] ss:$8 sps:$4 sm:$0xff]   ;;  %v8766_v56 = vld [vmem:[%s12233_s2 + $0x560] ss:$8 sps:$4 sm:$0xff]  }
 0x27a   :  { %2769 = vmatpush1.bf16.msra.mxu1 %v7581_v3  ;;  %v7438_v3 = vld [vmem:[%s12231_s1 + $0xad8] sm:$0xff] }
 0x27b   :  { %2770 = vmatprep.subr.bf16.mxu1 %v7590_v9  ;;  %v7570_v9 = vcombine.high %v7438_v3, %v7442_v6  ;;  %v7569_v13 = vcombine.low %v7438_v3, %v7442_v6  ;;  %v8786_v6 = vld [vmem:[%s12233_s2 + $0x5c4] ss:$8 sps:$4 sm:$0xff]  }
 0x27e   :  { %2771 = vmatpush1.bf16.msra.mxu1 %v7589_v11  ;;  %v7446_v11 = vld [vmem:[%s12231_s1 + $0xb18] sm:$0xff] }
 0x27f   :  { %2772 = vmatprep.subr.bf16.mxu1 %v7598_v14  ;;  %v7578_v14 = vcombine.high %v7446_v11, %v7450_v12  ;;  %v7577_v18 = vcombine.low %v7446_v11, %v7450_v12  ;;  %v8789_v11 = vld [vmem:[%s12233_s2 + $0x5d4] ss:$8 sps:$4 sm:$0xff]  }
 0x282   :  { %2773 = vmatpush1.bf16.msra.mxu1 %v7597_v15  ;;  %v7454_v15 = vld [vmem:[%s12231_s1 + $0xb58] sm:$0xff] }
 0x283   :  { %2824 = vmatprep.subr.bf16.mxu1 %v7482_v19  ;;  %v7586_v19 = vcombine.high %v7454_v15, %v7458_v16  ;;  %v7585_v23 = vcombine.low %v7454_v15, %v7458_v16  ;;  %v8792_v15 = vld [vmem:[%s12233_s2 + $0x5e4] ss:$8 sps:$4 sm:$0xff]  }
 0x285   :  { %2775 = vmatmul.mubr.bf16.vlgmr.msra.gmra.mrb[4].mxu1 %v10024_v38 }
 0x286   :  { %2825 = vmatpush1.bf16.msra.mxu1 %v7481_v21  ;;  %2856 = vmatprep.mubr.bf16.mxu1 %v10021_v36  ;;  %v7390_v36 = vld [vmem:[%s12231_s1 + $0x958] sm:$0xff] }
 0x287   :  { %2826 = vmatprep.subr.bf16.mxu1 %v7490_v25  ;;  %v7522_v5 = vcombine.high %v7390_v36, %v7394_v35  ;;  %v7521_v40 = vcombine.low %v7390_v36, %v7394_v35  ;;  %v7462_v21 = vld [vmem:[%s12231_s1 + $0xb98] sm:$0xff] }
 0x288   :  { %v7594_v25 = vcombine.high %v7462_v21, %v7466_v22  ;;  %v7593_v28 = vcombine.low %v7462_v21, %v7466_v22 }
 0x28a   :  { %2827 = vmatpush1.bf16.msra.mxu1 %v7489_v26  ;;  %v7470_v26 = vld [vmem:[%s12231_s1 + $0xbd8] sm:$0xff] }
 0x28b   :  { %2828 = vmatprep.subr.bf16.mxu1 %v7498_v30  ;;  %v7602_v30 = vcombine.high %v7470_v26, %v7474_v27 }
 0x28e   :  { %2829 = vmatpush1.bf16.msra.mxu1 %v7497_v31  ;;  %v7601_v31 = vcombine.low %v7470_v26, %v7474_v27 }
 0x28f   :  { %2830 = vmatprep.subr.bf16.mxu1 %v7506_v34 }
 0x292   :  { %2831 = vmatpush1.bf16.msra.mxu1 %v7505_v17 }
 0x293   :  { %2832 = vmatprep.subr.bf16.mxu1 %v7514_v37 }
 0x296   :  { %2833 = vmatpush1.bf16.msra.mxu1 %v7513_v39 }
 0x297   :  { %2834 = vmatprep.subr.bf16.mxu1 %v7522_v5 }
 0x298   :  { %v1880_v45 = vpop.f32.mrb[8].mxu1 }
 0x299   :  { %v10645_v47 = vadd.f32 %v10360_v4, %v1880_v45  ;;  %v1882_v48 = vpop.f32.mrb[9].mxu1  ;;  %v8744_v4 = vld [vmem:[%s12233_s2 + $0x4e4] ss:$8 sps:$4 sm:$0xff]   ;;  %v8748_v45 = vld [vmem:[%s12233_s2 + $0x500] ss:$8 sps:$4 sm:$0xff]  }
 0x29a   :  { %v10648_v49 = vadd.f32 %v10362_v7, %v1882_v48  ;;  %v1884_v50 = vpop.f32.mrb[10].mxu1  ;;  %2835 = vmatpush1.bf16.msra.mxu1 %v7521_v40  ;;  %v7418_v7 = vld [vmem:[%s12231_s1 + $0xa38] sm:$0xff]  ;;  %3905 = vmatprep.subr.bf16.mxu0 %v8744_v4  ;;  %v8762_v4 = vld [vmem:[%s12233_s2 + $0x544] ss:$8 sps:$4 sm:$0xff]  }
 0x29b   :  { %v1885_v52 = vpop.f32.mrb[11].mxu1  ;;  %2836 = vmatprep.subr.bf16.mxu1 %v7530_v43  ;;  %3906 = vmatpush1.bf16.msra.mxu0 %v8742_v24  ;;  %v7546_v57 = vcombine.high %v7414_v53, %v7418_v7  ;;  %v7545_v60 = vcombine.low %v7414_v53, %v7418_v7  ;;  %v8753_v48 = vld [vmem:[%s12233_s2 + $0x514] ss:$8 sps:$4 sm:$0xff]   ;;  %v8751_v50 = vld [vmem:[%s12233_s2 + $0x510] ss:$8 sps:$4 sm:$0xff]   ;;  %vm2877_vm7 = vcmp.gt.f32.partialorder %v10645_v47, 0.0 }
 0x29c   :  { %3907 = vmatprep.subr.bf16.mxu0 %v8747_v58  ;;  %v8754_v52 = vld [vmem:[%s12233_s2 + $0x520] ss:$8 sps:$4 sm:$0xff]   ;;  %v8757_v53 = vld [vmem:[%s12233_s2 + $0x530] ss:$8 sps:$4 sm:$0xff]   ;;  %v8765_v24 = vld [vmem:[%s12233_s2 + $0x554] ss:$8 sps:$4 sm:$0xff]  }
 0x29d   :  { %v8760_v7 = vld [vmem:[%s12233_s2 + $0x540] ss:$8 sps:$4 sm:$0xff]   ;;  %v8769_v58 = vld [vmem:[%s12233_s2 + $0x570] ss:$8 sps:$4 sm:$0xff]   ;;  %v2886_v3 = vmul.f32 0.2, %v10648_v49 }
 0x29e   :  { %2837 = vmatpush1.bf16.msra.mxu1 %v7529_v51  ;;  %v8756_v51 = vld [vmem:[%s12233_s2 + $0x524] ss:$8 sps:$4 sm:$0xff]   ;;  %vm2878_vm4 = vcmp.gt.f32.partialorder %v10648_v49, 0.0 }
 0x29f   :  { %2838 = vmatprep.subr.bf16.mxu1 %v7538_v29  ;;  %3908 = vmatpush1.bf16.msra.mxu0 %v8745_v59  ;;  %v8759_v29 = vld [vmem:[%s12233_s2 + $0x534] ss:$8 sps:$4 sm:$0xff]   ;;  %v8774_v59 = vld [vmem:[%s12233_s2 + $0x584] ss:$8 sps:$4 sm:$0xff]  }
 0x2a0   :  { %3918 = vmatprep.subr.bf16.mxu0 %v8750_v63  ;;  %v8780_v63 = vld [vmem:[%s12233_s2 + $0x5a4] ss:$8 sps:$4 sm:$0xff]  }
 0x2a2   :  { %2839 = vmatpush1.bf16.msra.mxu1 %v7537_v54  ;;  %v8763_v54 = vld [vmem:[%s12233_s2 + $0x550] ss:$8 sps:$4 sm:$0xff]  }
 0x2a3   :  { %2840 = vmatprep.subr.bf16.mxu1 %v7546_v57  ;;  %v8771_v57 = vld [vmem:[%s12233_s2 + $0x574] ss:$8 sps:$4 sm:$0xff]  }
 0x2a6   :  { %2841 = vmatpush1.bf16.msra.mxu1 %v7545_v60  ;;  %v8772_v60 = vld [vmem:[%s12233_s2 + $0x580] ss:$8 sps:$4 sm:$0xff]  }
 0x2a7   :  { %2842 = vmatprep.subr.bf16.mxu1 %v7554_v62  ;;  %v8775_v62 = vld [vmem:[%s12233_s2 + $0x590] ss:$8 sps:$4 sm:$0xff]  }
 0x2aa   :  { %2843 = vmatpush1.bf16.msra.mxu1 %v7553_v1  ;;  %v8783_v1 = vld [vmem:[%s12233_s2 + $0x5b4] ss:$8 sps:$4 sm:$0xff]  }
 0x2ab   :  { %2844 = vmatprep.subr.bf16.mxu1 %v7562_v2  ;;  %v8781_v2 = vld [vmem:[%s12233_s2 + $0x5b0] ss:$8 sps:$4 sm:$0xff]  }
 0x2ae   :  { %2845 = vmatpush1.bf16.msra.mxu1 %v7561_v8  ;;  %v8784_v8 = vld [vmem:[%s12233_s2 + $0x5c0] ss:$8 sps:$4 sm:$0xff]  }
 0x2af   :  { %2846 = vmatprep.subr.bf16.mxu1 %v7570_v9  ;;  %v2894_v9 = vsel %vm2878_vm4, %v10648_v49, %v2886_v3 }
 0x2b0   :  { %v2902_v12 = vpack.c.bf16 %v2894_v9, %v2894_v9 }
 0x2b2   :  { %2847 = vmatpush1.bf16.msra.mxu1 %v7569_v13  ;;  %v8787_v13 = vld [vmem:[%s12233_s2 + $0x5d0] ss:$8 sps:$4 sm:$0xff]   ;;  %v2918_v21 = vrot.slane %v2902_v12, 7 }
 0x2b3   :  { %2848 = vmatprep.subr.bf16.mxu1 %v7578_v14 }
 0x2b6   :  { %2849 = vmatpush1.bf16.msra.mxu1 %v7577_v18 }
 0x2b7   :  { %2850 = vmatprep.subr.bf16.mxu1 %v7586_v19 }
 0x2ba   :  { %2851 = vmatpush1.bf16.msra.mxu1 %v7585_v23 }
 0x2bb   :  { %2852 = vmatprep.subr.bf16.mxu1 %v7594_v25  ;;  %v8790_v25 = vld [vmem:[%s12233_s2 + $0x5e0] ss:$8 sps:$4 sm:$0xff]  }
 0x2be   :  { %2853 = vmatpush1.bf16.msra.mxu1 %v7593_v28  ;;  %v8795_v28 = vld [vmem:[%s12233_s2 + $0x5f4] ss:$8 sps:$4 sm:$0xff]  }
 0x2bf   :  { %2854 = vmatprep.subr.bf16.mxu1 %v7602_v30 }
 0x2c2   :  { %2855 = vmatpush1.bf16.msra.mxu1 %v7601_v31 }
 0x2c5   :  { %2857 = vmatmul.mubr.bf16.vlgmr.msra.gmra.mrb[12].mxu1 %v10024_v38 }
 0x318   :  { %v2735_v32 = vpop.f32.mrb[0].mxu1 }
 0x319   :  { %vm2873_vm0 = vcmp.gt.f32.partialorder %v2735_v32, 0.0  ;;  %v2881_v33 = vmul.f32 0.2, %v2735_v32  ;;  %v2737_v34 = vpop.f32.mrb[1].mxu1 }
 0x31a   :  { %vm2874_vm1 = vcmp.gt.f32.partialorder %v2737_v34, 0.0  ;;  %v2882_v17 = vmul.f32 0.2, %v2737_v34  ;;  %v2739_v36 = vpop.f32.mrb[2].mxu1 }
 0x31b   :  { %v2889_v35 = vsel %vm2873_vm0, %v2735_v32, %v2881_v33  ;;  %v2740_v37 = vpop.f32.mrb[3].mxu1  ;;  %v8793_v33 = vld [vmem:[%s12233_s2 + $0x5f0] ss:$8 sps:$4 sm:$0xff]   ;;  %v8798_v36 = vld [vmem:[%s12233_s2 + $0x604] ss:$8 sps:$4 sm:$0xff]  }
 0x31c   :  { %v2897_v39 = vpack.c.bf16 %v2889_v35, %v2889_v35  ;;  %v2890_v10 = vsel %vm2874_vm1, %v2737_v34, %v2882_v17  ;;  %v10827_v34 = vsel %vm2921_vm2, 0, %v2918_v21  ;;  %v8843_v21 = vld [vmem:[%s12233_s2 + $0x6f4] ss:$8 sps:$4 sm:$0xff]   ;;  %vm6944_vm1 = vcmask 517120  }
 0x31d   :  { %v2898_v20 = vpack.c.bf16 %v2890_v10, %v2890_v10  ;;  %v10848_v10 = vsel %vm2939_vm3, %v10827_v34, 0 }
 0x31e   :  { %v2913_v5 = vrot.slane %v2897_v39, 7 }
 0x31f   :  { %v2914_v40 = vrot.slane %v2898_v20, 7 }
 0x320   :  { %v10715_v41 = vsel %vm2921_vm2, 0, %v2913_v5  ;;  %v8796_v5 = vld [vmem:[%s12233_s2 + $0x600] ss:$8 sps:$4 sm:$0xff]  }
 0x321   :  { %v10719_v38 = vsel %vm2939_vm3, %v10715_v41, 0  ;;  %v10722_v42 = vsel %vm2921_vm2, 0, %v2914_v40 }
 0x322   :  { %v10726_v43 = vsel %vm2939_vm3, %v10722_v42, 0  ;;  %v3221_v46 = vrot.slane %v10719_v38, 1 }
 0x323   :  { %v3222_v44 = vrot.slane %v10726_v43, 1 }
 0x325   :  { %3909 = vmatprep.mubr.bf16.mxu0 %v3222_v44  ;;  %v8801_v44 = vld [vmem:[%s12233_s2 + $0x614] ss:$8 sps:$4 sm:$0xff]  }
 0x326   :  { %3910 = vmatmul.mubr.bf16.vlgmr.msra.gmra.mrb[4].mxu0 %v3221_v46  ;;  %v8799_v46 = vld [vmem:[%s12233_s2 + $0x610] ss:$8 sps:$4 sm:$0xff]  }
 0x327   :  { %3919 = vmatpush1.bf16.msra.mxu0 %v8748_v45  ;;  %v3226_v45 = vrot.slane %v10848_v10, 1 }
 0x328   :  { %3920 = vmatprep.subr.bf16.mxu0 %v8753_v48  ;;  %v8804_v48 = vld [vmem:[%s12233_s2 + $0x624] ss:$8 sps:$4 sm:$0xff]  }
 0x32b   :  { %3921 = vmatpush1.bf16.msra.mxu0 %v8751_v50  ;;  %v8802_v50 = vld [vmem:[%s12233_s2 + $0x620] ss:$8 sps:$4 sm:$0xff]  }
 0x32c   :  { %3922 = vmatprep.subr.bf16.mxu0 %v8756_v51  ;;  %v8807_v51 = vld [vmem:[%s12233_s2 + $0x634] ss:$8 sps:$4 sm:$0xff]  }
 0x32f   :  { %3923 = vmatpush1.bf16.msra.mxu0 %v8754_v52  ;;  %v8805_v52 = vld [vmem:[%s12233_s2 + $0x630] ss:$8 sps:$4 sm:$0xff]  }
 0x330   :  { %3924 = vmatprep.subr.bf16.mxu0 %v8759_v29  ;;  %v8810_v29 = vld [vmem:[%s12233_s2 + $0x644] ss:$8 sps:$4 sm:$0xff]  }
 0x333   :  { %3925 = vmatpush1.bf16.msra.mxu0 %v8757_v53  ;;  %v8808_v53 = vld [vmem:[%s12233_s2 + $0x640] ss:$8 sps:$4 sm:$0xff]  }
 0x334   :  { %3926 = vmatprep.subr.bf16.mxu0 %v8762_v4  ;;  %v8813_v4 = vld [vmem:[%s12233_s2 + $0x654] ss:$8 sps:$4 sm:$0xff]  }
 0x337   :  { %3927 = vmatpush1.bf16.msra.mxu0 %v8760_v7  ;;  %v8811_v7 = vld [vmem:[%s12233_s2 + $0x650] ss:$8 sps:$4 sm:$0xff]  }
 0x338   :  { %3928 = vmatprep.subr.bf16.mxu0 %v8765_v24  ;;  %v8816_v24 = vld [vmem:[%s12233_s2 + $0x664] ss:$8 sps:$4 sm:$0xff]  }
 0x33b   :  { %3929 = vmatpush1.bf16.msra.mxu0 %v8763_v54  ;;  %v8814_v54 = vld [vmem:[%s12233_s2 + $0x660] ss:$8 sps:$4 sm:$0xff]  }
 0x33c   :  { %3930 = vmatprep.subr.bf16.mxu0 %v8768_v55  ;;  %v8819_v55 = vld [vmem:[%s12233_s2 + $0x674] ss:$8 sps:$4 sm:$0xff]  }
 0x33f   :  { %3931 = vmatpush1.bf16.msra.mxu0 %v8766_v56  ;;  %v8817_v56 = vld [vmem:[%s12233_s2 + $0x670] ss:$8 sps:$4 sm:$0xff]  }
 0x340   :  { %3932 = vmatprep.subr.bf16.mxu0 %v8771_v57  ;;  %v8822_v57 = vld [vmem:[%s12233_s2 + $0x684] ss:$8 sps:$4 sm:$0xff]  }
 0x343   :  { %3933 = vmatpush1.bf16.msra.mxu0 %v8769_v58  ;;  %v8820_v58 = vld [vmem:[%s12233_s2 + $0x680] ss:$8 sps:$4 sm:$0xff]  }
 0x344   :  { %3934 = vmatprep.subr.bf16.mxu0 %v8774_v59  ;;  %v8825_v59 = vld [vmem:[%s12233_s2 + $0x694] ss:$8 sps:$4 sm:$0xff]  }
 0x347   :  { %3935 = vmatpush1.bf16.msra.mxu0 %v8772_v60  ;;  %v8823_v60 = vld [vmem:[%s12233_s2 + $0x690] ss:$8 sps:$4 sm:$0xff]  }
 0x348   :  { %3936 = vmatprep.subr.bf16.mxu0 %v8777_v61  ;;  %v8828_v61 = vld [vmem:[%s12233_s2 + $0x6a4] ss:$8 sps:$4 sm:$0xff]  }
 0x34b   :  { %3937 = vmatpush1.bf16.msra.mxu0 %v8775_v62  ;;  %v8826_v62 = vld [vmem:[%s12233_s2 + $0x6a0] ss:$8 sps:$4 sm:$0xff]  }
 0x34c   :  { %3938 = vmatprep.subr.bf16.mxu0 %v8780_v63  ;;  %v8831_v63 = vld [vmem:[%s12233_s2 + $0x6b4] ss:$8 sps:$4 sm:$0xff]  }
 0x34f   :  { %3939 = vmatpush1.bf16.msra.mxu0 %v8778_v0  ;;  %v2885_v0 = vmul.f32 0.2, %v10645_v47 }
 0x350   :  { %3940 = vmatprep.subr.bf16.mxu0 %v8783_v1  ;;  %v8829_v1 = vld [vmem:[%s12233_s2 + $0x6b0] ss:$8 sps:$4 sm:$0xff]  }
 0x351   :  { %v2893_v3 = vsel %vm2877_vm7, %v10645_v47, %v2885_v0  ;;  %v8840_v47 = vld [vmem:[%s12233_s2 + $0x6e4] ss:$8 sps:$4 sm:$0xff]   ;;  %v8880_v0 = vld [vmem:[%s12233_s2 + $0x7c0] ss:$8 sps:$4 sm:$0xff]  }
 0x352   :  { %v2901_v9 = vpack.c.bf16 %v2893_v3, %v2893_v3  ;;  %v8883_v3 = vld [vmem:[%s12233_s2 + $0x7d0] ss:$8 sps:$4 sm:$0xff]  }
 0x353   :  { %3941 = vmatpush1.bf16.msra.mxu0 %v8781_v2  ;;  %v8834_v2 = vld [vmem:[%s12233_s2 + $0x6c4] ss:$8 sps:$4 sm:$0xff]  }
 0x354   :  { %3942 = vmatprep.subr.bf16.mxu0 %v8786_v6  ;;  %v8832_v6 = vld [vmem:[%s12233_s2 + $0x6c0] ss:$8 sps:$4 sm:$0xff]  }
 0x357   :  { %3943 = vmatpush1.bf16.msra.mxu0 %v8784_v8  ;;  %v8837_v8 = vld [vmem:[%s12233_s2 + $0x6d4] ss:$8 sps:$4 sm:$0xff]  }
 0x358   :  { %v2776_v14 = vpop.f32.mrb[4].mxu1  ;;  %3944 = vmatprep.subr.bf16.mxu0 %v8789_v11  ;;  %v8835_v11 = vld [vmem:[%s12233_s2 + $0x6d0] ss:$8 sps:$4 sm:$0xff]  }
 0x359   :  { %vm2875_vm5 = vcmp.gt.f32.partialorder %v2776_v14, 0.0  ;;  %v2883_v16 = vmul.f32 0.2, %v2776_v14  ;;  %v2778_v49 = vpop.f32.mrb[5].mxu1 }
 0x35a   :  { %vm2876_vm6 = vcmp.gt.f32.partialorder %v2778_v49, 0.0  ;;  %v2884_v18 = vmul.f32 0.2, %v2778_v49  ;;  %v2780_v19 = vpop.f32.mrb[6].mxu1 }
 0x35b   :  { %v2891_v22 = vsel %vm2875_vm5, %v2776_v14, %v2883_v16  ;;  %3945 = vmatpush1.bf16.msra.mxu0 %v8787_v13  ;;  %v2781_v23 = vpop.f32.mrb[7].mxu1  ;;  %v2917_v14 = vrot.slane %v2901_v9, 7  ;;  %v8886_v9 = vld [vmem:[%s12233_s2 + $0x7e0] ss:$8 sps:$4 sm:$0xff]  }
 0x35c   :  { %v2899_v26 = vpack.c.bf16 %v2891_v22, %v2891_v22  ;;  %v2892_v27 = vsel %vm2876_vm6, %v2778_v49, %v2884_v18  ;;  %3946 = vmatprep.subr.bf16.mxu0 %v8792_v15  ;;  %v8838_v18 = vld [vmem:[%s12233_s2 + $0x6e0] ss:$8 sps:$4 sm:$0xff]  }
 0x35d   :  { %v2900_v30 = vpack.c.bf16 %v2892_v27, %v2892_v27  ;;  %v10949_v23 = vsel %vm2921_vm2, 0, %v2917_v14  ;;  %v8846_v27 = vld [vmem:[%s12233_s2 + $0x704] ss:$8 sps:$4 sm:$0xff]  }
 0x35e   :  { %v2915_v31 = vrot.slane %v2899_v26, 7  ;;  %v8841_v26 = vld [vmem:[%s12233_s2 + $0x6f0] ss:$8 sps:$4 sm:$0xff]  }
 0x35f   :  { %v2916_v32 = vrot.slane %v2900_v30, 7  ;;  %3947 = vmatpush1.bf16.msra.mxu0 %v8790_v25 }
 0x360   :  { %v10830_v17 = vsel %vm2921_vm2, 0, %v2915_v31  ;;  %3948 = vmatprep.subr.bf16.mxu0 %v8795_v28  ;;  %v10959_v28 = vsel %vm2939_vm3, %v10949_v23, 0 }
 0x361   :  { %v10837_v35 = vsel %vm2939_vm3, %v10830_v17, 0  ;;  %v10840_v37 = vsel %vm2921_vm2, 0, %v2916_v32  ;;  %v8844_v32 = vld [vmem:[%s12233_s2 + $0x700] ss:$8 sps:$4 sm:$0xff]  }
 0x362   :  { %v10844_v39 = vsel %vm2939_vm3, %v10840_v37, 0  ;;  %v3223_v40 = vrot.slane %v10837_v35, 1 }
 0x363   :  { %3949 = vmatpush1.bf16.msra.mxu0 %v8793_v33  ;;  %v3224_v20 = vrot.slane %v10844_v39, 1 }
 0x364   :  { %3959 = vmatprep.subr.bf16.mxu0 %v8798_v36  ;;  %v3225_v36 = vrot.slane %v10959_v28, 1 }
 0x365   :  { %3950 = vmatprep.mubr.bf16.mxu0 %v3224_v20  ;;  %v8849_v20 = vld [vmem:[%s12233_s2 + $0x714] ss:$8 sps:$4 sm:$0xff]  }
 0x366   :  { %3951 = vmatmul.mubr.bf16.vlgmr.msra.gmra.mrb[4].mxu0 %v3223_v40  ;;  %v8852_v40 = vld [vmem:[%s12233_s2 + $0x724] ss:$8 sps:$4 sm:$0xff]  }
 0x367   :  { %3960 = vmatpush1.bf16.msra.mxu0 %v8796_v5  ;;  %3991 = vmatprep.mubr.bf16.mxu0 %v3226_v45  ;;  %v8847_v5 = vld [vmem:[%s12233_s2 + $0x710] ss:$8 sps:$4 sm:$0xff]   ;;  %v8855_v45 = vld [vmem:[%s12233_s2 + $0x734] ss:$8 sps:$4 sm:$0xff]  }
 0x368   :  { %3961 = vmatprep.subr.bf16.mxu0 %v8801_v44  ;;  %v8850_v44 = vld [vmem:[%s12233_s2 + $0x720] ss:$8 sps:$4 sm:$0xff]  }
 0x36b   :  { %3962 = vmatpush1.bf16.msra.mxu0 %v8799_v46  ;;  %v8853_v46 = vld [vmem:[%s12233_s2 + $0x730] ss:$8 sps:$4 sm:$0xff]  }
 0x36c   :  { %3963 = vmatprep.subr.bf16.mxu0 %v8804_v48  ;;  %v8858_v48 = vld [vmem:[%s12233_s2 + $0x744] ss:$8 sps:$4 sm:$0xff]  }
 0x36f   :  { %3964 = vmatpush1.bf16.msra.mxu0 %v8802_v50  ;;  %v8856_v50 = vld [vmem:[%s12233_s2 + $0x740] ss:$8 sps:$4 sm:$0xff]  }
 0x370   :  { %3965 = vmatprep.subr.bf16.mxu0 %v8807_v51  ;;  %v8861_v51 = vld [vmem:[%s12233_s2 + $0x754] ss:$8 sps:$4 sm:$0xff]  }
 0x373   :  { %3966 = vmatpush1.bf16.msra.mxu0 %v8805_v52  ;;  %v8859_v52 = vld [vmem:[%s12233_s2 + $0x750] ss:$8 sps:$4 sm:$0xff]  }
 0x374   :  { %3967 = vmatprep.subr.bf16.mxu0 %v8810_v29  ;;  %v8864_v29 = vld [vmem:[%s12233_s2 + $0x764] ss:$8 sps:$4 sm:$0xff]  }
 0x377   :  { %3968 = vmatpush1.bf16.msra.mxu0 %v8808_v53  ;;  %v8862_v53 = vld [vmem:[%s12233_s2 + $0x760] ss:$8 sps:$4 sm:$0xff]  }
 0x378   :  { %3969 = vmatprep.subr.bf16.mxu0 %v8813_v4  ;;  %v8867_v4 = vld [vmem:[%s12233_s2 + $0x774] ss:$8 sps:$4 sm:$0xff]  }
 0x37b   :  { %3970 = vmatpush1.bf16.msra.mxu0 %v8811_v7  ;;  %v8865_v7 = vld [vmem:[%s12233_s2 + $0x770] ss:$8 sps:$4 sm:$0xff]  }
 0x37c   :  { %3971 = vmatprep.subr.bf16.mxu0 %v8816_v24  ;;  %v8870_v24 = vld [vmem:[%s12233_s2 + $0x784] ss:$8 sps:$4 sm:$0xff]  }
 0x37f   :  { %3972 = vmatpush1.bf16.msra.mxu0 %v8814_v54  ;;  %v8868_v54 = vld [vmem:[%s12233_s2 + $0x780] ss:$8 sps:$4 sm:$0xff]  }
 0x380   :  { %3973 = vmatprep.subr.bf16.mxu0 %v8819_v55  ;;  %v8873_v55 = vld [vmem:[%s12233_s2 + $0x794] ss:$8 sps:$4 sm:$0xff]  }
 0x383   :  { %3974 = vmatpush1.bf16.msra.mxu0 %v8817_v56  ;;  %v8871_v56 = vld [vmem:[%s12233_s2 + $0x790] ss:$8 sps:$4 sm:$0xff]  }
 0x384   :  { %3975 = vmatprep.subr.bf16.mxu0 %v8822_v57  ;;  %v8876_v57 = vld [vmem:[%s12233_s2 + $0x7a4] ss:$8 sps:$4 sm:$0xff]  }
 0x387   :  { %3976 = vmatpush1.bf16.msra.mxu0 %v8820_v58  ;;  %v8874_v58 = vld [vmem:[%s12233_s2 + $0x7a0] ss:$8 sps:$4 sm:$0xff]  }
 0x388   :  { %3977 = vmatprep.subr.bf16.mxu0 %v8825_v59  ;;  %v8879_v59 = vld [vmem:[%s12233_s2 + $0x7b4] ss:$8 sps:$4 sm:$0xff]  }
 0x38b   :  { %3978 = vmatpush1.bf16.msra.mxu0 %v8823_v60 }
 0x38c   :  { %3979 = vmatprep.subr.bf16.mxu0 %v8828_v61  ;;  %v8877_v61 = vld [vmem:[%s12233_s2 + $0x7b0] ss:$8 sps:$4 sm:$0xff]  }
 0x38f   :  { %3980 = vmatpush1.bf16.msra.mxu0 %v8826_v62  ;;  %v8882_v62 = vld [vmem:[%s12233_s2 + $0x7c4] ss:$8 sps:$4 sm:$0xff]  }
 0x390   :  { %3981 = vmatprep.subr.bf16.mxu0 %v8831_v63 }
 0x393   :  { %3982 = vmatpush1.bf16.msra.mxu0 %v8829_v1  ;;  %v8885_v1 = vld [vmem:[%s12233_s2 + $0x7d4] ss:$8 sps:$4 sm:$0xff]  }
 0x394   :  { %3983 = vmatprep.subr.bf16.mxu0 %v8834_v2 }
 0x397   :  { %3984 = vmatpush1.bf16.msra.mxu0 %v8832_v6  ;;  %v8888_v6 = vld [vmem:[%s12233_s2 + $0x7e4] ss:$8 sps:$4 sm:$0xff]  }
 0x398   :  { %v10937_v12 = vpop.f32.mrb[12].mxu1  ;;  %3985 = vmatprep.subr.bf16.mxu0 %v8837_v8 }
 0x399   :  { %v2860_v13 = vpop.f32.mrb[13].mxu1  ;;  %v2887_v60 = vmul.f32 0.2, %v10937_v12  ;;  %vm2879_vm9 = vcmp.gt.f32.partialorder %v10937_v12, 0.0 }
 0x39a   :  { %vm2880_vm8 = vcmp.gt.f32.partialorder %v2860_v13, 0.0  ;;  %v2888_v15 = vmul.f32 0.2, %v2860_v13  ;;  %v2862_v16 = vpop.f32.mrb[14].mxu1 }
 0x39b   :  { %3986 = vmatpush1.bf16.msra.mxu0 %v8835_v11  ;;  %v2863_v49 = vpop.f32.mrb[15].mxu1  ;;  %v2895_v63 = vsel %vm2879_vm9, %v10937_v12, %v2887_v60  ;;  %v8891_v11 = vld [vmem:[%s12233_s2 + $0x7f4] ss:$8 sps:$4 sm:$0xff]   ;;  %v8943_v60 = vld [vmem:[%s12233_s2 + $0x110] ss:$8 sps:$4 sm:$0xff]  }
 0x39c   :  { %v2896_v19 = vsel %vm2880_vm8, %v2860_v13, %v2888_v15  ;;  %3987 = vmatprep.subr.bf16.mxu0 %v8840_v47  ;;  %v2903_v2 = vpack.c.bf16 %v2895_v63, %v2895_v63  ;;  %v8889_v47 = vld [vmem:[%s12233_s2 + $0x7f0] ss:$8 sps:$4 sm:$0xff]   ;;  %v8894_v13 = vld [vmem:[%s12233_s2 + $0x4] ss:$8 sps:$4 sm:$0xff]   ;;  %v8892_v15 = vld [vmem:[%s12233_s2] ss:$8 sps:$4 sm:$0xff]  }
 0x39d   :  { %v2904_v22 = vpack.c.bf16 %v2896_v19, %v2896_v19  ;;  %v8897_v49 = vld [vmem:[%s12233_s2 + $0x14] ss:$8 sps:$4 sm:$0xff]   ;;  %v8900_v19 = vld [vmem:[%s12233_s2 + $0x24] ss:$8 sps:$4 sm:$0xff]  }
 0x39e   :  { %v2919_v8 = vrot.slane %v2903_v2, 7  ;;  %v8954_v63 = vld [vmem:[%s12233_s2 + $0x144] ss:$8 sps:$4 sm:$0xff]   ;;  %v8955_v2 = vld [vmem:[%s12233_s2 + $0x150] ss:$8 sps:$4 sm:$0xff]  }
 0x39f   :  { %v2920_v25 = vrot.slane %v2904_v22, 7  ;;  %3988 = vmatpush1.bf16.msra.mxu0 %v8838_v18  ;;  %v8895_v18 = vld [vmem:[%s12233_s2 + $0x10] ss:$8 sps:$4 sm:$0xff]   ;;  %v8903_v22 = vld [vmem:[%s12233_s2 + $0x34] ss:$8 sps:$4 sm:$0xff]  }
 0x3a0   :  { %3989 = vmatprep.subr.bf16.mxu0 %v8843_v21  ;;  %v11064_v12 = vsel %vm2921_vm2, 0, %v2919_v8  ;;  %v8898_v21 = vld [vmem:[%s12233_s2 + $0x20] ss:$8 sps:$4 sm:$0xff]   ;;  %v8963_v8 = vld [vmem:[%s12233_s2 + $0x174] ss:$8 sps:$4 sm:$0xff]  }
 0x3a1   :  { %v10962_v30 = vsel %vm2921_vm2, 0, %v2920_v25  ;;  %v11074_v14 = vsel %vm2939_vm3, %v11064_v12, 0  ;;  %v8906_v25 = vld [vmem:[%s12233_s2 + $0x44] ss:$8 sps:$4 sm:$0xff]  }
 0x3a2   :  { %v10966_v31 = vsel %vm2939_vm3, %v10962_v30, 0  ;;  %v3227_v16 = vrot.slane %v11074_v14, 1 }
 0x3a3   :  { %3990 = vmatpush1.bf16.msra.mxu0 %v8841_v26  ;;  %v3228_v33 = vrot.slane %v10966_v31, 1  ;;  %v8904_v26 = vld [vmem:[%s12233_s2 + $0x40] ss:$8 sps:$4 sm:$0xff]  }
 0x3a4   :  { %4000 = vmatprep.subr.bf16.mxu0 %v8846_v27  ;;  %v8909_v27 = vld [vmem:[%s12233_s2 + $0x54] ss:$8 sps:$4 sm:$0xff]  }
 0x3a6   :  { %3992 = vmatmul.mubr.bf16.vlgmr.msra.gmra.mrb[4].mxu0 %v3225_v36  ;;  %v8910_v36 = vld [vmem:[%s12233_s2 + $0x60] ss:$8 sps:$4 sm:$0xff]  }
 0x3a7   :  { %4001 = vmatpush1.bf16.msra.mxu0 %v8844_v32  ;;  %4032 = vmatprep.mubr.bf16.mxu0 %v3228_v33  ;;  %v8907_v32 = vld [vmem:[%s12233_s2 + $0x50] ss:$8 sps:$4 sm:$0xff]   ;;  %v8912_v33 = vld [vmem:[%s12233_s2 + $0x64] ss:$8 sps:$4 sm:$0xff]  }
 0x3a8   :  { %4002 = vmatprep.subr.bf16.mxu0 %v8849_v20  ;;  %v8915_v20 = vld [vmem:[%s12233_s2 + $0x74] ss:$8 sps:$4 sm:$0xff]  }
 0x3ab   :  { %4003 = vmatpush1.bf16.msra.mxu0 %v8847_v5  ;;  %v8913_v5 = vld [vmem:[%s12233_s2 + $0x70] ss:$8 sps:$4 sm:$0xff]  }
 0x3ac   :  { %4004 = vmatprep.subr.bf16.mxu0 %v8852_v40  ;;  %v8918_v40 = vld [vmem:[%s12233_s2 + $0x84] ss:$8 sps:$4 sm:$0xff]  }
 0x3af   :  { %4005 = vmatpush1.bf16.msra.mxu0 %v8850_v44  ;;  %v8916_v44 = vld [vmem:[%s12233_s2 + $0x80] ss:$8 sps:$4 sm:$0xff]  }
 0x3b0   :  { %4006 = vmatprep.subr.bf16.mxu0 %v8855_v45  ;;  %v8921_v45 = vld [vmem:[%s12233_s2 + $0x94] ss:$8 sps:$4 sm:$0xff]  }
 0x3b3   :  { %4007 = vmatpush1.bf16.msra.mxu0 %v8853_v46  ;;  %v8919_v46 = vld [vmem:[%s12233_s2 + $0x90] ss:$8 sps:$4 sm:$0xff]  }
 0x3b4   :  { %4008 = vmatprep.subr.bf16.mxu0 %v8858_v48  ;;  %v8924_v48 = vld [vmem:[%s12233_s2 + $0xa4] ss:$8 sps:$4 sm:$0xff]  }
 0x3b7   :  { %4009 = vmatpush1.bf16.msra.mxu0 %v8856_v50  ;;  %v8922_v50 = vld [vmem:[%s12233_s2 + $0xa0] ss:$8 sps:$4 sm:$0xff]  }
 0x3b8   :  { %4010 = vmatprep.subr.bf16.mxu0 %v8861_v51  ;;  %v8927_v51 = vld [vmem:[%s12233_s2 + $0xb4] ss:$8 sps:$4 sm:$0xff]  }
 0x3bb   :  { %4011 = vmatpush1.bf16.msra.mxu0 %v8859_v52  ;;  %v8925_v52 = vld [vmem:[%s12233_s2 + $0xb0] ss:$8 sps:$4 sm:$0xff]  }
 0x3bc   :  { %4012 = vmatprep.subr.bf16.mxu0 %v8864_v29  ;;  %v8930_v29 = vld [vmem:[%s12233_s2 + $0xc4] ss:$8 sps:$4 sm:$0xff]  }
 0x3bf   :  { %4013 = vmatpush1.bf16.msra.mxu0 %v8862_v53  ;;  %v8928_v53 = vld [vmem:[%s12233_s2 + $0xc0] ss:$8 sps:$4 sm:$0xff]  }
 0x3c0   :  { %4014 = vmatprep.subr.bf16.mxu0 %v8867_v4  ;;  %v8933_v4 = vld [vmem:[%s12233_s2 + $0xd4] ss:$8 sps:$4 sm:$0xff]  }
 0x3c3   :  { %4015 = vmatpush1.bf16.msra.mxu0 %v8865_v7  ;;  %v8931_v7 = vld [vmem:[%s12233_s2 + $0xd0] ss:$8 sps:$4 sm:$0xff]  }
 0x3c4   :  { %4016 = vmatprep.subr.bf16.mxu0 %v8870_v24  ;;  %v8936_v24 = vld [vmem:[%s12233_s2 + $0xe4] ss:$8 sps:$4 sm:$0xff]  }
 0x3c7   :  { %4017 = vmatpush1.bf16.msra.mxu0 %v8868_v54  ;;  %v8934_v54 = vld [vmem:[%s12233_s2 + $0xe0] ss:$8 sps:$4 sm:$0xff]  }
 0x3c8   :  { %4018 = vmatprep.subr.bf16.mxu0 %v8873_v55  ;;  %v8939_v55 = vld [vmem:[%s12233_s2 + $0xf4] ss:$8 sps:$4 sm:$0xff]  }
 0x3cb   :  { %4019 = vmatpush1.bf16.msra.mxu0 %v8871_v56  ;;  %v8937_v56 = vld [vmem:[%s12233_s2 + $0xf0] ss:$8 sps:$4 sm:$0xff]  }
 0x3cc   :  { %4020 = vmatprep.subr.bf16.mxu0 %v8876_v57  ;;  %v8942_v57 = vld [vmem:[%s12233_s2 + $0x104] ss:$8 sps:$4 sm:$0xff]  }
 0x3cf   :  { %4021 = vmatpush1.bf16.msra.mxu0 %v8874_v58  ;;  %v8940_v58 = vld [vmem:[%s12233_s2 + $0x100] ss:$8 sps:$4 sm:$0xff]  }
 0x3d0   :  { %4022 = vmatprep.subr.bf16.mxu0 %v8879_v59  ;;  %v8945_v59 = vld [vmem:[%s12233_s2 + $0x114] ss:$8 sps:$4 sm:$0xff]  }
 0x3d3   :  { %4023 = vmatpush1.bf16.msra.mxu0 %v8877_v61  ;;  %v8948_v61 = vld [vmem:[%s12233_s2 + $0x124] ss:$8 sps:$4 sm:$0xff]  }
 0x3d4   :  { %4024 = vmatprep.subr.bf16.mxu0 %v8882_v62  ;;  %v8946_v62 = vld [vmem:[%s12233_s2 + $0x120] ss:$8 sps:$4 sm:$0xff]  }
 0x3d7   :  { %4025 = vmatpush1.bf16.msra.mxu0 %v8880_v0  ;;  %v8952_v0 = vld [vmem:[%s12233_s2 + $0x140] ss:$8 sps:$4 sm:$0xff]  }
 0x3d8   :  { %4026 = vmatprep.subr.bf16.mxu0 %v8885_v1  ;;  %v8957_v1 = vld [vmem:[%s12233_s2 + $0x154] ss:$8 sps:$4 sm:$0xff]  }
 0x3db   :  { %4027 = vmatpush1.bf16.msra.mxu0 %v8883_v3  ;;  %v8960_v3 = vld [vmem:[%s12233_s2 + $0x164] ss:$8 sps:$4 sm:$0xff]  }
 0x3dc   :  { %4028 = vmatprep.subr.bf16.mxu0 %v8888_v6  ;;  %v8958_v6 = vld [vmem:[%s12233_s2 + $0x160] ss:$8 sps:$4 sm:$0xff]  }
 0x3df   :  { %4029 = vmatpush1.bf16.msra.mxu0 %v8886_v9  ;;  %v8961_v9 = vld [vmem:[%s12233_s2 + $0x170] ss:$8 sps:$4 sm:$0xff]  }
 0x3e0   :  { %4030 = vmatprep.subr.bf16.mxu0 %v8891_v11  ;;  %v8966_v11 = vld [vmem:[%s12233_s2 + $0x184] ss:$8 sps:$4 sm:$0xff]  }
 0x3e3   :  { %4031 = vmatpush1.bf16.msra.mxu0 %v8889_v47  ;;  %v8964_v47 = vld [vmem:[%s12233_s2 + $0x180] ss:$8 sps:$4 sm:$0xff]  }
 0x3e4   :  { %4681 = vmatprep.subr.bf16.mxu0 %v8894_v13  ;;  %v8969_v13 = vld [vmem:[%s12233_s2 + $0x194] ss:$8 sps:$4 sm:$0xff]  }
 0x3e6   :  { %4033 = vmatmul.mubr.bf16.vlgmr.msra.gmra.mrb[4].mxu0 %v3227_v16  ;;  %v8972_v16 = vld [vmem:[%s12233_s2 + $0x1a4] ss:$8 sps:$4 sm:$0xff]  }
 0x3e7   :  { %4682 = vmatpush1.bf16.msra.mxu0 %v8892_v15  ;;  %7987 = vmatprep.mubr.msk.bf16.mxu0 %vm2939_vm3, %v10722_v42  ;;  %v8901_v42 = vld [vmem:[%s12233_s2 + $0x30] ss:$8 sps:$4 sm:$0xff]  }
 0x3e8   :  { %4683 = vmatprep.subr.bf16.mxu0 %v8897_v49  ;;  %v8967_v15 = vld [vmem:[%s12233_s2 + $0x190] ss:$8 sps:$4 sm:$0xff]   ;;  %v8970_v49 = vld [vmem:[%s12233_s2 + $0x1a0] ss:$8 sps:$4 sm:$0xff]  }
 0x3eb   :  { %4684 = vmatpush1.bf16.msra.mxu0 %v8895_v18  ;;  %v8975_v18 = vld [vmem:[%s12233_s2 + $0x1b4] ss:$8 sps:$4 sm:$0xff]  }
 0x3ec   :  { %4685 = vmatprep.subr.bf16.mxu0 %v8900_v19  ;;  %v8973_v19 = vld [vmem:[%s12233_s2 + $0x1b0] ss:$8 sps:$4 sm:$0xff]  }
 0x3ef   :  { %4686 = vmatpush1.bf16.msra.mxu0 %v8898_v21  ;;  %v8978_v21 = vld [vmem:[%s12233_s2 + $0x1c4] ss:$8 sps:$4 sm:$0xff]  }
 0x3f0   :  { %4687 = vmatprep.subr.bf16.mxu0 %v8903_v22  ;;  %v8976_v22 = vld [vmem:[%s12233_s2 + $0x1c0] ss:$8 sps:$4 sm:$0xff]  }
 0x3f3   :  { %4688 = vmatpush1.bf16.msra.mxu0 %v8901_v42  ;;  %v8981_v42 = vld [vmem:[%s12233_s2 + $0x1d4] ss:$8 sps:$4 sm:$0xff]  }
 0x3f4   :  { %4689 = vmatprep.subr.bf16.mxu0 %v8906_v25  ;;  %v8979_v25 = vld [vmem:[%s12233_s2 + $0x1d0] ss:$8 sps:$4 sm:$0xff]  }
 0x3f7   :  { %4690 = vmatpush1.bf16.msra.mxu0 %v8904_v26  ;;  %v8984_v26 = vld [vmem:[%s12233_s2 + $0x1e4] ss:$8 sps:$4 sm:$0xff]  }
 0x3f8   :  { %4691 = vmatprep.subr.bf16.mxu0 %v8909_v27  ;;  %v8982_v27 = vld [vmem:[%s12233_s2 + $0x1e0] ss:$8 sps:$4 sm:$0xff]  }
 0x3fb   :  { %4692 = vmatpush1.bf16.msra.mxu0 %v8907_v32  ;;  %v8987_v32 = vld [vmem:[%s12233_s2 + $0x1f4] ss:$8 sps:$4 sm:$0xff]  }
 0x3fc   :  { %4693 = vmatprep.subr.bf16.mxu0 %v8912_v33  ;;  %v8985_v33 = vld [vmem:[%s12233_s2 + $0x1f0] ss:$8 sps:$4 sm:$0xff]  }
 0x3ff   :  { %4694 = vmatpush1.bf16.msra.mxu0 %v8910_v36  ;;  %v8990_v36 = vld [vmem:[%s12233_s2 + $0x204] ss:$8 sps:$4 sm:$0xff]  }
 0x400   :  { %4695 = vmatprep.subr.bf16.mxu0 %v8915_v20  ;;  %v8988_v20 = vld [vmem:[%s12233_s2 + $0x200] ss:$8 sps:$4 sm:$0xff]  }
 0x403   :  { %4696 = vmatpush1.bf16.msra.mxu0 %v8913_v5  ;;  %v8993_v5 = vld [vmem:[%s12233_s2 + $0x214] ss:$8 sps:$4 sm:$0xff]  }
 0x404   :  { %4697 = vmatprep.subr.bf16.mxu0 %v8918_v40  ;;  %v8991_v40 = vld [vmem:[%s12233_s2 + $0x210] ss:$8 sps:$4 sm:$0xff]  }
 0x407   :  { %4698 = vmatpush1.bf16.msra.mxu0 %v8916_v44  ;;  %v8996_v44 = vld [vmem:[%s12233_s2 + $0x224] ss:$8 sps:$4 sm:$0xff]  }
 0x408   :  { %4699 = vmatprep.subr.bf16.mxu0 %v8921_v45  ;;  %v8994_v45 = vld [vmem:[%s12233_s2 + $0x220] ss:$8 sps:$4 sm:$0xff]  }
 0x40b   :  { %4700 = vmatpush1.bf16.msra.mxu0 %v8919_v46  ;;  %v9002_v46 = vld [vmem:[%s12233_s2 + $0x244] ss:$8 sps:$4 sm:$0xff]  }
 0x40c   :  { %4701 = vmatprep.subr.bf16.mxu0 %v8924_v48  ;;  %v9000_v48 = vld [vmem:[%s12233_s2 + $0x240] ss:$8 sps:$4 sm:$0xff]  }
 0x40f   :  { %4702 = vmatpush1.bf16.msra.mxu0 %v8922_v50  ;;  %v9005_v50 = vld [vmem:[%s12233_s2 + $0x254] ss:$8 sps:$4 sm:$0xff]  }
 0x410   :  { %4703 = vmatprep.subr.bf16.mxu0 %v8927_v51  ;;  %v9003_v51 = vld [vmem:[%s12233_s2 + $0x250] ss:$8 sps:$4 sm:$0xff]  }
 0x413   :  { %4704 = vmatpush1.bf16.msra.mxu0 %v8925_v52  ;;  %v9008_v52 = vld [vmem:[%s12233_s2 + $0x264] ss:$8 sps:$4 sm:$0xff]  }
 0x414   :  { %4705 = vmatprep.subr.bf16.mxu0 %v8930_v29  ;;  %v9006_v29 = vld [vmem:[%s12233_s2 + $0x260] ss:$8 sps:$4 sm:$0xff]  }
 0x417   :  { %4706 = vmatpush1.bf16.msra.mxu0 %v8928_v53  ;;  %v9011_v53 = vld [vmem:[%s12233_s2 + $0x274] ss:$8 sps:$4 sm:$0xff]  }
 0x418   :  { %4707 = vmatprep.subr.bf16.mxu0 %v8933_v4  ;;  %v9009_v4 = vld [vmem:[%s12233_s2 + $0x270] ss:$8 sps:$4 sm:$0xff]  }
 0x41b   :  { %4708 = vmatpush1.bf16.msra.mxu0 %v8931_v7  ;;  %v9014_v7 = vld [vmem:[%s12233_s2 + $0x284] ss:$8 sps:$4 sm:$0xff]  }
 0x41c   :  { %4709 = vmatprep.subr.bf16.mxu0 %v8936_v24  ;;  %v9012_v24 = vld [vmem:[%s12233_s2 + $0x280] ss:$8 sps:$4 sm:$0xff]  }
 0x41f   :  { %4710 = vmatpush1.bf16.msra.mxu0 %v8934_v54  ;;  %v9017_v54 = vld [vmem:[%s12233_s2 + $0x294] ss:$8 sps:$4 sm:$0xff]  }
 0x420   :  { %4711 = vmatprep.subr.bf16.mxu0 %v8939_v55  ;;  %v9015_v55 = vld [vmem:[%s12233_s2 + $0x290] ss:$8 sps:$4 sm:$0xff]  }
 0x423   :  { %4712 = vmatpush1.bf16.msra.mxu0 %v8937_v56  ;;  %v9020_v56 = vld [vmem:[%s12233_s2 + $0x2a4] ss:$8 sps:$4 sm:$0xff]  }
 0x424   :  { %4722 = vmatprep.subr.bf16.mxu0 %v8942_v57  ;;  %v9018_v57 = vld [vmem:[%s12233_s2 + $0x2a0] ss:$8 sps:$4 sm:$0xff]  }
 0x426   :  { %7988 = vmatmul.mubr.msk.bf16.vlgmr.msra.gmra.mrb[4].mxu0 %vm2939_vm3, %v10715_v41  ;;  %v8951_v41 = vld [vmem:[%s12233_s2 + $0x134] ss:$8 sps:$4 sm:$0xff]  }
 0x427   :  { %4723 = vmatpush1.bf16.msra.mxu0 %v8940_v58  ;;  %7989 = vmatprep.mubr.msk.bf16.mxu0 %vm2939_vm3, %v10840_v37  ;;  %v8949_v37 = vld [vmem:[%s12233_s2 + $0x130] ss:$8 sps:$4 sm:$0xff]   ;;  %v9023_v58 = vld [vmem:[%s12233_s2 + $0x2b4] ss:$8 sps:$4 sm:$0xff]  }
 0x428   :  { %4724 = vmatprep.subr.bf16.mxu0 %v8945_v59  ;;  %v9021_v59 = vld [vmem:[%s12233_s2 + $0x2b0] ss:$8 sps:$4 sm:$0xff]  }
 0x42b   :  { %4725 = vmatpush1.bf16.msra.mxu0 %v8943_v60  ;;  %v9026_v60 = vld [vmem:[%s12233_s2 + $0x2c4] ss:$8 sps:$4 sm:$0xff]  }
 0x42c   :  { %4726 = vmatprep.subr.bf16.mxu0 %v8948_v61  ;;  %v9024_v61 = vld [vmem:[%s12233_s2 + $0x2c0] ss:$8 sps:$4 sm:$0xff]  }
 0x42f   :  { %4727 = vmatpush1.bf16.msra.mxu0 %v8946_v62  ;;  %v9029_v62 = vld [vmem:[%s12233_s2 + $0x2d4] ss:$8 sps:$4 sm:$0xff]  }
 0x430   :  { %4728 = vmatprep.subr.bf16.mxu0 %v8951_v41  ;;  %v9027_v41 = vld [vmem:[%s12233_s2 + $0x2d0] ss:$8 sps:$4 sm:$0xff]  }
 0x433   :  { %4729 = vmatpush1.bf16.msra.mxu0 %v8949_v37  ;;  %v9032_v37 = vld [vmem:[%s12233_s2 + $0x2e4] ss:$8 sps:$4 sm:$0xff]  }
 0x434   :  { %4730 = vmatprep.subr.bf16.mxu0 %v8954_v63  ;;  %v9030_v63 = vld [vmem:[%s12233_s2 + $0x2e0] ss:$8 sps:$4 sm:$0xff]  }
 0x437   :  { %4731 = vmatpush1.bf16.msra.mxu0 %v8952_v0  ;;  %v9035_v0 = vld [vmem:[%s12233_s2 + $0x2f4] ss:$8 sps:$4 sm:$0xff]  }
 0x438   :  { %4732 = vmatprep.subr.bf16.mxu0 %v8957_v1  ;;  %v9033_v1 = vld [vmem:[%s12233_s2 + $0x2f0] ss:$8 sps:$4 sm:$0xff]  }
 0x43b   :  { %4733 = vmatpush1.bf16.msra.mxu0 %v8955_v2  ;;  %v9038_v2 = vld [vmem:[%s12233_s2 + $0x304] ss:$8 sps:$4 sm:$0xff]  }
 0x43c   :  { %4734 = vmatprep.subr.bf16.mxu0 %v8960_v3  ;;  %v9036_v3 = vld [vmem:[%s12233_s2 + $0x300] ss:$8 sps:$4 sm:$0xff]  }
 0x43f   :  { %4735 = vmatpush1.bf16.msra.mxu0 %v8958_v6  ;;  %v9041_v6 = vld [vmem:[%s12233_s2 + $0x314] ss:$8 sps:$4 sm:$0xff]  }
 0x440   :  { %4736 = vmatprep.subr.bf16.mxu0 %v8963_v8  ;;  %v9039_v8 = vld [vmem:[%s12233_s2 + $0x310] ss:$8 sps:$4 sm:$0xff]  }
 0x443   :  { %4737 = vmatpush1.bf16.msra.mxu0 %v8961_v9  ;;  %v9044_v9 = vld [vmem:[%s12233_s2 + $0x324] ss:$8 sps:$4 sm:$0xff]  }
 0x444   :  { %4738 = vmatprep.subr.bf16.mxu0 %v8966_v11  ;;  %v9042_v11 = vld [vmem:[%s12233_s2 + $0x320] ss:$8 sps:$4 sm:$0xff]  }
 0x447   :  { %4739 = vmatpush1.bf16.msra.mxu0 %v8964_v47  ;;  %v9050_v47 = vld [vmem:[%s12233_s2 + $0x344] ss:$8 sps:$4 sm:$0xff]  }
 0x448   :  { %4740 = vmatprep.subr.bf16.mxu0 %v8969_v13  ;;  %v9048_v13 = vld [vmem:[%s12233_s2 + $0x340] ss:$8 sps:$4 sm:$0xff]  }
 0x44b   :  { %4741 = vmatpush1.bf16.msra.mxu0 %v8967_v15  ;;  %v9053_v15 = vld [vmem:[%s12233_s2 + $0x354] ss:$8 sps:$4 sm:$0xff]  }
 0x44c   :  { %4742 = vmatprep.subr.bf16.mxu0 %v8972_v16  ;;  %v9051_v16 = vld [vmem:[%s12233_s2 + $0x350] ss:$8 sps:$4 sm:$0xff]  }
 0x44f   :  { %4743 = vmatpush1.bf16.msra.mxu0 %v8970_v49  ;;  %v9056_v49 = vld [vmem:[%s12233_s2 + $0x364] ss:$8 sps:$4 sm:$0xff]  }
 0x450   :  { %4744 = vmatprep.subr.bf16.mxu0 %v8975_v18  ;;  %v9054_v18 = vld [vmem:[%s12233_s2 + $0x360] ss:$8 sps:$4 sm:$0xff]  }
 0x453   :  { %4745 = vmatpush1.bf16.msra.mxu0 %v8973_v19  ;;  %v9059_v19 = vld [vmem:[%s12233_s2 + $0x374] ss:$8 sps:$4 sm:$0xff]  }
 0x454   :  { %4746 = vmatprep.subr.bf16.mxu0 %v8978_v21  ;;  %v9057_v21 = vld [vmem:[%s12233_s2 + $0x370] ss:$8 sps:$4 sm:$0xff]  }
 0x457   :  { %4747 = vmatpush1.bf16.msra.mxu0 %v8976_v22  ;;  %v9062_v22 = vld [vmem:[%s12233_s2 + $0x384] ss:$8 sps:$4 sm:$0xff]  }
 0x458   :  { %4748 = vmatprep.subr.bf16.mxu0 %v8981_v42  ;;  %v9060_v42 = vld [vmem:[%s12233_s2 + $0x380] ss:$8 sps:$4 sm:$0xff]  }
 0x45b   :  { %4749 = vmatpush1.bf16.msra.mxu0 %v8979_v25  ;;  %v9065_v25 = vld [vmem:[%s12233_s2 + $0x394] ss:$8 sps:$4 sm:$0xff]  }
 0x45c   :  { %4750 = vmatprep.subr.bf16.mxu0 %v8984_v26  ;;  %v9063_v26 = vld [vmem:[%s12233_s2 + $0x390] ss:$8 sps:$4 sm:$0xff]  }
 0x45f   :  { %4751 = vmatpush1.bf16.msra.mxu0 %v8982_v27  ;;  %v9068_v27 = vld [vmem:[%s12233_s2 + $0x3a4] ss:$8 sps:$4 sm:$0xff]  }
 0x460   :  { %4752 = vmatprep.subr.bf16.mxu0 %v8987_v32  ;;  %v9066_v32 = vld [vmem:[%s12233_s2 + $0x3a0] ss:$8 sps:$4 sm:$0xff]  }
 0x463   :  { %4753 = vmatpush1.bf16.msra.mxu0 %v8985_v33  ;;  %v9071_v33 = vld [vmem:[%s12233_s2 + $0x3b4] ss:$8 sps:$4 sm:$0xff]  }
 0x464   :  { %4763 = vmatprep.subr.bf16.mxu0 %v8990_v36  ;;  %v9069_v36 = vld [vmem:[%s12233_s2 + $0x3b0] ss:$8 sps:$4 sm:$0xff]  }
 0x466   :  { %7990 = vmatmul.mubr.msk.bf16.vlgmr.msra.gmra.mrb[4].mxu0 %vm2939_vm3, %v10830_v17  ;;  %v8999_v17 = vld [vmem:[%s12233_s2 + $0x234] ss:$8 sps:$4 sm:$0xff]  }
 0x467   :  { %4764 = vmatpush1.bf16.msra.mxu0 %v8988_v20  ;;  %7991 = vmatprep.mubr.msk.bf16.mxu0 %vm2939_vm3, %v10827_v34  ;;  %v8997_v34 = vld [vmem:[%s12233_s2 + $0x230] ss:$8 sps:$4 sm:$0xff]   ;;  %v9074_v20 = vld [vmem:[%s12233_s2 + $0x3c4] ss:$8 sps:$4 sm:$0xff]  }
 0x468   :  { %4765 = vmatprep.subr.bf16.mxu0 %v8993_v5  ;;  %v9072_v5 = vld [vmem:[%s12233_s2 + $0x3c0] ss:$8 sps:$4 sm:$0xff]  }
 0x46b   :  { %4766 = vmatpush1.bf16.msra.mxu0 %v8991_v40  ;;  %v9077_v40 = vld [vmem:[%s12233_s2 + $0x3d4] ss:$8 sps:$4 sm:$0xff]  }
 0x46c   :  { %4767 = vmatprep.subr.bf16.mxu0 %v8996_v44  ;;  %v9075_v44 = vld [vmem:[%s12233_s2 + $0x3d0] ss:$8 sps:$4 sm:$0xff]  }
 0x46f   :  { %4768 = vmatpush1.bf16.msra.mxu0 %v8994_v45  ;;  %v9080_v45 = vld [vmem:[%s12233_s2 + $0x3e4] ss:$8 sps:$4 sm:$0xff]  }
 0x470   :  { %4769 = vmatprep.subr.bf16.mxu0 %v8999_v17  ;;  %v9078_v17 = vld [vmem:[%s12233_s2 + $0x3e0] ss:$8 sps:$4 sm:$0xff]  }
 0x473   :  { %4770 = vmatpush1.bf16.msra.mxu0 %v8997_v34  ;;  %v9083_v34 = vld [vmem:[%s12233_s2 + $0x3f4] ss:$8 sps:$4 sm:$0xff]  }
 0x474   :  { %4771 = vmatprep.subr.bf16.mxu0 %v9002_v46  ;;  %v9081_v46 = vld [vmem:[%s12233_s2 + $0x3f0] ss:$8 sps:$4 sm:$0xff]  }
 0x477   :  { %4772 = vmatpush1.bf16.msra.mxu0 %v9000_v48  ;;  %v9086_v48 = vld [vmem:[%s12233_s2 + $0x804] ss:$8 sps:$4 sm:$0xff]  }
 0x478   :  { %4773 = vmatprep.subr.bf16.mxu0 %v9005_v50  ;;  %v9084_v50 = vld [vmem:[%s12233_s2 + $0x800] ss:$8 sps:$4 sm:$0xff]  }
 0x47b   :  { %4774 = vmatpush1.bf16.msra.mxu0 %v9003_v51  ;;  %v9089_v51 = vld [vmem:[%s12233_s2 + $0x814] ss:$8 sps:$4 sm:$0xff]  }
 0x47c   :  { %4775 = vmatprep.subr.bf16.mxu0 %v9008_v52  ;;  %v4975_v52 = vrot.slane %v10726_v43, 2  ;;  %v9095_v43 = vld [vmem:[%s12233_s2 + $0x834] ss:$8 sps:$4 sm:$0xff]  }
 0x47f   :  { %4776 = vmatpush1.bf16.msra.mxu0 %v9006_v29  ;;  %v9087_v29 = vld [vmem:[%s12233_s2 + $0x810] ss:$8 sps:$4 sm:$0xff]  }
 0x480   :  { %4777 = vmatprep.subr.bf16.mxu0 %v9011_v53  ;;  %v9092_v53 = vld [vmem:[%s12233_s2 + $0x824] ss:$8 sps:$4 sm:$0xff]  }
 0x483   :  { %4778 = vmatpush1.bf16.msra.mxu0 %v9009_v4  ;;  %v9090_v4 = vld [vmem:[%s12233_s2 + $0x820] ss:$8 sps:$4 sm:$0xff]  }
 0x484   :  { %4779 = vmatprep.subr.bf16.mxu0 %v9014_v7  ;;  %v9098_v7 = vld [vmem:[%s12233_s2 + $0x844] ss:$8 sps:$4 sm:$0xff]  }
 0x487   :  { %4780 = vmatpush1.bf16.msra.mxu0 %v9012_v24  ;;  %v9096_v24 = vld [vmem:[%s12233_s2 + $0x840] ss:$8 sps:$4 sm:$0xff]  }
 0x488   :  { %4781 = vmatprep.subr.bf16.mxu0 %v9017_v54  ;;  %v9101_v54 = vld [vmem:[%s12233_s2 + $0x854] ss:$8 sps:$4 sm:$0xff]  }
 0x48b   :  { %4782 = vmatpush1.bf16.msra.mxu0 %v9015_v55  ;;  %v9099_v55 = vld [vmem:[%s12233_s2 + $0x850] ss:$8 sps:$4 sm:$0xff]  }
 0x48c   :  { %4783 = vmatprep.subr.bf16.mxu0 %v9020_v56  ;;  %v9104_v56 = vld [vmem:[%s12233_s2 + $0x864] ss:$8 sps:$4 sm:$0xff]  }
 0x48f   :  { %4784 = vmatpush1.bf16.msra.mxu0 %v9018_v57  ;;  %v9102_v57 = vld [vmem:[%s12233_s2 + $0x860] ss:$8 sps:$4 sm:$0xff]  }
 0x490   :  { %4785 = vmatprep.subr.bf16.mxu0 %v9023_v58  ;;  %v9107_v58 = vld [vmem:[%s12233_s2 + $0x874] ss:$8 sps:$4 sm:$0xff]  }
 0x493   :  { %4786 = vmatpush1.bf16.msra.mxu0 %v9021_v59  ;;  %v9105_v59 = vld [vmem:[%s12233_s2 + $0x870] ss:$8 sps:$4 sm:$0xff]  }
 0x494   :  { %4787 = vmatprep.subr.bf16.mxu0 %v9026_v60  ;;  %v9110_v60 = vld [vmem:[%s12233_s2 + $0x884] ss:$8 sps:$4 sm:$0xff]  }
 0x497   :  { %4788 = vmatpush1.bf16.msra.mxu0 %v9024_v61  ;;  %v9108_v61 = vld [vmem:[%s12233_s2 + $0x880] ss:$8 sps:$4 sm:$0xff]  }
 0x498   :  { %4789 = vmatprep.subr.bf16.mxu0 %v9029_v62  ;;  %v9113_v62 = vld [vmem:[%s12233_s2 + $0x894] ss:$8 sps:$4 sm:$0xff]  }
 0x49b   :  { %4790 = vmatpush1.bf16.msra.mxu0 %v9027_v41  ;;  %v9111_v41 = vld [vmem:[%s12233_s2 + $0x890] ss:$8 sps:$4 sm:$0xff]  }
 0x49c   :  { %4791 = vmatprep.subr.bf16.mxu0 %v9032_v37  ;;  %v9116_v37 = vld [vmem:[%s12233_s2 + $0x8a4] ss:$8 sps:$4 sm:$0xff]  }
 0x49f   :  { %4792 = vmatpush1.bf16.msra.mxu0 %v9030_v63  ;;  %v9114_v63 = vld [vmem:[%s12233_s2 + $0x8a0] ss:$8 sps:$4 sm:$0xff]  }
 0x4a0   :  { %4793 = vmatprep.subr.bf16.mxu0 %v9035_v0  ;;  %v9119_v0 = vld [vmem:[%s12233_s2 + $0x8b4] ss:$8 sps:$4 sm:$0xff]  }
 0x4a3   :  { %4794 = vmatpush1.bf16.msra.mxu0 %v9033_v1  ;;  %v9117_v1 = vld [vmem:[%s12233_s2 + $0x8b0] ss:$8 sps:$4 sm:$0xff]  }
 0x4a4   :  { %4804 = vmatprep.subr.bf16.mxu0 %v9038_v2  ;;  %v9122_v2 = vld [vmem:[%s12233_s2 + $0x8c4] ss:$8 sps:$4 sm:$0xff]  }
 0x4a6   :  { %7992 = vmatmul.mubr.msk.bf16.vlgmr.msra.gmra.mrb[4].mxu0 %vm2939_vm3, %v10949_v23  ;;  %v9047_v23 = vld [vmem:[%s12233_s2 + $0x334] ss:$8 sps:$4 sm:$0xff]  }
 0x4a7   :  { %4805 = vmatpush1.bf16.msra.mxu0 %v9036_v3  ;;  %7993 = vmatprep.mubr.msk.bf16.mxu0 %vm2939_vm3, %v10962_v30  ;;  %v9045_v30 = vld [vmem:[%s12233_s2 + $0x330] ss:$8 sps:$4 sm:$0xff]   ;;  %v9120_v3 = vld [vmem:[%s12233_s2 + $0x8c0] ss:$8 sps:$4 sm:$0xff]  }
 0x4a8   :  { %4806 = vmatprep.subr.bf16.mxu0 %v9041_v6  ;;  %v9125_v6 = vld [vmem:[%s12233_s2 + $0x8d4] ss:$8 sps:$4 sm:$0xff]  }
 0x4ab   :  { %4807 = vmatpush1.bf16.msra.mxu0 %v9039_v8  ;;  %v9123_v8 = vld [vmem:[%s12233_s2 + $0x8d0] ss:$8 sps:$4 sm:$0xff]  }
 0x4ac   :  { %4808 = vmatprep.subr.bf16.mxu0 %v9044_v9  ;;  %v9128_v9 = vld [vmem:[%s12233_s2 + $0x8e4] ss:$8 sps:$4 sm:$0xff]  }
 0x4af   :  { %4809 = vmatpush1.bf16.msra.mxu0 %v9042_v11  ;;  %v9126_v11 = vld [vmem:[%s12233_s2 + $0x8e0] ss:$8 sps:$4 sm:$0xff]  }
 0x4b0   :  { %4810 = vmatprep.subr.bf16.mxu0 %v9047_v23  ;;  %v9131_v23 = vld [vmem:[%s12233_s2 + $0x8f4] ss:$8 sps:$4 sm:$0xff]  }
 0x4b3   :  { %4811 = vmatpush1.bf16.msra.mxu0 %v9045_v30  ;;  %v9129_v30 = vld [vmem:[%s12233_s2 + $0x8f0] ss:$8 sps:$4 sm:$0xff]  }
 0x4b4   :  { %4812 = vmatprep.subr.bf16.mxu0 %v9050_v47  ;;  %v9134_v47 = vld [vmem:[%s12233_s2 + $0x904] ss:$8 sps:$4 sm:$0xff]  }
 0x4b7   :  { %4813 = vmatpush1.bf16.msra.mxu0 %v9048_v13  ;;  %v9132_v13 = vld [vmem:[%s12233_s2 + $0x900] ss:$8 sps:$4 sm:$0xff]  }
 0x4b8   :  { %4814 = vmatprep.subr.bf16.mxu0 %v9053_v15  ;;  %v4974_v15 = vrot.slane %v10719_v38, 2  ;;  %v9138_v38 = vld [vmem:[%s12233_s2 + $0x920] ss:$8 sps:$4 sm:$0xff]  }
 0x4bb   :  { %4815 = vmatpush1.bf16.msra.mxu0 %v9051_v16  ;;  %v9137_v16 = vld [vmem:[%s12233_s2 + $0x914] ss:$8 sps:$4 sm:$0xff]  }
 0x4bc   :  { %4816 = vmatprep.subr.bf16.mxu0 %v9056_v49  ;;  %v4977_v49 = vrot.slane %v10844_v39, 2  ;;  %v9143_v39 = vld [vmem:[%s12233_s2 + $0x934] ss:$8 sps:$4 sm:$0xff]  }
 0x4bf   :  { %4817 = vmatpush1.bf16.msra.mxu0 %v9054_v18  ;;  %v9135_v18 = vld [vmem:[%s12233_s2 + $0x910] ss:$8 sps:$4 sm:$0xff]  }
 0x4c0   :  { %4818 = vmatprep.subr.bf16.mxu0 %v9059_v19  ;;  %v9140_v19 = vld [vmem:[%s12233_s2 + $0x924] ss:$8 sps:$4 sm:$0xff]  }
 0x4c3   :  { %4819 = vmatpush1.bf16.msra.mxu0 %v9057_v21  ;;  %v9141_v21 = vld [vmem:[%s12233_s2 + $0x930] ss:$8 sps:$4 sm:$0xff]  }
 0x4c4   :  { %4820 = vmatprep.subr.bf16.mxu0 %v9062_v22  ;;  %v9146_v22 = vld [vmem:[%s12233_s2 + $0x944] ss:$8 sps:$4 sm:$0xff]  }
 0x4c7   :  { %4821 = vmatpush1.bf16.msra.mxu0 %v9060_v42  ;;  %v9144_v42 = vld [vmem:[%s12233_s2 + $0x940] ss:$8 sps:$4 sm:$0xff]  }
 0x4c8   :  { %4822 = vmatprep.subr.bf16.mxu0 %v9065_v25  ;;  %v9149_v25 = vld [vmem:[%s12233_s2 + $0x954] ss:$8 sps:$4 sm:$0xff]  }
 0x4cb   :  { %4823 = vmatpush1.bf16.msra.mxu0 %v9063_v26  ;;  %v9147_v26 = vld [vmem:[%s12233_s2 + $0x950] ss:$8 sps:$4 sm:$0xff]  }
 0x4cc   :  { %4824 = vmatprep.subr.bf16.mxu0 %v9068_v27  ;;  %v9152_v27 = vld [vmem:[%s12233_s2 + $0x964] ss:$8 sps:$4 sm:$0xff]  }
 0x4cf   :  { %4825 = vmatpush1.bf16.msra.mxu0 %v9066_v32  ;;  %v9150_v32 = vld [vmem:[%s12233_s2 + $0x960] ss:$8 sps:$4 sm:$0xff]  }
 0x4d0   :  { %4826 = vmatprep.subr.bf16.mxu0 %v9071_v33  ;;  %v9155_v33 = vld [vmem:[%s12233_s2 + $0x974] ss:$8 sps:$4 sm:$0xff]  }
 0x4d3   :  { %4827 = vmatpush1.bf16.msra.mxu0 %v9069_v36  ;;  %v9153_v36 = vld [vmem:[%s12233_s2 + $0x970] ss:$8 sps:$4 sm:$0xff]  }
 0x4d4   :  { %4828 = vmatprep.subr.bf16.mxu0 %v9074_v20  ;;  %v9158_v20 = vld [vmem:[%s12233_s2 + $0x984] ss:$8 sps:$4 sm:$0xff]  }
 0x4d7   :  { %4829 = vmatpush1.bf16.msra.mxu0 %v9072_v5  ;;  %v9156_v5 = vld [vmem:[%s12233_s2 + $0x980] ss:$8 sps:$4 sm:$0xff]  }
 0x4d8   :  { %4830 = vmatprep.subr.bf16.mxu0 %v9077_v40  ;;  %v9161_v40 = vld [vmem:[%s12233_s2 + $0x994] ss:$8 sps:$4 sm:$0xff]  }
 0x4db   :  { %4831 = vmatpush1.bf16.msra.mxu0 %v9075_v44  ;;  %v9159_v44 = vld [vmem:[%s12233_s2 + $0x990] ss:$8 sps:$4 sm:$0xff]  }
 0x4dc   :  { %4832 = vmatprep.subr.bf16.mxu0 %v9080_v45  ;;  %v9164_v45 = vld [vmem:[%s12233_s2 + $0x9a4] ss:$8 sps:$4 sm:$0xff]  }
 0x4df   :  { %4833 = vmatpush1.bf16.msra.mxu0 %v9078_v17  ;;  %v9162_v17 = vld [vmem:[%s12233_s2 + $0x9a0] ss:$8 sps:$4 sm:$0xff]  }
 0x4e0   :  { %4834 = vmatprep.subr.bf16.mxu0 %v9083_v34  ;;  %v9167_v34 = vld [vmem:[%s12233_s2 + $0x9b4] ss:$8 sps:$4 sm:$0xff]  }
 0x4e3   :  { %4835 = vmatpush1.bf16.msra.mxu0 %v9081_v46  ;;  %v9165_v46 = vld [vmem:[%s12233_s2 + $0x9b0] ss:$8 sps:$4 sm:$0xff]  }
 0x4e4   :  { %5630 = vmatprep.subr.bf16.mxu0 %v9086_v48  ;;  %v9170_v48 = vld [vmem:[%s12233_s2 + $0x9c4] ss:$8 sps:$4 sm:$0xff]  }
 0x4e6   :  { %7994 = vmatmul.mubr.msk.bf16.vlgmr.msra.gmra.mrb[4].mxu0 %vm2939_vm3, %v11064_v12  ;;  %v9093_v12 = vld [vmem:[%s12233_s2 + $0x830] ss:$8 sps:$4 sm:$0xff]  }
 0x4e7   :  { %5631 = vmatpush1.bf16.msra.mxu0 %v9084_v50  ;;  %5662 = vmatprep.mubr.bf16.mxu0 %v4975_v52  ;;  %v9168_v50 = vld [vmem:[%s12233_s2 + $0x9c0] ss:$8 sps:$4 sm:$0xff]   ;;  %v9171_v52 = vld [vmem:[%s12233_s2 + $0x9d0] ss:$8 sps:$4 sm:$0xff]  }
 0x4e8   :  { %5632 = vmatprep.subr.bf16.mxu0 %v9089_v51  ;;  %v9173_v51 = vld [vmem:[%s12233_s2 + $0x9d4] ss:$8 sps:$4 sm:$0xff]  }
 0x4eb   :  { %5633 = vmatpush1.bf16.msra.mxu0 %v9087_v29  ;;  %v9176_v29 = vld [vmem:[%s12233_s2 + $0x9e4] ss:$8 sps:$4 sm:$0xff]  }
 0x4ec   :  { %5634 = vmatprep.subr.bf16.mxu0 %v9092_v53  ;;  %v9174_v53 = vld [vmem:[%s12233_s2 + $0x9e0] ss:$8 sps:$4 sm:$0xff]  }
 0x4ef   :  { %5635 = vmatpush1.bf16.msra.mxu0 %v9090_v4  ;;  %v9179_v4 = vld [vmem:[%s12233_s2 + $0x9f4] ss:$8 sps:$4 sm:$0xff]  }
 0x4f0   :  { %5636 = vmatprep.subr.bf16.mxu0 %v9095_v43  ;;  %v9177_v43 = vld [vmem:[%s12233_s2 + $0x9f0] ss:$8 sps:$4 sm:$0xff]  }
 0x4f3   :  { %5637 = vmatpush1.bf16.msra.mxu0 %v9093_v12  ;;  %v9182_v12 = vld [vmem:[%s12233_s2 + $0xa04] ss:$8 sps:$4 sm:$0xff]  }
 0x4f4   :  { %5638 = vmatprep.subr.bf16.mxu0 %v9098_v7  ;;  %v9180_v7 = vld [vmem:[%s12233_s2 + $0xa00] ss:$8 sps:$4 sm:$0xff]  }
 0x4f7   :  { %5639 = vmatpush1.bf16.msra.mxu0 %v9096_v24  ;;  %v4976_v24 = vrot.slane %v10837_v35, 2  ;;  %v9186_v35 = vld [vmem:[%s12233_s2 + $0xa20] ss:$8 sps:$4 sm:$0xff]  }
 0x4f8   :  { %5640 = vmatprep.subr.bf16.mxu0 %v9101_v54  ;;  %v9185_v54 = vld [vmem:[%s12233_s2 + $0xa14] ss:$8 sps:$4 sm:$0xff]  }
 0x4fb   :  { %5641 = vmatpush1.bf16.msra.mxu0 %v9099_v55  ;;  %v4979_v55 = vrot.slane %v10848_v10, 2  ;;  %v9191_v10 = vld [vmem:[%s12233_s2 + $0xa34] ss:$8 sps:$4 sm:$0xff]  }
 0x4fc   :  { %5642 = vmatprep.subr.bf16.mxu0 %v9104_v56  ;;  %v9183_v56 = vld [vmem:[%s12233_s2 + $0xa10] ss:$8 sps:$4 sm:$0xff]  }
 0x4ff   :  { %5643 = vmatpush1.bf16.msra.mxu0 %v9102_v57  ;;  %v9188_v57 = vld [vmem:[%s12233_s2 + $0xa24] ss:$8 sps:$4 sm:$0xff]  }
 0x500   :  { %5644 = vmatprep.subr.bf16.mxu0 %v9107_v58  ;;  %v9189_v58 = vld [vmem:[%s12233_s2 + $0xa30] ss:$8 sps:$4 sm:$0xff]  }
 0x503   :  { %5645 = vmatpush1.bf16.msra.mxu0 %v9105_v59  ;;  %v9194_v59 = vld [vmem:[%s12233_s2 + $0xa44] ss:$8 sps:$4 sm:$0xff]  }
 0x504   :  { %5646 = vmatprep.subr.bf16.mxu0 %v9110_v60  ;;  %v9192_v60 = vld [vmem:[%s12233_s2 + $0xa40] ss:$8 sps:$4 sm:$0xff]  }
 0x507   :  { %5647 = vmatpush1.bf16.msra.mxu0 %v9108_v61  ;;  %v9197_v61 = vld [vmem:[%s12233_s2 + $0xa54] ss:$8 sps:$4 sm:$0xff]  }
 0x508   :  { %5648 = vmatprep.subr.bf16.mxu0 %v9113_v62  ;;  %v9195_v62 = vld [vmem:[%s12233_s2 + $0xa50] ss:$8 sps:$4 sm:$0xff]  }
 0x50b   :  { %5649 = vmatpush1.bf16.msra.mxu0 %v9111_v41  ;;  %v9200_v41 = vld [vmem:[%s12233_s2 + $0xa64] ss:$8 sps:$4 sm:$0xff]  }
 0x50c   :  { %5650 = vmatprep.subr.bf16.mxu0 %v9116_v37  ;;  %v9198_v37 = vld [vmem:[%s12233_s2 + $0xa60] ss:$8 sps:$4 sm:$0xff]  }
 0x50f   :  { %5651 = vmatpush1.bf16.msra.mxu0 %v9114_v63  ;;  %v9203_v63 = vld [vmem:[%s12233_s2 + $0xa74] ss:$8 sps:$4 sm:$0xff]  }
 0x510   :  { %5652 = vmatprep.subr.bf16.mxu0 %v9119_v0  ;;  %v9201_v0 = vld [vmem:[%s12233_s2 + $0xa70] ss:$8 sps:$4 sm:$0xff]  }
 0x513   :  { %5653 = vmatpush1.bf16.msra.mxu0 %v9117_v1  ;;  %v9206_v1 = vld [vmem:[%s12233_s2 + $0xa84] ss:$8 sps:$4 sm:$0xff]  }
 0x514   :  { %5654 = vmatprep.subr.bf16.mxu0 %v9122_v2  ;;  %v9204_v2 = vld [vmem:[%s12233_s2 + $0xa80] ss:$8 sps:$4 sm:$0xff]  }
 0x517   :  { %5655 = vmatpush1.bf16.msra.mxu0 %v9120_v3  ;;  %v9209_v3 = vld [vmem:[%s12233_s2 + $0xa94] ss:$8 sps:$4 sm:$0xff]  }
 0x518   :  { %5656 = vmatprep.subr.bf16.mxu0 %v9125_v6  ;;  %v9207_v6 = vld [vmem:[%s12233_s2 + $0xa90] ss:$8 sps:$4 sm:$0xff]  }
 0x51b   :  { %5657 = vmatpush1.bf16.msra.mxu0 %v9123_v8  ;;  %v9212_v8 = vld [vmem:[%s12233_s2 + $0xaa4] ss:$8 sps:$4 sm:$0xff]  }
 0x51c   :  { %5658 = vmatprep.subr.bf16.mxu0 %v9128_v9  ;;  %v9210_v9 = vld [vmem:[%s12233_s2 + $0xaa0] ss:$8 sps:$4 sm:$0xff]  }
 0x51f   :  { %5659 = vmatpush1.bf16.msra.mxu0 %v9126_v11  ;;  %v9215_v11 = vld [vmem:[%s12233_s2 + $0xab4] ss:$8 sps:$4 sm:$0xff]  }
 0x520   :  { %5660 = vmatprep.subr.bf16.mxu0 %v9131_v23  ;;  %v9213_v23 = vld [vmem:[%s12233_s2 + $0xab0] ss:$8 sps:$4 sm:$0xff]  }
 0x523   :  { %5661 = vmatpush1.bf16.msra.mxu0 %v9129_v30  ;;  %v9218_v30 = vld [vmem:[%s12233_s2 + $0xac4] ss:$8 sps:$4 sm:$0xff]  }
 0x524   :  { %5671 = vmatprep.subr.bf16.mxu0 %v9134_v47  ;;  %v9216_v47 = vld [vmem:[%s12233_s2 + $0xac0] ss:$8 sps:$4 sm:$0xff]  }
 0x526   :  { %5663 = vmatmul.mubr.bf16.vlgmr.msra.gmra.mrb[4].mxu0 %v4974_v15  ;;  %v9219_v15 = vld [vmem:[%s12233_s2 + $0xad0] ss:$8 sps:$4 sm:$0xff]  }
 0x527   :  { %5672 = vmatpush1.bf16.msra.mxu0 %v9132_v13  ;;  %5703 = vmatprep.mubr.bf16.mxu0 %v4977_v49  ;;  %v9221_v13 = vld [vmem:[%s12233_s2 + $0xad4] ss:$8 sps:$4 sm:$0xff]   ;;  %v9222_v49 = vld [vmem:[%s12233_s2 + $0xae0] ss:$8 sps:$4 sm:$0xff]  }
 0x528   :  { %5673 = vmatprep.subr.bf16.mxu0 %v9137_v16  ;;  %v9224_v16 = vld [vmem:[%s12233_s2 + $0xae4] ss:$8 sps:$4 sm:$0xff]  }
 0x52b   :  { %5674 = vmatpush1.bf16.msra.mxu0 %v9135_v18  ;;  %v9227_v18 = vld [vmem:[%s12233_s2 + $0xaf4] ss:$8 sps:$4 sm:$0xff]  }
 0x52c   :  { %5675 = vmatprep.subr.bf16.mxu0 %v9140_v19  ;;  %v9225_v19 = vld [vmem:[%s12233_s2 + $0xaf0] ss:$8 sps:$4 sm:$0xff]  }
 0x52f   :  { %5676 = vmatpush1.bf16.msra.mxu0 %v9138_v38  ;;  %v9230_v38 = vld [vmem:[%s12233_s2 + $0xb04] ss:$8 sps:$4 sm:$0xff]  }
 0x530   :  { %5677 = vmatprep.subr.bf16.mxu0 %v9143_v39  ;;  %v9228_v39 = vld [vmem:[%s12233_s2 + $0xb00] ss:$8 sps:$4 sm:$0xff]  }
 0x533   :  { %5678 = vmatpush1.bf16.msra.mxu0 %v9141_v21  ;;  %v4978_v21 = vrot.slane %v10959_v28, 2  ;;  %v9234_v28 = vld [vmem:[%s12233_s2 + $0xb20] ss:$8 sps:$4 sm:$0xff]  }
 0x534   :  { %5679 = vmatprep.subr.bf16.mxu0 %v9146_v22  ;;  %v9233_v22 = vld [vmem:[%s12233_s2 + $0xb14] ss:$8 sps:$4 sm:$0xff]  }
 0x537   :  { %5680 = vmatpush1.bf16.msra.mxu0 %v9144_v42  ;;  %v4981_v42 = vrot.slane %v10966_v31, 2  ;;  %v9239_v31 = vld [vmem:[%s12233_s2 + $0xb34] ss:$8 sps:$4 sm:$0xff]  }
 0x538   :  { %5681 = vmatprep.subr.bf16.mxu0 %v9149_v25  ;;  %v9231_v25 = vld [vmem:[%s12233_s2 + $0xb10] ss:$8 sps:$4 sm:$0xff]  }
 0x53b   :  { %5682 = vmatpush1.bf16.msra.mxu0 %v9147_v26  ;;  %v9236_v26 = vld [vmem:[%s12233_s2 + $0xb24] ss:$8 sps:$4 sm:$0xff]  }
 0x53c   :  { %5683 = vmatprep.subr.bf16.mxu0 %v9152_v27  ;;  %v9237_v27 = vld [vmem:[%s12233_s2 + $0xb30] ss:$8 sps:$4 sm:$0xff]  }
 0x53f   :  { %5684 = vmatpush1.bf16.msra.mxu0 %v9150_v32  ;;  %v9242_v32 = vld [vmem:[%s12233_s2 + $0xb44] ss:$8 sps:$4 sm:$0xff]  }
 0x540   :  { %5685 = vmatprep.subr.bf16.mxu0 %v9155_v33  ;;  %v9240_v33 = vld [vmem:[%s12233_s2 + $0xb40] ss:$8 sps:$4 sm:$0xff]  }
 0x543   :  { %5686 = vmatpush1.bf16.msra.mxu0 %v9153_v36  ;;  %v9245_v36 = vld [vmem:[%s12233_s2 + $0xb54] ss:$8 sps:$4 sm:$0xff]  }
 0x544   :  { %5687 = vmatprep.subr.bf16.mxu0 %v9158_v20  ;;  %v9243_v20 = vld [vmem:[%s12233_s2 + $0xb50] ss:$8 sps:$4 sm:$0xff]  }
 0x547   :  { %5688 = vmatpush1.bf16.msra.mxu0 %v9156_v5  ;;  %v9248_v5 = vld [vmem:[%s12233_s2 + $0xb64] ss:$8 sps:$4 sm:$0xff]  }
 0x548   :  { %5689 = vmatprep.subr.bf16.mxu0 %v9161_v40  ;;  %v9246_v40 = vld [vmem:[%s12233_s2 + $0xb60] ss:$8 sps:$4 sm:$0xff]  }
 0x54b   :  { %5690 = vmatpush1.bf16.msra.mxu0 %v9159_v44  ;;  %v9251_v44 = vld [vmem:[%s12233_s2 + $0xb74] ss:$8 sps:$4 sm:$0xff]  }
 0x54c   :  { %5691 = vmatprep.subr.bf16.mxu0 %v9164_v45  ;;  %v9249_v45 = vld [vmem:[%s12233_s2 + $0xb70] ss:$8 sps:$4 sm:$0xff]  }
 0x54f   :  { %5692 = vmatpush1.bf16.msra.mxu0 %v9162_v17  ;;  %v9254_v17 = vld [vmem:[%s12233_s2 + $0xb84] ss:$8 sps:$4 sm:$0xff]  }
 0x550   :  { %5693 = vmatprep.subr.bf16.mxu0 %v9167_v34  ;;  %v9252_v34 = vld [vmem:[%s12233_s2 + $0xb80] ss:$8 sps:$4 sm:$0xff]  }
 0x553   :  { %5694 = vmatpush1.bf16.msra.mxu0 %v9165_v46  ;;  %v9257_v46 = vld [vmem:[%s12233_s2 + $0xb94] ss:$8 sps:$4 sm:$0xff]  }
 0x554   :  { %5695 = vmatprep.subr.bf16.mxu0 %v9170_v48  ;;  %v9255_v48 = vld [vmem:[%s12233_s2 + $0xb90] ss:$8 sps:$4 sm:$0xff]  }
 0x557   :  { %5696 = vmatpush1.bf16.msra.mxu0 %v9168_v50  ;;  %v9260_v50 = vld [vmem:[%s12233_s2 + $0xba4] ss:$8 sps:$4 sm:$0xff]  }
 0x558   :  { %5697 = vmatprep.subr.bf16.mxu0 %v9173_v51  ;;  %v9258_v51 = vld [vmem:[%s12233_s2 + $0xba0] ss:$8 sps:$4 sm:$0xff]  }
 0x55b   :  { %5698 = vmatpush1.bf16.msra.mxu0 %v9171_v52  ;;  %v9263_v52 = vld [vmem:[%s12233_s2 + $0xbb4] ss:$8 sps:$4 sm:$0xff]  }
 0x55c   :  { %5699 = vmatprep.subr.bf16.mxu0 %v9176_v29  ;;  %v9261_v29 = vld [vmem:[%s12233_s2 + $0xbb0] ss:$8 sps:$4 sm:$0xff]  }
 0x55f   :  { %5700 = vmatpush1.bf16.msra.mxu0 %v9174_v53  ;;  %v9266_v53 = vld [vmem:[%s12233_s2 + $0xbc4] ss:$8 sps:$4 sm:$0xff]  }
 0x560   :  { %5701 = vmatprep.subr.bf16.mxu0 %v9179_v4  ;;  %v9264_v4 = vld [vmem:[%s12233_s2 + $0xbc0] ss:$8 sps:$4 sm:$0xff]  }
 0x563   :  { %5702 = vmatpush1.bf16.msra.mxu0 %v9177_v43  ;;  %v9269_v43 = vld [vmem:[%s12233_s2 + $0xbd4] ss:$8 sps:$4 sm:$0xff]  }
 0x564   :  { %5712 = vmatprep.subr.bf16.mxu0 %v9182_v12  ;;  %v9267_v12 = vld [vmem:[%s12233_s2 + $0xbd0] ss:$8 sps:$4 sm:$0xff]  }
 0x566   :  { %5704 = vmatmul.mubr.bf16.vlgmr.msra.gmra.mrb[4].mxu0 %v4976_v24  ;;  %v9270_v24 = vld [vmem:[%s12233_s2 + $0xbe0] ss:$8 sps:$4 sm:$0xff]  }
 0x567   :  { %5713 = vmatpush1.bf16.msra.mxu0 %v9180_v7  ;;  %5744 = vmatprep.mubr.bf16.mxu0 %v4979_v55  ;;  %v9272_v7 = vld [vmem:[%s12233_s2 + $0xbe4] ss:$8 sps:$4 sm:$0xff]  }
 0x568   :  { %5714 = vmatprep.subr.bf16.mxu0 %v9185_v54  ;;  %v9275_v54 = vld [vmem:[%s12233_s2 + $0xbf4] ss:$8 sps:$4 sm:$0xff]   ;;  %v5812_v55 = vld [vmem:[%s12234_s5 + $0x80] sm:$0xff] }
 0x56b   :  { %5715 = vmatpush1.bf16.msra.mxu0 %v9183_v56  ;;  %v5813_v56 = vld [vmem:[%s12234_s5 + $0x88] sm:$0xff] }
 0x56c   :  { %5716 = vmatprep.subr.bf16.mxu0 %v9188_v57  ;;  %v9273_v57 = vld [vmem:[%s12233_s2 + $0xbf0] ss:$8 sps:$4 sm:$0xff]  }
 0x56f   :  { %5717 = vmatpush1.bf16.msra.mxu0 %v9186_v35  ;;  %v11871_v35 = vpack.c.bf16 %v5813_v56, %v5812_v55 }
 0x570   :  { %5718 = vmatprep.subr.bf16.mxu0 %v9191_v10  ;;  %v5796_v10 = vld [vmem:[%s12234_s5] sm:$0xff] }
 0x573   :  { %5719 = vmatpush1.bf16.msra.mxu0 %v9189_v58  ;;  %v5797_v58 = vld [vmem:[%s12234_s5 + $0x8] sm:$0xff] }
 0x574   :  { %5720 = vmatprep.subr.bf16.mxu0 %v9194_v59  ;;  %v5814_v59 = vld [vmem:[%s12234_s5 + $0x90] sm:$0xff] }
 0x577   :  { %5721 = vmatpush1.bf16.msra.mxu0 %v9192_v60  ;;  %v5815_v60 = vld [vmem:[%s12234_s5 + $0x98] sm:$0xff] }
 0x578   :  { %5722 = vmatprep.subr.bf16.mxu0 %v9197_v61  ;;  %v11885_v61 = vpack.c.bf16 %v5797_v58, %v5796_v10 }
 0x57b   :  { %5723 = vmatpush1.bf16.msra.mxu0 %v9195_v62  ;;  %v4980_v62 = vrot.slane %v11074_v14, 2  ;;  %v5817_v14 = vld [vmem:[%s12234_s5 + $0xa8] sm:$0xff] }
 0x57c   :  { %5724 = vmatprep.subr.bf16.mxu0 %v9200_v41  ;;  %v11889_v41 = vpack.c.bf16 %v5815_v60, %v5814_v59 }
 0x57f   :  { %5725 = vmatpush1.bf16.msra.mxu0 %v9198_v37  ;;  %v5798_v37 = vld [vmem:[%s12234_s5 + $0x10] sm:$0xff] }
 0x580   :  { %5726 = vmatprep.subr.bf16.mxu0 %v9203_v63  ;;  %v5799_v63 = vld [vmem:[%s12234_s5 + $0x18] sm:$0xff] }
 0x583   :  { %5727 = vmatpush1.bf16.msra.mxu0 %v9201_v0  ;;  %v5816_v0 = vld [vmem:[%s12234_s5 + $0xa0] sm:$0xff] }
 0x584   :  { %5728 = vmatprep.subr.bf16.mxu0 %v9206_v1  ;;  %v11904_v1 = vpack.c.bf16 %v5799_v63, %v5798_v37  ;;  %v9317_v37 = vmov 0.0  }
 0x585   :  { %5983 = vmatprep.mubr.f32.mxu1 %v9317_v37 }
 0x587   :  { %5729 = vmatpush1.bf16.msra.mxu0 %v9204_v2  ;;  %v11907_v2 = vpack.c.bf16 %v5817_v14, %v5816_v0 }
 0x588   :  { %5730 = vmatprep.subr.bf16.mxu0 %v9209_v3  ;;  %v5800_v3 = vld [vmem:[%s12234_s5 + $0x20] sm:$0xff] }
 0x58b   :  { %5731 = vmatpush1.bf16.msra.mxu0 %v9207_v6  ;;  %v5801_v6 = vld [vmem:[%s12234_s5 + $0x28] sm:$0xff] }
 0x58c   :  { %5732 = vmatprep.subr.bf16.mxu0 %v9212_v8  ;;  %v5818_v8 = vld [vmem:[%s12234_s5 + $0xb0] sm:$0xff] }
 0x58f   :  { %5733 = vmatpush1.bf16.msra.mxu0 %v9210_v9  ;;  %v5819_v9 = vld [vmem:[%s12234_s5 + $0xb8] sm:$0xff] }
 0x590   :  { %5734 = vmatprep.subr.bf16.mxu0 %v9215_v11  ;;  %v11922_v11 = vpack.c.bf16 %v5801_v6, %v5800_v3 }
 0x593   :  { %5735 = vmatpush1.bf16.msra.mxu0 %v9213_v23  ;;  %v11925_v23 = vpack.c.bf16 %v5819_v9, %v5818_v8 }
 0x594   :  { %5736 = vmatprep.subr.bf16.mxu0 %v9218_v30  ;;  %v5802_v30 = vld [vmem:[%s12234_s5 + $0x30] sm:$0xff] }
 0x597   :  { %5737 = vmatpush1.bf16.msra.mxu0 %v9216_v47  ;;  %v5803_v47 = vld [vmem:[%s12234_s5 + $0x38] sm:$0xff] }
 0x598   :  { %5738 = vmatprep.subr.bf16.mxu0 %v9221_v13  ;;  %v5820_v13 = vld [vmem:[%s12234_s5 + $0xc0] sm:$0xff] }
 0x59b   :  { %5739 = vmatpush1.bf16.msra.mxu0 %v9219_v15  ;;  %v5821_v15 = vld [vmem:[%s12234_s5 + $0xc8] sm:$0xff] }
 0x59c   :  { %5740 = vmatprep.subr.bf16.mxu0 %v9224_v16  ;;  %v11940_v16 = vpack.c.bf16 %v5803_v47, %v5802_v30 }
 0x59f   :  { %5741 = vmatpush1.bf16.msra.mxu0 %v9222_v49  ;;  %v11943_v49 = vpack.c.bf16 %v5821_v15, %v5820_v13 }
 0x5a0   :  { %5742 = vmatprep.subr.bf16.mxu0 %v9227_v18  ;;  %v5804_v18 = vld [vmem:[%s12234_s5 + $0x40] sm:$0xff] }
 0x5a3   :  { %5743 = vmatpush1.bf16.msra.mxu0 %v9225_v19  ;;  %v5805_v19 = vld [vmem:[%s12234_s5 + $0x48] sm:$0xff] }
 0x5a4   :  { %5753 = vmatprep.subr.bf16.mxu0 %v9230_v38  ;;  %v11953_v38 = vpack.c.bf16 %v5805_v19, %v5804_v18 }
 0x5a6   :  { %5745 = vmatmul.mubr.bf16.vlgmr.msra.gmra.mrb[4].mxu0 %v4978_v21  ;;  %v5823_v21 = vld [vmem:[%s12234_s5 + $0xd8] sm:$0xff] }
 0x5a7   :  { %5754 = vmatpush1.bf16.msra.mxu0 %v9228_v39  ;;  %5785 = vmatprep.mubr.bf16.mxu0 %v4981_v42  ;;  %v5822_v39 = vld [vmem:[%s12234_s5 + $0xd0] sm:$0xff] }
 0x5a8   :  { %5755 = vmatprep.subr.bf16.mxu0 %v9233_v22  ;;  %v11962_v22 = vpack.c.bf16 %v5823_v21, %v5822_v39  ;;  %v5806_v42 = vld [vmem:[%s12234_s5 + $0x50] sm:$0xff] }
 0x5ab   :  { %5756 = vmatpush1.bf16.msra.mxu0 %v9231_v25  ;;  %v5807_v25 = vld [vmem:[%s12234_s5 + $0x58] sm:$0xff] }
 0x5ac   :  { %5757 = vmatprep.subr.bf16.mxu0 %v9236_v26  ;;  %v11970_v26 = vpack.c.bf16 %v5807_v25, %v5806_v42  ;;  %v9276_v25 = vld [vmem:[%s12236_s3 + $0xc0] sm:$0xff]  }
 0x5af   :  { %5758 = vmatpush1.bf16.msra.mxu0 %v9234_v28  ;;  %v5824_v28 = vld [vmem:[%s12234_s5 + $0xe0] sm:$0xff] }
 0x5b0   :  { %5759 = vmatprep.subr.bf16.mxu0 %v9239_v31  ;;  %v5825_v31 = vld [vmem:[%s12234_s5 + $0xe8] sm:$0xff] }
 0x5b3   :  { %5760 = vmatpush1.bf16.msra.mxu0 %v9237_v27  ;;  %v8541_v27 = vpack.c.bf16 %v5825_v31, %v5824_v28 }
 0x5b4   :  { %5761 = vmatprep.subr.bf16.mxu0 %v9242_v32  ;;  %v5808_v32 = vld [vmem:[%s12234_s5 + $0x60] sm:$0xff] }
 0x5b7   :  { %5762 = vmatpush1.bf16.msra.mxu0 %v9240_v33  ;;  %v5809_v33 = vld [vmem:[%s12234_s5 + $0x68] sm:$0xff] }
 0x5b8   :  { %5763 = vmatprep.subr.bf16.mxu0 %v9245_v36  ;;  %v8543_v36 = vpack.c.bf16 %v5809_v33, %v5808_v32  ;;  %v9277_v33 = vld [vmem:[%s12236_s3 + $0x80] sm:$0xff]  }
 0x5bb   :  { %5764 = vmatpush1.bf16.msra.mxu0 %v9243_v20  ;;  %v5826_v20 = vld [vmem:[%s12234_s5 + $0xf0] sm:$0xff] }
 0x5bc   :  { %5765 = vmatprep.subr.bf16.mxu0 %v9248_v5  ;;  %v5827_v5 = vld [vmem:[%s12234_s5 + $0xf8] sm:$0xff] }
 0x5bf   :  { %5766 = vmatpush1.bf16.msra.mxu0 %v9246_v40  ;;  %v8545_v40 = vpack.c.bf16 %v5827_v5, %v5826_v20  ;;  %v9279_v5 = vld [vmem:[%s12236_s3 + $0x88] sm:$0xff]  }
 0x5c0   :  { %5767 = vmatprep.subr.bf16.mxu0 %v9251_v44  ;;  %v5810_v44 = vld [vmem:[%s12234_s5 + $0x70] sm:$0xff] }
 0x5c3   :  { %5768 = vmatpush1.bf16.msra.mxu0 %v9249_v45  ;;  %v5811_v45 = vld [vmem:[%s12234_s5 + $0x78] sm:$0xff] }
 0x5c4   :  { %5769 = vmatprep.subr.bf16.mxu0 %v9254_v17  ;;  %v8547_v17 = vpack.c.bf16 %v5811_v45, %v5810_v44  ;;  %v9281_v44 = vld [vmem:[%s12236_s3 + $0x90] sm:$0xff]   ;;  %v9282_v45 = vld [vmem:[%s12236_s3 + $0xd8] sm:$0xff]  }
 0x5c7   :  { %5770 = vmatpush1.bf16.msra.mxu0 %v9252_v34  ;;  %v5829_v34 = vld [vmem:[%s12235_s6 + $0x8] sm:$0xff] }
 0x5c8   :  { %5771 = vmatprep.subr.bf16.mxu0 %v9257_v46  ;;  %v5831_v46 = vld [vmem:[%s12235_s6 + $0x18] sm:$0xff] }
 0x5cb   :  { %5772 = vmatpush1.bf16.msra.mxu0 %v9255_v48  ;;  %v5828_v48 = vld [vmem:[%s12235_s6] sm:$0xff] }
 0x5cc   :  { %5773 = vmatprep.subr.bf16.mxu0 %v9260_v50  ;;  %v8549_v50 = vpack.c.bf16 %v5831_v46, %v5829_v34  ;;  %v9284_v34 = vld [vmem:[%s12236_s3 + $0xe0] sm:$0xff]  }
 0x5cd   :  { %v9285_v46 = vld [vmem:[%s12236_s3 + $0xa0] sm:$0xff]  }
 0x5ce   :  { %8550 = vmatprep.subr.bf16.mxu1 %v8549_v50 }
 0x5cf   :  { %5774 = vmatpush1.bf16.msra.mxu0 %v9258_v51  ;;  %v5830_v51 = vld [vmem:[%s12235_s6 + $0x10] sm:$0xff] }
 0x5d0   :  { %5775 = vmatprep.subr.bf16.mxu0 %v9263_v52  ;;  %v12010_v52 = vpack.c.bf16 %v5830_v51, %v5828_v48  ;;  %v9286_v48 = vld [vmem:[%s12236_s3 + $0xe8] sm:$0xff]   ;;  %v9288_v51 = vld [vmem:[%s12236_s3 + $0xf0] sm:$0xff]  }
 0x5d2   :  { %8552 = vmatpush1.bf16.msra.mxu1 %v12010_v52 }
 0x5d3   :  { %5776 = vmatpush1.bf16.msra.mxu0 %v9261_v29  ;;  %8554 = vmatprep.subr.bf16.mxu1 %v11871_v35 }
 0x5d4   :  { %5777 = vmatprep.subr.bf16.mxu0 %v9266_v53 }
 0x5d7   :  { %5778 = vmatpush1.bf16.msra.mxu0 %v9264_v4 }
 0x5d8   :  { %5779 = vmatprep.subr.bf16.mxu0 %v9269_v43 }
 0x5db   :  { %5780 = vmatpush1.bf16.msra.mxu0 %v9267_v12 }
 0x5dc   :  { %5781 = vmatprep.subr.bf16.mxu0 %v9272_v7 }
 0x5df   :  { %5782 = vmatpush1.bf16.msra.mxu0 %v9270_v24 }
 0x5e0   :  { %5783 = vmatprep.subr.bf16.mxu0 %v9275_v54 }
 0x5e3   :  { %5784 = vmatpush1.bf16.msra.mxu0 %v9273_v57 }
 0x5e4   :  { %8518 = vmatprep.subr.bf16.mxu0 %v11871_v35 }
 0x5e6   :  { %5786 = vmatmul.mubr.bf16.vlgmr.msra.gmra.mrb[4].mxu0 %v4980_v62 }
 0x5e7   :  { %8520 = vmatpush3.bf16.msra.mxu0 %v11885_v61 }
 0x5e8   :  { %8522 = vmatprep.subr.bf16.mxu0 %v11889_v41 }
 0x5eb   :  { %8524 = vmatpush3.bf16.msra.mxu0 %v11904_v1 }
 0x5ec   :  { %8526 = vmatprep.subr.bf16.mxu0 %v11907_v2 }
 0x5ef   :  { %8528 = vmatpush3.bf16.msra.mxu0 %v11922_v11 }
 0x5f0   :  { %8530 = vmatprep.subr.bf16.mxu0 %v11925_v23 }
 0x5f3   :  { %8532 = vmatpush3.bf16.msra.mxu0 %v11940_v16 }
 0x5f4   :  { %8534 = vmatprep.subr.bf16.mxu0 %v11943_v49 }
 0x5f7   :  { %8536 = vmatpush3.bf16.msra.mxu0 %v11953_v38 }
 0x5f8   :  { %8538 = vmatprep.subr.bf16.mxu0 %v11962_v22 }
 0x5fb   :  { %8540 = vmatpush3.bf16.msra.mxu0 %v11970_v26 }
 0x5fc   :  { %8542 = vmatprep.subr.bf16.mxu0 %v8541_v27 }
 0x5ff   :  { %8544 = vmatpush3.bf16.msra.mxu0 %v8543_v36 }
 0x600   :  { %8546 = vmatprep.subr.bf16.mxu0 %v8545_v40 }
 0x603   :  { %8548 = vmatpush3.bf16.msra.mxu0 %v8547_v17 }
 0x6b9   :  { %v5787_v29 = vpop.f32.mrb[4].mxu0 }
 0x6ba   :  { %v5832_v53 = vrot.slane %v5787_v29, 4  ;;  %v5789_v4 = vpop.f32.mrb[5].mxu0 }
 0x6bb   :  { %v5838_v43 = vrot.slane %v5789_v4, 4  ;;  %v5791_v12 = vpop.f32.mrb[6].mxu0 }
 0x6bc   :  { %v5833_v7 = vadd.f32 %v5832_v53, %v5787_v29  ;;  %v5792_v24 = vpop.f32.mrb[7].mxu0  ;;  %v9291_v53 = vld [vmem:[%s12236_s3 + $0xb8] sm:$0xff]  }
 0x6bd   :  { %v5839_v54 = vadd.f32 %v5838_v43, %v5789_v4  ;;  %v6171_v43 = vld [vmem:[%s12237_s7] sm:$0x3] }
 0x6be   :  { %v5834_v55 = vrot.slane %v5833_v7, 2  ;;  %v6185_v24 = vld [vmem:[%s12238_s8] sm:$0x3] }
 0x6bf   :  { %v5840_v56 = vrot.slane %v5839_v54, 2 }
 0x6c0   :  { %v5835_v57 = vadd.f32 %v5834_v55, %v5833_v7 }
 0x6c1   :  { %v5841_v10 = vadd.f32 %v5840_v56, %v5839_v54 }
 0x6c2   :  { %v5836_v58 = vrot.slane %v5835_v57, 1 }
 0x6c3   :  { %v5842_v59 = vrot.slane %v5841_v10, 1 }
 0x6c4   :  { %v5837_v62 = vadd.f32 %v5836_v58, %v5835_v57 }
 0x6c5   :  { %v5843_v60 = vadd.f32 %v5842_v59, %v5841_v10 }
 0x6c7   :  { %5908 = vmatprep.mubr.f32.mxu0 %v5843_v60 }
 0x6c8   :  { %5909 = vmatmul.mubr.f32.vlgmr.msra.gmra.mrb[8].mxu0 %v5837_v62 }
 0x79b   :  { %v8359_v35 = vpop.f32.mrb[8].mxu0 }
 0x79c   :  { %v8360_v63 = vpop.f32.mrb[9].mxu0 }
 0x79d   :  { %v8361_v0 = vadd.f32 %v8360_v63, %v8359_v35 }
 0x79f   :  { %v5914_v14 = vmul.f32 0.0078125, %v8361_v0 }
 0x7a1   :  { %8251 = vmatmul.mubr.msk.f32.vlgmr.msra.gmra.mrb[16].mxu1 %vm5915_vm10, %v5914_v14 }
 0x7a2   :  { %8556 = vmatpush3.bf16.msra.mxu1 %v11885_v61  ;;  %v5990_v61 = vlaneseq }
 0x7a3   :  { %8558 = vmatprep.subr.bf16.mxu1 %v11889_v41 }
 0x7a4   :  { %v12027_v41 = vshrl.u32 %v5990_v61, 7 }
 0x7a6   :  { %8560 = vmatpush3.bf16.msra.mxu1 %v11904_v1  ;;  %v12030_v1 = vsub.s32 0, %v12027_v41  ;;  %v12100_v12 = vsub.s32 1, %v12027_v41 }
 0x7a7   :  { %8562 = vmatprep.subr.bf16.mxu1 %v11907_v2 }
 0x7a8   :  { %v6176_v55 = vrot.slane %v6171_v43, %v12030_v1  ;;  %v6180_v10 = vrot.slane %v6171_v43, %v12100_v12  ;;  %v6190_v59 = vrot.slane %v6185_v24, %v12030_v1  ;;  %v6194_v62 = vrot.slane %v6185_v24, %v12100_v12 }
 0x7aa   :  { %8564 = vmatpush3.bf16.msra.mxu1 %v11922_v11 }
 0x7ab   :  { %8566 = vmatprep.subr.bf16.mxu1 %v11925_v23 }
 0x7ae   :  { %8568 = vmatpush3.bf16.msra.mxu1 %v11940_v16 }
 0x7af   :  { %8570 = vmatprep.subr.bf16.mxu1 %v11943_v49 }
 0x7b2   :  { %8572 = vmatpush3.bf16.msra.mxu1 %v11953_v38 }
 0x7b3   :  { %8574 = vmatprep.subr.bf16.mxu1 %v11962_v22 }
 0x7b6   :  { %8576 = vmatpush3.bf16.msra.mxu1 %v11970_v26 }
 0x7b7   :  { %8578 = vmatprep.subr.bf16.mxu1 %v8541_v27 }
 0x7ba   :  { %8580 = vmatpush3.bf16.msra.mxu1 %v8543_v36  ;;  %v9278_v36 = vld [vmem:[%s12236_s3 + $0xc8] sm:$0xff]  }
 0x7bb   :  { %8582 = vmatprep.subr.bf16.mxu1 %v8545_v40  ;;  %v9280_v40 = vld [vmem:[%s12236_s3 + $0xd0] sm:$0xff]  }
 0x7be   :  { %8584 = vmatpush3.bf16.msra.mxu1 %v8547_v17  ;;  %v9283_v17 = vld [vmem:[%s12236_s3 + $0x98] sm:$0xff]  }
 0x7bf   :  { %8586 = vmatprep.subr.bf16.mxu1 %v8549_v50  ;;  %v9287_v50 = vld [vmem:[%s12236_s3 + $0xa8] sm:$0xff]  }
 0x874   :  { %v5985_v2 = vpop.f32.mrb[16].mxu1 }
 0x875   :  { %v5993_v3 = vrot.slane %v5985_v2, %v12030_v1  ;;  %v5987_v6 = vpop.f32.mrb[17].mxu1 }
 0x876   :  { %v5997_v8 = vrot.slane %v5987_v6, %v12030_v1 }
 0x877   :  { %v12034_v9 = vsub.f32 %v5787_v29, %v5993_v3  ;;  %v9290_v29 = vld [vmem:[%s12236_s3 + $0xf8] sm:$0xff]  }
 0x878   :  { %v12036_v11 = vsub.f32 %v5789_v4, %v5997_v8  ;;  %v9292_v4 = vld [vmem:[%s12236_s3 + $0x40] sm:$0xff]  }
 0x879   :  { %v6000_v23 = vmul.f32 %v12034_v9, %v12034_v9 }
 0x87a   :  { %v6001_v30 = vmul.f32 %v12036_v11, %v12036_v11 }
 0x87b   :  { %v6002_v47 = vrot.slane %v6000_v23, 4 }
 0x87c   :  { %v6008_v13 = vrot.slane %v6001_v30, 4 }
 0x87d   :  { %v6003_v15 = vadd.f32 %v6002_v47, %v6000_v23 }
 0x87e   :  { %v6009_v16 = vadd.f32 %v6008_v13, %v6001_v30 }
 0x87f   :  { %v6004_v49 = vrot.slane %v6003_v15, 2 }
 0x880   :  { %v6010_v18 = vrot.slane %v6009_v16, 2 }
 0x881   :  { %v6005_v19 = vadd.f32 %v6004_v49, %v6003_v15  ;;  %v9293_v15 = vld [vmem:[%s12236_s3] sm:$0xff]  }
 0x882   :  { %v6011_v38 = vadd.f32 %v6010_v18, %v6009_v16  ;;  %v9294_v18 = vld [vmem:[%s12236_s3 + $0x48] sm:$0xff]  }
 0x883   :  { %v6006_v39 = vrot.slane %v6005_v19, 1 }
 0x884   :  { %v6012_v21 = vrot.slane %v6011_v38, 1 }
 0x885   :  { %v6007_v42 = vadd.f32 %v6006_v39, %v6005_v19  ;;  %v9295_v19 = vld [vmem:[%s12236_s3 + $0x8] sm:$0xff]   ;;  %v9297_v39 = vld [vmem:[%s12236_s3 + $0x10] sm:$0xff]  }
 0x886   :  { %v6013_v22 = vadd.f32 %v6012_v21, %v6011_v38  ;;  %v9296_v38 = vld [vmem:[%s12236_s3 + $0x50] sm:$0xff]   ;;  %v9298_v21 = vld [vmem:[%s12236_s3 + $0x58] sm:$0xff]  }
 0x888   :  { %6078 = vmatprep.mubr.f32.mxu1 %v6013_v22  ;;  %v9299_v22 = vld [vmem:[%s12236_s3 + $0x18] sm:$0xff]  }
 0x889   :  { %6079 = vmatmul.mubr.f32.vlgmr.msra.gmra.mrb[18].mxu1 %v6007_v42  ;;  %v9300_v42 = vld [vmem:[%s12236_s3 + $0x60] sm:$0xff]  }
 0x88a   :  { %8588 = vmatpush1.bf16.msra.mxu1 %v12010_v52  ;;  %6154 = vmatprep.mubr.f32.mxu1 %v9317_v37  ;;  %v9289_v52 = vld [vmem:[%s12236_s3 + $0xb0] sm:$0xff]  }
 0x88b   :  { %8397 = vmatprep.subr.bf16.mxu1 %v9276_v25  ;;  %v9301_v25 = vld [vmem:[%s12236_s3 + $0x20] sm:$0xff]  }
 0x95c   :  { %v8394_v26 = vpop.f32.mrb[18].mxu1 }
 0x95d   :  { %v8395_v28 = vpop.f32.mrb[19].mxu1 }
 0x95e   :  { %v8396_v31 = vadd.f32 %v8395_v28, %v8394_v26  ;;  %v9302_v26 = vld [vmem:[%s12236_s3 + $0x68] sm:$0xff]  }
 0x95f   :  { %v9303_v28 = vld [vmem:[%s12236_s3 + $0x28] sm:$0xff]  }
 0x960   :  { %v6084_v27 = vmul.f32 0.0078125, %v8396_v31  ;;  %v9304_v31 = vld [vmem:[%s12236_s3 + $0x70] sm:$0xff]  }
 0x962   :  { %v6085_v32 = vadd.f32 1e-05, %v6084_v27  ;;  %v9305_v27 = vld [vmem:[%s12236_s3 + $0x30] sm:$0xff]  }
 0x964   :  { %9308 = vrsqrt.f32 %v6085_v32  ;;  %v9306_v32 = vld [vmem:[%s12236_s3 + $0x78] sm:$0xff]  }
 0x96e   :  { %v9309_v20 = vpop.eup %9308 }
 0x96f   :  { %8252 = vmatmul.mubr.msk.f32.vlgmr.msra.gmra.mrb[20].mxu1 %vm5915_vm10, %v9309_v20  ;;  %v6561_v20 = vld [vmem:[%s12239_s9 + $0x8] sm:$0xff] }
 0x970   :  { %8398 = vmatpush3.bf16.msra.mxu1 %v9277_v33  ;;  %v9307_v33 = vld [vmem:[%s12236_s3 + $0x38] sm:$0xff]  }
 0x971   :  { %8399 = vmatprep.subr.bf16.mxu1 %v9278_v36  ;;  %v6560_v36 = vld [vmem:[%s12239_s9] sm:$0xff] }
 0x974   :  { %8400 = vmatpush3.bf16.msra.mxu1 %v9279_v5  ;;  %v8590_v5 = vpack.c.bf16 %v6561_v20, %v6560_v36  ;;  %v6911_v20 = vld [vmem:[%s12243_s4] sm:$0xf] }
 0x975   :  { %8401 = vmatprep.subr.bf16.mxu1 %v9280_v40  ;;  %v9318_v40 = vmov 0.0|0.0  }
 0x978   :  { %8402 = vmatpush3.bf16.msra.mxu1 %v9281_v44  ;;  %v6562_v44 = vld [vmem:[%s12239_s9 + $0x10] sm:$0xff] }
 0x979   :  { %8403 = vmatprep.subr.bf16.mxu1 %v9282_v45  ;;  %v6563_v45 = vld [vmem:[%s12239_s9 + $0x18] sm:$0xff] }
 0x97c   :  { %8404 = vmatpush3.bf16.msra.mxu1 %v9283_v17  ;;  %v8593_v17 = vpack.c.bf16 %v6563_v45, %v6562_v44  ;;  %v6920_v44 = vrot.slane %v6911_v20, %v12100_v12 }
 0x97d   :  { %8405 = vmatprep.subr.bf16.mxu1 %v9284_v34  ;;  %v6564_v34 = vld [vmem:[%s12239_s9 + $0x20] sm:$0xff] }
 0x980   :  { %8406 = vmatpush3.bf16.msra.mxu1 %v9285_v46  ;;  %v6565_v46 = vld [vmem:[%s12239_s9 + $0x28] sm:$0xff] }
 0x981   :  { %8407 = vmatprep.subr.bf16.mxu1 %v9286_v48  ;;  %v8596_v48 = vpack.c.bf16 %v6565_v46, %v6564_v34  ;;  %v6915_v34 = vrot.slane %v6911_v20, %v12030_v1 }
 0x984   :  { %8408 = vmatpush3.bf16.msra.mxu1 %v9287_v50  ;;  %v6566_v50 = vld [vmem:[%s12239_s9 + $0x30] sm:$0xff] }
 0x985   :  { %8409 = vmatprep.subr.bf16.mxu1 %v9288_v51  ;;  %v6567_v51 = vld [vmem:[%s12239_s9 + $0x38] sm:$0xff] }
 0x988   :  { %8410 = vmatpush3.bf16.msra.mxu1 %v9289_v52  ;;  %v8599_v52 = vpack.c.bf16 %v6567_v51, %v6566_v50 }
 0x989   :  { %8411 = vmatprep.subr.bf16.mxu1 %v9290_v29 }
 0x98c   :  { %8412 = vmatpush3.bf16.msra.mxu1 %v9291_v53 }
 0x98d   :  { %8419 = vmatprep.subr.bf16.mxu1 %v9292_v4 }
 0xa42   :  { %v6156_v7 = vpop.f32.mrb[20].mxu1 }
 0xa43   :  { %v6164_v54 = vrot.slane %v6156_v7, %v12030_v1  ;;  %v6158_v56 = vpop.f32.mrb[21].mxu1 }
 0xa44   :  { %v6168_v57 = vrot.slane %v6158_v56, %v12030_v1 }
 0xa45   :  { %v6169_v58 = vmul.f32 %v6164_v54, %v12034_v9 }
 0xa46   :  { %v6170_v60 = vmul.f32 %v6168_v57, %v12036_v11 }
 0xa47   :  { %v6183_v35 = vmul.f32 %v6176_v55, %v6169_v58 }
 0xa48   :  { %v6184_v63 = vmul.f32 %v6180_v10, %v6170_v60 }
 0xa49   :  { %v6197_v0 = vadd.f32 %v6190_v59, %v6183_v35 }
 0xa4a   :  { %v6198_v14 = vadd.f32 %v6194_v62, %v6184_v63  ;;  %v6568_v63 = vld [vmem:[%s12240_s10] sm:$0xff] }
 0xa4b   :  { %vm6199_vm11 = vcmp.gt.f32.partialorder %v6197_v0, 0.0  ;;  %v6201_v61 = vmul.f32 0.2, %v6197_v0 }
 0xa4c   :  { %v6202_v2 = vmul.f32 0.2, %v6198_v14  ;;  %vm6200_vm12 = vcmp.gt.f32.partialorder %v6198_v14, 0.0 }
 0xa4d   :  { %v6203_v3 = vsel %vm6199_vm11, %v6197_v0, %v6201_v61  ;;  %v6569_v0 = vld [vmem:[%s12240_s10 + $0x8] sm:$0xff] }
 0xa4e   :  { %v6204_v6 = vsel %vm6200_vm12, %v6198_v14, %v6202_v2  ;;  %v6205_v8 = vpack.c.bf16 %v6203_v3, %v6203_v3  ;;  %v8602_v61 = vpack.c.bf16 %v6569_v0, %v6568_v63 }
 0xa4f   :  { %v6206_v23 = vpack.c.bf16 %v6204_v6, %v6204_v6 }
 0xa50   :  { %v6209_v30 = vrot.slane %v6205_v8, 7 }
 0xa51   :  { %v6210_v9 = vrot.slane %v6206_v23, 7 }
 0xa52   :  { %v6212_v47 = vsel %vm2921_vm2, 0, %v6209_v30 }
 0xa53   :  { %v6215_v11 = vsel %vm2921_vm2, 0, %v6210_v9  ;;  %v6284_v16 = vrot.slane %v6212_v47, 1 }
 0xa54   :  { %v6285_v13 = vrot.slane %v6215_v11, 1 }
 0xa56   :  { %6416 = vmatprep.mubr.bf16.mxu1 %v6285_v13 }
 0xa57   :  { %6417 = vmatmul.mubr.bf16.vlgmr.msra.gmra.mrb[24].mxu1 %v6284_v16 }
 0xa58   :  { %8420 = vmatpush3.bf16.msra.mxu1 %v9293_v15  ;;  %8318 = vmatprep.mubr.msk.bf16.mxu1 %vm12119_vm13, %v6210_v9 }
 0xa59   :  { %8421 = vmatprep.subr.bf16.mxu1 %v9294_v18 }
 0xa5c   :  { %8422 = vmatpush3.bf16.msra.mxu1 %v9295_v19 }
 0xa5d   :  { %8423 = vmatprep.subr.bf16.mxu1 %v9296_v38 }
 0xa60   :  { %8424 = vmatpush3.bf16.msra.mxu1 %v9297_v39 }
 0xa61   :  { %8425 = vmatprep.subr.bf16.mxu1 %v9298_v21 }
 0xa64   :  { %8426 = vmatpush3.bf16.msra.mxu1 %v9299_v22 }
 0xa65   :  { %8427 = vmatprep.subr.bf16.mxu1 %v9300_v42 }
 0xa68   :  { %8428 = vmatpush3.bf16.msra.mxu1 %v9301_v25 }
 0xa69   :  { %8429 = vmatprep.subr.bf16.mxu1 %v9302_v26 }
 0xa6c   :  { %8430 = vmatpush3.bf16.msra.mxu1 %v9303_v28 }
 0xa6d   :  { %8431 = vmatprep.subr.bf16.mxu1 %v9304_v31 }
 0xa70   :  { %8432 = vmatpush3.bf16.msra.mxu1 %v9305_v27  ;;  %v8325_v27 = vld [vmem:[%s12241_s11] ss:$0 sm:$0xff] }
 0xa71   :  { %8433 = vmatprep.subr.bf16.mxu1 %v9306_v32 }
 0xa74   :  { %8434 = vmatpush3.bf16.msra.mxu1 %v9307_v33  ;;  %v6928_v33 = vsub.s32 2, %v12027_v41 }
 0xa75   :  { %8589 = vmatprep.subr.bf16.mxu1 %v9318_v40 }
 0xa76   :  { %v6929_v45 = vrot.slane %v6911_v20, %v6928_v33 }
 0xa77   :  { %8320 = vmatmul.mubr.msk.bf16.vlgmr.msra.gmra.mrb[28].mxu1 %vm12119_vm13, %v6209_v30 }
 0xa78   :  { %8591 = vmatpush3.bf16.msra.mxu1 %v8590_v5  ;;  %8481 = vmatprep.mubr.msk.f32.mxu1 %vm9319_vm14, %v9317_v37 }
 0xa79   :  { %8592 = vmatprep.subr.bf16.mxu1 %v9318_v40 }
 0xa7c   :  { %8594 = vmatpush3.bf16.msra.mxu1 %v8593_v17 }
 0xa7d   :  { %8595 = vmatprep.subr.bf16.mxu1 %v9318_v40 }
 0xa80   :  { %8597 = vmatpush3.bf16.msra.mxu1 %v8596_v48 }
 0xa81   :  { %8598 = vmatprep.subr.bf16.mxu1 %v9318_v40 }
 0xa84   :  { %8600 = vmatpush3.bf16.msra.mxu1 %v8599_v52 }
 0xa85   :  { %8601 = vmatprep.subr.bf16.mxu1 %v9318_v40 }
 0xb2a   :  { %v8413_v29 = vpop.f32.mrb[24].mxu1 }
 0xb2b   :  { %v8414_v53 = vpop.f32.mrb[25].mxu1 }
 0xb2c   :  { %v8415_v4 = vadd.f32 %v8414_v53, %v8413_v29  ;;  %v8416_v43 = vpop.f32.mrb[26].mxu1 }
 0xb2d   :  { %v8417_v7 = vpop.f32.mrb[27].mxu1 }
 0xb4a   :  { %v8435_v24 = vpop.f32.mrb[28].mxu1 }
 0xb4b   :  { %v8436_v54 = vpop.f32.mrb[29].mxu1 }
 0xb4c   :  { %v8437_v55 = vadd.f32 %v8436_v54, %v8435_v24  ;;  %v8438_v56 = vpop.f32.mrb[30].mxu1 }
 0xb4d   :  { %v8439_v57 = vpop.f32.mrb[31].mxu1 }
 0xb4e   :  { %v6555_v10 = vadd.f32 %v8437_v55, %v8415_v4 }
 0xb50   :  { %v6571_v58 = vsel %vm6570_vm15, %v6555_v10, 0.0 }
 0xb51   :  { %v6572_v59 = vrot.slane %v6571_v58, 4 }
 0xb53   :  { %v6573_v60 = vadd.f32 %v6572_v59, %v6571_v58 }
 0xb55   :  { %v6574_v62 = vrot.slane %v6573_v60, 2 }
 0xb57   :  { %v6575_v35 = vadd.f32 %v6574_v62, %v6573_v60 }
 0xb59   :  { %v6576_v14 = vrot.slane %v6575_v35, 1 }
 0xb5b   :  { %v6577_v2 = vadd.f32 %v6576_v14, %v6575_v35 }
 0xb5d   :  { %8482 = vmatmul.mubr.msk.f32.vlgmr.msra.gmra.mrb[22].mxu1 %vm6570_vm15, %v6577_v2 }
 0xb5e   :  { %8603 = vmatpush3.bf16.msra.mxu1 %v8602_v61  ;;  %8488 = vmatprep.mubr.msk.f32.mxu1 %vm9319_vm14, %v9317_v37 }
 0xb5f   :  { %8604 = vmatprep.subr.bf16.mxu1 %v9318_v40 }
 0xc30   :  { %v6647_v3 = vpop.f32.mrb[22].mxu1 }
 0xc31   :  { %v6651_v6 = vmul.f32 0.03125, %v6647_v3  ;;  %v8483_v8 = vpop.f32.mrb[23].mxu1 }
 0xc33   :  { %8489 = vmatmul.mubr.msk.f32.vlgmr.msra.gmra.mrb[32].mxu1 %vm5915_vm10, %v6651_v6 }
 0xc34   :  { %8606 = vmatpush3.bf16.msra.mxu1 %v8590_v5  ;;  %8507 = vmatprep.mubr.msk.f32.mxu1 %vm9319_vm14, %v9317_v37  ;;  %v6937_v5 = vsub.s32 3, %v12027_v41 }
 0xc35   :  { %8607 = vmatprep.subr.bf16.mxu1 %v9318_v40 }
 0xc36   :  { %v6938_v46 = vrot.slane %v6911_v20, %v6937_v5 }
 0xc38   :  { %8609 = vmatpush3.bf16.msra.mxu1 %v8593_v17 }
 0xc39   :  { %8610 = vmatprep.subr.bf16.mxu1 %v9318_v40 }
 0xc3c   :  { %8612 = vmatpush3.bf16.msra.mxu1 %v8596_v48 }
 0xc3d   :  { %8613 = vmatprep.subr.bf16.mxu1 %v9318_v40 }
 0xc40   :  { %8615 = vmatpush3.bf16.msra.mxu1 %v8599_v52 }
 0xc41   :  { %8616 = vmatprep.subr.bf16.mxu1 %v9318_v40 }
 0xd06   :  { %v6721_v23 = vpop.f32.mrb[32].mxu1 }
 0xd07   :  { %v6728_v30 = vrot.slane %v6721_v23, %v12030_v1  ;;  %v8490_v9 = vpop.f32.mrb[33].mxu1 }
 0xd09   :  { %v6729_v47 = vsub.f32 %v6555_v10, %v6728_v30 }
 0xd0b   :  { %v6730_v11 = vmul.f32 %v6729_v47, %v6729_v47 }
 0xd0d   :  { %v6731_v13 = vsel %vm6570_vm15, %v6730_v11, 0.0 }
 0xd0e   :  { %v6732_v15 = vrot.slane %v6731_v13, 4 }
 0xd10   :  { %v6733_v16 = vadd.f32 %v6732_v15, %v6731_v13 }
 0xd12   :  { %v6734_v49 = vrot.slane %v6733_v16, 2 }
 0xd14   :  { %v6735_v18 = vadd.f32 %v6734_v49, %v6733_v16 }
 0xd16   :  { %v6736_v19 = vrot.slane %v6735_v18, 1 }
 0xd18   :  { %v6737_v38 = vadd.f32 %v6736_v19, %v6735_v18 }
 0xd1a   :  { %8508 = vmatmul.mubr.msk.f32.vlgmr.msra.gmra.mrb[34].mxu1 %vm6570_vm15, %v6737_v38 }
 0xd1b   :  { %8618 = vmatpush3.bf16.msra.mxu1 %v8602_v61  ;;  %8514 = vmatprep.mubr.msk.f32.mxu1 %vm9319_vm14, %v9317_v37  ;;  %v8326_v37 = vld [vmem:[%s12242_s12] ss:$0 sm:$0xff] }
 0xded   :  { %v6807_v39 = vpop.f32.mrb[34].mxu1 }
 0xdee   :  { %v6811_v21 = vmul.f32 0.03125, %v6807_v39  ;;  %v8509_v22 = vpop.f32.mrb[35].mxu1 }
 0xdf0   :  { %v6812_v42 = vadd.f32 1e-05, %v6811_v21 }
 0xdf2   :  { %9310 = vrsqrt.f32 %v6812_v42 }
 0xdfc   :  { %v9311_v25 = vpop.eup %9310 }
 0xdfd   :  { %8515 = vmatmul.mubr.msk.f32.vlgmr.msra.gmra.mrb[36].mxu1 %vm5915_vm10, %v9311_v25 }
 0xed0   :  { %v6883_v26 = vpop.f32.mrb[36].mxu1 }
 0xed1   :  { %v6890_v28 = vrot.slane %v6883_v26, %v12030_v1  ;;  %v8516_v31 = vpop.f32.mrb[37].mxu1 }
 0xed3   :  { %v6891_v32 = vmul.f32 %v6890_v28, %v6729_v47 }
 0xed5   :  { %v6899_v36 = vmul.f32 %v8325_v27, %v6891_v32 }
 0xed7   :  { %v6907_v40 = vadd.f32 %v8326_v37, %v6899_v36 }
 0xed9   :  { %v6909_v17 = vmul.f32 0.2, %v6907_v40  ;;  %vm6908_vm0 = vcmp.gt.f32.partialorder %v6907_v40, 0.0 }
 0xedb   :  { %v6910_v48 = vsel %vm6908_vm0, %v6907_v40, %v6909_v17 }
 0xedc   :  { %v6921_v50 = vmul.f32 %v6920_v44, %v6910_v48  ;;  %v6930_v51 = vmul.f32 %v6929_v45, %v6910_v48  ;;  %v6916_v52 = vmul.f32 %v6915_v34, %v6910_v48  ;;  %v6939_v53 = vmul.f32 %v6938_v46, %v6910_v48 }
 0xede   :  { %v6923_v29 = vrot.slane %v6921_v50, 2  ;;  %v6932_v43 = vrot.slane %v6930_v51, 4  ;;  %v6941_v24 = vrot.slane %v6939_v53, 6 }
 0xee0   :  { %v6925_v4 = vadd.f32 %v6923_v29, %v6916_v52 }
 0xee2   :  { %v6934_v7 = vadd.f32 %v6932_v43, %v6925_v4 }
 0xee4   :  { %v6943_v41 = vadd.f32 %v6941_v24, %v6934_v7 }
 0xee6   :  { %v6945_v54 = vsel %vm6944_vm1, %v6943_v41, 0.0 }
 0xee7   :  { %6946 = vadd.xlane.f32.xlu0 %v6945_v54 }
 0xf74   :  { %v6947_v12 = vpop.xlane.xlu0 %6946 }
 0xf75   :  { %v6948_v55 = vsub.f32 0.0, %v6947_v12 }
 0xf77   :  { %v6949_v56 = vmul.f32 1.442695, %v6948_v55 }
 0xf79   :  { %9312 = vpow2.f32 %v6949_v56 }
 0xf83   :  { %v9313_v1 = vpop.eup %9312 }
 0xf84   :  { %v6951_v57 = vadd.f32 1.0, %v9313_v1 }
 0xf86   :  { %9314 = vrcp.f32 %v6951_v57 }
 0xf90   :  { %v9315_v10 = vpop.eup %9314 }
 0xf91   :  { %6954 = vst [vmem:[%s12244_s13] sm:$0x3] %v9315_v10 }

</bundles_post_ra>
